<compile_context>
chip_gen: v7x
topology: tpu7x:2x2x1
jax: 0.10.0
libtpu: 0.0.40
codegen_flags: <defaults>
</compile_context>

<pallas_src>
import math
import jax
import jax.numpy as jnp
from jax import lax
from jax.experimental import pallas as pl
from jax.experimental.pallas import tpu as pltpu


def _make_fused_layer_kernel(S, Se, N, D, F, H, eps=1e-6):
    dh = D // H
    scale = 1.0 / math.sqrt(dh)
    f32 = jnp.float32
    bf16 = jnp.bfloat16

    def kernel(x_ref, y_ref, e_ref, em_ref,
               na_ref, nb_ref,
               wq_ref, bq_ref, wkv_ref, bkv_ref, wo_ref, bo_ref,
               w1_ref, b1_ref, w2_ref, b2_ref,
               xo_ref, yo_ref):
        x = x_ref[0].astype(f32)            # (S, D)
        y = y_ref[0].astype(f32)            # (S, D)

        # Causal (target) additive bias built in-kernel: no (B,S,S) HBM DMA.
        # TODO(synk): assumes the standard lower-triangular trg_mask of the
        #             reference decoder; an arbitrary trg_mask would instead be
        #             passed as a compact bf16 additive bias like enc_dec_mask.
        rows = lax.broadcasted_iota(jnp.int32, (S, S), 0)
        cols = lax.broadcasted_iota(jnp.int32, (S, S), 1)
        causal_bias = jnp.where(rows >= cols, 0.0, -1e9).astype(f32)     # (S, S)

        em_bias = em_ref[0].astype(f32)     # (S, Se) enc-dec additive bias

        def norm(v, idx):
            a = na_ref[idx]                 # (1, D)
            b = nb_ref[idx]                 # (1, D)
            mean = jnp.mean(v, axis=-1, keepdims=True)
            d = v - mean
            var = jnp.sum(d * d, axis=-1, keepdims=True) * (1.0 / (D - 1))
            std = jnp.sqrt(var)             # unbiased std (torch.std default)
            return a * d / (std + eps) + b  # exact divide (parity with reference)

        def attention(q_in, kv_chunks, idx):
            """q_in: (Sq, D) f32.  kv_chunks: list of (kv (Sk,D), bias (Sq,Sk)|None).
            Joint softmax across all chunks (running max / denominator).  Every
            matmul is a head-leading batched einsum; heads never sliced."""
            wq = wq_ref[idx]                # (H, D, dh)    bf16
            wkv = wkv_ref[idx]              # (H, D, 2*dh)  bf16
            wo = wo_ref[idx]                # (H, dh, D)    bf16
            Sq = q_in.shape[0]

            q_b = jnp.broadcast_to(q_in.astype(bf16), (H, Sq, D))
            qh = jnp.einsum('hsd,hdk->hsk', q_b, wq,
                            preferred_element_type=f32) + bq_ref[idx]    # (H,Sq,dh)
            qh = (qh * scale).astype(bf16)

            # pass 1: per-chunk scores (+bias), running row max
            s_list, v_list = [], []
            m = jnp.full((H, Sq, 1), -1e30, dtype=f32)
            for kv, bias in kv_chunks:
                Sk = kv.shape[0]
                kv_b = jnp.broadcast_to(kv.astype(bf16), (H, Sk, D))
                kvh = jnp.einsum('hsd,hdk->hsk', kv_b, wkv,
                                 preferred_element_type=f32) + bkv_ref[idx]
                kh = kvh[..., :dh].astype(bf16)                          # (H,Sk,dh)
                vh = kvh[..., dh:].astype(bf16)                          # (H,Sk,dh)
                s = jnp.einsum('hqd,hkd->hqk', qh, kh,
                               preferred_element_type=f32)               # (H,Sq,Sk)
                if bias is not None:
                    s = s + bias[None, :, :]
                s_list.append(s)
                v_list.append(vh)
                m = jnp.maximum(m, jnp.max(s, axis=-1, keepdims=True))

            # pass 2: joint softmax across chunks + weighted values
            l = jnp.zeros((H, Sq, 1), dtype=f32)
            ctx = jnp.zeros((H, Sq, dh), dtype=f32)
            for s, vh in zip(s_list, v_list):
                p = jnp.exp(s - m)
                l = l + jnp.sum(p, axis=-1, keepdims=True)
                ctx = ctx + jnp.einsum('hqk,hkd->hqd', p.astype(bf16), vh,
                                       preferred_element_type=f32)
            ctx = (ctx * pl.reciprocal(l, approx=True)).astype(bf16)

            # output projection: per-head (dh,D) matmuls, head-sum on the VPU
            out_h = jnp.einsum('hqd,hdk->hqk', ctx, wo,
                               preferred_element_type=f32)               # (H,Sq,D)
            return jnp.sum(out_h, axis=0) + bo_ref[idx]                  # (Sq, D)

        # ---- x2 = norm_1(x); x, y = attn_2(x2, y, trg_mask); x = x + dropout_1(x) ----
        x2 = norm(x, 0)
        x_attn = attention(x2, [(y, causal_bias)], 0)    # duplex, x path
        y = attention(y, [(x2, None)], 1)                # duplex, y path (all-ones mask)
        x = x_attn + x_attn                              # dropout = identity

        # ---- x2 = norm_2(x); x = attn_1(x2, y, trg_mask); x = x + dropout_2(x) -------
        x2 = norm(x, 1)
        x_attn = attention(x2, [(y, causal_bias)], 2)    # simplex (uses updated y)
        x = x_attn + x_attn

        # ---- x2 = norm_3(x); x = x2 + dropout_3(attn_3(x2, e_outputs, enc_dec_mask)) -
        x2 = norm(x, 2)
        e_all = e_ref[0]                                 # (N, Se, D) bf16
        ml_chunks = [(e_all[n], em_bias) for n in range(N)]   # layer loop on key axis
        x = x2 + attention(x2, ml_chunks, 3)

        # ---- x2 = norm_4(x); x = x2 + dropout_4(ff(x2)) -------------------------------
        x2 = norm(x, 3)
        # Conv1d(k=3, pad=1) over seq: three matmuls on +/-1 shifted activations.
        # Shifts use pltpu.roll (XLU sublane rotate) + edge-row zeroing -> no
        # (S,S) shift-matrix matmuls on the MXU, no HBM padding.
        row = lax.broadcasted_iota(jnp.int32, (S, 1), 0)
        first = row == 0
        last = row == S - 1

        def shift_prev(v):   # out[l] = v[l-1], zero at l == 0
            return jnp.where(first, 0.0, pltpu.roll(v, 1, 0))

        def shift_next(v):   # out[l] = v[l+1], zero at l == S-1
            return jnp.where(last, 0.0, pltpu.roll(v, S - 1, 0))

        x2b = x2.astype(bf16)
        h = (jnp.dot(shift_prev(x2).astype(bf16), w1_ref[0], preferred_element_type=f32)
             + jnp.dot(x2b, w1_ref[1], preferred_element_type=f32)
             + jnp.dot(shift_next(x2).astype(bf16), w1_ref[2], preferred_element_type=f32)
             + b1_ref[...])
        h = jnp.maximum(h, 0.0)

        ff = (jnp.dot(shift_prev(h).astype(bf16), w2_ref[0], preferred_element_type=f32)
              + jnp.dot(h.astype(bf16), w2_ref[1], preferred_element_type=f32)
              + jnp.dot(shift_next(h).astype(bf16), w2_ref[2], preferred_element_type=f32)
              + b2_ref[...])
        x = x2 + ff

        xo_ref[0] = x.astype(xo_ref.dtype)
        yo_ref[0] = y.astype(yo_ref.dtype)

    return kernel


def alternating_decoder_layer_conv2(x, y, e_outputs, enc_dec_mask, trg_mask,
                                    params, heads):
    B, S, D = x.shape
    _, N, Se, _ = e_outputs.shape
    F = params["ff_w1"].shape[2]
    H = heads
    dh = D // H
    bf16 = jnp.bfloat16

    # trg_mask is regenerated causally inside the kernel (no (B,S,S) DMA).
    del trg_mask
    # compact additive enc-dec bias, bf16 (halves the mask DMA vs f32).
    em_bias = jnp.where(enc_dec_mask.reshape(B, S, Se) == 0, -1e9, 0.0).astype(bf16)

    # Head-split weight layouts so every in-kernel matmul is a head-leading
    # batched einsum (no in-kernel lane slicing / transposes / concats).  At
    # production these packs would be done once at parameter-load time.
    wq = params["attn_wq"].reshape(4, D, H, dh).transpose(0, 2, 1, 3).astype(bf16)
    bq = params["attn_bq"].reshape(4, 1, H, dh).transpose(0, 2, 1, 3)
    wk = params["attn_wkv"][:, :, :D].reshape(4, D, H, dh)
    wv = params["attn_wkv"][:, :, D:].reshape(4, D, H, dh)
    wkv = jnp.concatenate([wk, wv], axis=-1).transpose(0, 2, 1, 3).astype(bf16)
    bk = params["attn_bkv"][:, :, :D].reshape(4, 1, H, dh)
    bv = params["attn_bkv"][:, :, D:].reshape(4, 1, H, dh)
    bkv = jnp.concatenate([bk, bv], axis=-1).transpose(0, 2, 1, 3)
    wo = params["attn_wo"].reshape(4, H, dh, D).astype(bf16)
    bo = params["attn_bo"]

    kernel = _make_fused_layer_kernel(S, Se, N, D, F, H)

    per_b3 = lambda b: (b, 0, 0)
    per_b4 = lambda b: (b, 0, 0, 0)
    c2 = lambda b: (0, 0)
    c3 = lambda b: (0, 0, 0)
    c4 = lambda b: (0, 0, 0, 0)

    out_x, out_y = pl.pallas_call(
        kernel,
        out_shape=(jax.ShapeDtypeStruct((B, S, D), jnp.float32),
                   jax.ShapeDtypeStruct((B, S, D), jnp.float32)),
        grid=(B,),
        in_specs=[
            pl.BlockSpec((1, S, D), per_b3),         # x (bf16)
            pl.BlockSpec((1, S, D), per_b3),         # y (bf16)
            pl.BlockSpec((1, N, Se, D), per_b4),     # encoder outputs, per-layer chunks
            pl.BlockSpec((1, S, Se), per_b3),        # enc-dec additive bias (bf16)
            pl.BlockSpec((4, 1, D), c3),             # norm alpha (norm_1..norm_4)
            pl.BlockSpec((4, 1, D), c3),             # norm bias
            pl.BlockSpec((4, H, D, dh), c4),         # wq  [attn2_x, attn2_y, attn1, attn3]
            pl.BlockSpec((4, H, 1, dh), c4),         # bq
            pl.BlockSpec((4, H, D, 2 * dh), c4),     # wkv (K|V fused per head)
            pl.BlockSpec((4, H, 1, 2 * dh), c4),     # bkv
            pl.BlockSpec((4, H, dh, D), c4),         # wo
            pl.BlockSpec((4, 1, D), c3),             # bo
            pl.BlockSpec((3, D, F), c3),             # ff conv1 weight taps
            pl.BlockSpec((1, F), c2),                # ff conv1 bias
            pl.BlockSpec((3, F, D), c3),             # ff conv2 weight taps
            pl.BlockSpec((1, D), c2),                # ff conv2 bias
        ],
        out_specs=(pl.BlockSpec((1, S, D), per_b3),
                   pl.BlockSpec((1, S, D), per_b3)),
        compiler_params=pltpu.CompilerParams(
            dimension_semantics=("parallel",),       # batch axis -> both TCs on v7x
            vmem_limit_bytes=48 * 1024 * 1024),
    )(x.astype(bf16), y.astype(bf16), e_outputs.astype(bf16), em_bias,
      params["norm_alpha"], params["norm_bias"],
      wq, bq, wkv, bkv, wo, bo,
      params["ff_w1"].astype(bf16), params["ff_b1"],
      params["ff_w2"].astype(bf16), params["ff_b2"])
    return out_x, out_y


# ----------------------------------------------------------------------------
# Parameter init (deterministic, synthetic)
# ----------------------------------------------------------------------------

def init_params(key, d_model, d_ff):
    ka = jax.random.split(key, 8)
    return {
        "norm_alpha": jnp.ones((4, 1, d_model), jnp.float32),
        "norm_bias": jnp.zeros((4, 1, d_model), jnp.float32),
        # attention path order: [attn_2 x-path, attn_2 y-path, attn_1, attn_3]
        "attn_wq": jax.random.normal(ka[0], (4, d_model, d_model), jnp.float32) * 0.02,
        "attn_bq": jax.random.normal(ka[1], (4, 1, d_model), jnp.float32) * 0.02,
        "attn_wkv": jax.random.normal(ka[2], (4, d_model, 2 * d_model), jnp.float32) * 0.02,
        "attn_bkv": jax.random.normal(ka[3], (4, 1, 2 * d_model), jnp.float32) * 0.02,
        "attn_wo": jax.random.normal(ka[4], (4, d_model, d_model), jnp.float32) * 0.02,
        "attn_bo": jax.random.normal(ka[5], (4, 1, d_model), jnp.float32) * 0.02,
        "ff_w1": jax.random.normal(ka[6], (3, d_model, d_ff), jnp.float32) * 0.02,
        "ff_b1": jnp.zeros((1, d_ff), jnp.float32),
        "ff_w2": jax.random.normal(ka[7], (3, d_ff, d_model), jnp.float32) * 0.02,
        "ff_b2": jnp.zeros((1, d_model), jnp.float32),
    }


# ----------------------------------------------------------------------------
# Main
# ----------------------------------------------------------------------------

if __name__ == "__main__":
    B, S, Se, D, H, F, N = 2, 8, 8, 32, 4, 64, 2

    key = jax.random.PRNGKey(0)
    k_x, k_y, k_e, k_p = jax.random.split(key, 4)

    x = jax.random.normal(k_x, (B, S, D), jnp.float32)
    y = jax.random.normal(k_y, (B, S, D), jnp.float32)
    e_outputs = jax.random.normal(k_e, (B, N, Se, D), jnp.float32)

    trg_mask = jnp.tril(jnp.ones((S, S), jnp.float32))[None, None].repeat(B, axis=0)
    enc_dec_mask = jnp.ones((B, 1, S, Se), jnp.float32)

    params = init_params(k_p, D, F)

    fwd = jax.jit(lambda a, b_, c, d_, e_: alternating_decoder_layer_conv2(
        a, b_, c, d_, e_, params, H))

    out_x, out_y = fwd(x, y, e_outputs, enc_dec_mask, trg_mask)
    jax.block_until_ready((out_x, out_y))

    assert out_x.shape == (B, S, D) and out_y.shape == (B, S, D)
    assert bool(jnp.all(jnp.isfinite(out_x))) and bool(jnp.all(jnp.isfinite(out_y)))
    print("KERNEL_OK")
</pallas_src>

<mosaic_0001>
module attributes {stable_mosaic.version = 11 : i64} {
  func.func @kernel(%arg0: i32, %arg1: memref<1x8x32xbf16, #tpu.memory_space<vmem>>, %arg2: memref<1x8x32xbf16, #tpu.memory_space<vmem>>, %arg3: memref<1x2x8x32xbf16, #tpu.memory_space<vmem>>, %arg4: memref<1x8x8xbf16, #tpu.memory_space<vmem>>, %arg5: memref<4x1x32xf32, #tpu.memory_space<vmem>>, %arg6: memref<4x1x32xf32, #tpu.memory_space<vmem>>, %arg7: memref<4x4x32x8xbf16, #tpu.memory_space<vmem>>, %arg8: memref<4x4x1x8xf32, #tpu.memory_space<vmem>>, %arg9: memref<4x4x32x16xbf16, #tpu.memory_space<vmem>>, %arg10: memref<4x4x1x16xf32, #tpu.memory_space<vmem>>, %arg11: memref<4x4x8x32xbf16, #tpu.memory_space<vmem>>, %arg12: memref<4x1x32xf32, #tpu.memory_space<vmem>>, %arg13: memref<3x32x64xbf16, #tpu.memory_space<vmem>>, %arg14: memref<1x64xf32, #tpu.memory_space<vmem>>, %arg15: memref<3x64x32xbf16, #tpu.memory_space<vmem>>, %arg16: memref<1x32xf32, #tpu.memory_space<vmem>>, %arg17: memref<1x8x32xf32, #tpu.memory_space<vmem>>, %arg18: memref<1x8x32xf32, #tpu.memory_space<vmem>>) attributes {dimension_semantics = [#tpu.dimension_semantics<parallel>], iteration_bounds = array<i64: 2>, scalar_prefetch = 0 : i64, scratch_operands = 0 : i64, tpu.core_type = #tpu.core_type<tc>, window_params = [{transform_indices = @transform_0, window_bounds = array<i64: 1, 8, 32>}, {transform_indices = @transform_1, window_bounds = array<i64: 1, 8, 32>}, {transform_indices = @transform_2, window_bounds = array<i64: 1, 2, 8, 32>}, {transform_indices = @transform_3, window_bounds = array<i64: 1, 8, 8>}, {pipeline_mode = #tpu.pipeline_mode<synchronous>, transform_indices = @transform_4, window_bounds = array<i64: 4, 1, 32>}, {pipeline_mode = #tpu.pipeline_mode<synchronous>, transform_indices = @transform_5, window_bounds = array<i64: 4, 1, 32>}, {pipeline_mode = #tpu.pipeline_mode<synchronous>, transform_indices = @transform_6, window_bounds = array<i64: 4, 4, 32, 8>}, {pipeline_mode = #tpu.pipeline_mode<synchronous>, transform_indices = @transform_7, window_bounds = array<i64: 4, 4, 1, 8>}, {pipeline_mode = #tpu.pipeline_mode<synchronous>, transform_indices = @transform_8, window_bounds = array<i64: 4, 4, 32, 16>}, {pipeline_mode = #tpu.pipeline_mode<synchronous>, transform_indices = @transform_9, window_bounds = array<i64: 4, 4, 1, 16>}, {pipeline_mode = #tpu.pipeline_mode<synchronous>, transform_indices = @transform_10, window_bounds = array<i64: 4, 4, 8, 32>}, {pipeline_mode = #tpu.pipeline_mode<synchronous>, transform_indices = @transform_11, window_bounds = array<i64: 4, 1, 32>}, {pipeline_mode = #tpu.pipeline_mode<synchronous>, transform_indices = @transform_12, window_bounds = array<i64: 3, 32, 64>}, {pipeline_mode = #tpu.pipeline_mode<synchronous>, transform_indices = @transform_13, window_bounds = array<i64: 1, 64>}, {pipeline_mode = #tpu.pipeline_mode<synchronous>, transform_indices = @transform_14, window_bounds = array<i64: 3, 64, 32>}, {pipeline_mode = #tpu.pipeline_mode<synchronous>, transform_indices = @transform_15, window_bounds = array<i64: 1, 32>}, {transform_indices = @transform_16, window_bounds = array<i64: 1, 8, 32>}, {transform_indices = @transform_17, window_bounds = array<i64: 1, 8, 32>}]} {
    %c0 = arith.constant 0 : index
    %c0_0 = arith.constant 0 : index
    %c0_1 = arith.constant 0 : index
    %0 = vector.load %arg1[%c0, %c0_0, %c0_1] : memref<1x8x32xbf16, #tpu.memory_space<vmem>>, vector<1x8x32xbf16>
    %1 = vector.shape_cast %0 : vector<1x8x32xbf16> to vector<8x32xbf16>
    %2 = arith.extf %1 : vector<8x32xbf16> to vector<8x32xf32>
    %c0_2 = arith.constant 0 : index
    %c0_3 = arith.constant 0 : index
    %c0_4 = arith.constant 0 : index
    %3 = vector.load %arg2[%c0_2, %c0_3, %c0_4] : memref<1x8x32xbf16, #tpu.memory_space<vmem>>, vector<1x8x32xbf16>
    %4 = vector.shape_cast %3 : vector<1x8x32xbf16> to vector<8x32xbf16>
    %5 = arith.extf %4 : vector<8x32xbf16> to vector<8x32xf32>
    %6 = tpu.iota {dimensions = array<i32: 0>} : vector<8x8xi32>
    %7 = tpu.iota {dimensions = array<i32: 1>} : vector<8x8xi32>
    %8 = arith.cmpi sge, %6, %7 : vector<8x8xi32>
    %cst = arith.constant 0.000000e+00 : f32
    %cst_5 = arith.constant -1.000000e+09 : f32
    %9 = vector.broadcast %cst : f32 to vector<8x8xf32>
    %10 = vector.broadcast %cst_5 : f32 to vector<8x8xf32>
    %11 = arith.select %8, %9, %10 : vector<8x8xi1>, vector<8x8xf32>
    %c0_6 = arith.constant 0 : index
    %c0_7 = arith.constant 0 : index
    %c0_8 = arith.constant 0 : index
    %12 = vector.load %arg4[%c0_6, %c0_7, %c0_8] : memref<1x8x8xbf16, #tpu.memory_space<vmem>>, vector<1x8x8xbf16>
    %13 = vector.shape_cast %12 : vector<1x8x8xbf16> to vector<8x8xbf16>
    %14 = arith.extf %13 : vector<8x8xbf16> to vector<8x8xf32>
    %c0_9 = arith.constant 0 : index
    %c0_10 = arith.constant 0 : index
    %c0_11 = arith.constant 0 : index
    %15 = vector.load %arg5[%c0_9, %c0_10, %c0_11] : memref<4x1x32xf32, #tpu.memory_space<vmem>>, vector<1x1x32xf32>
    %16 = vector.shape_cast %15 : vector<1x1x32xf32> to vector<1x32xf32>
    %c0_12 = arith.constant 0 : index
    %c0_13 = arith.constant 0 : index
    %c0_14 = arith.constant 0 : index
    %17 = vector.load %arg6[%c0_12, %c0_13, %c0_14] : memref<4x1x32xf32, #tpu.memory_space<vmem>>, vector<1x1x32xf32>
    %18 = vector.shape_cast %17 : vector<1x1x32xf32> to vector<1x32xf32>
    %cst_15 = arith.constant dense<0.000000e+00> : vector<8xf32>
    %19 = vector.multi_reduction <add>, %2, %cst_15 [1] : vector<8x32xf32> to vector<8xf32>
    %20 = vector.shape_cast %19 : vector<8xf32> to vector<8x1xf32>
    %cst_16 = arith.constant 3.200000e+01 : f32
    %21 = vector.broadcast %cst_16 : f32 to vector<8x1xf32>
    %22 = arith.divf %20, %21 : vector<8x1xf32>
    %23 = vector.broadcast %22 : vector<8x1xf32> to vector<8x32xf32>
    %24 = arith.subf %2, %23 : vector<8x32xf32>
    %25 = arith.mulf %24, %24 : vector<8x32xf32>
    %cst_17 = arith.constant dense<0.000000e+00> : vector<8xf32>
    %26 = vector.multi_reduction <add>, %25, %cst_17 [1] : vector<8x32xf32> to vector<8xf32>
    %27 = vector.shape_cast %26 : vector<8xf32> to vector<8x1xf32>
    %cst_18 = arith.constant 0.0322580636 : f32
    %28 = vector.broadcast %cst_18 : f32 to vector<8x1xf32>
    %29 = arith.mulf %27, %28 : vector<8x1xf32>
    %30 = math.sqrt %29 : vector<8x1xf32>
    %31 = vector.broadcast %16 : vector<1x32xf32> to vector<8x32xf32>
    %32 = arith.mulf %31, %24 : vector<8x32xf32>
    %cst_19 = arith.constant 9.99999997E-7 : f32
    %33 = vector.broadcast %cst_19 : f32 to vector<8x1xf32>
    %34 = arith.addf %30, %33 : vector<8x1xf32>
    %35 = vector.broadcast %34 : vector<8x1xf32> to vector<8x32xf32>
    %36 = arith.divf %32, %35 : vector<8x32xf32>
    %37 = vector.broadcast %18 : vector<1x32xf32> to vector<8x32xf32>
    %38 = arith.addf %36, %37 : vector<8x32xf32>
    %c0_20 = arith.constant 0 : index
    %c0_21 = arith.constant 0 : index
    %c0_22 = arith.constant 0 : index
    %c0_23 = arith.constant 0 : index
    %39 = vector.load %arg7[%c0_20, %c0_21, %c0_22, %c0_23] : memref<4x4x32x8xbf16, #tpu.memory_space<vmem>>, vector<1x4x32x8xbf16>
    %40 = vector.shape_cast %39 : vector<1x4x32x8xbf16> to vector<4x32x8xbf16>
    %c0_24 = arith.constant 0 : index
    %c0_25 = arith.constant 0 : index
    %c0_26 = arith.constant 0 : index
    %c0_27 = arith.constant 0 : index
    %41 = vector.load %arg9[%c0_24, %c0_25, %c0_26, %c0_27] : memref<4x4x32x16xbf16, #tpu.memory_space<vmem>>, vector<1x4x32x16xbf16>
    %42 = vector.shape_cast %41 : vector<1x4x32x16xbf16> to vector<4x32x16xbf16>
    %c0_28 = arith.constant 0 : index
    %c0_29 = arith.constant 0 : index
    %c0_30 = arith.constant 0 : index
    %c0_31 = arith.constant 0 : index
    %43 = vector.load %arg11[%c0_28, %c0_29, %c0_30, %c0_31] : memref<4x4x8x32xbf16, #tpu.memory_space<vmem>>, vector<1x4x8x32xbf16>
    %44 = vector.shape_cast %43 : vector<1x4x8x32xbf16> to vector<4x8x32xbf16>
    %45 = arith.truncf %38 : vector<8x32xf32> to vector<8x32xbf16>
    %46 = vector.shape_cast %45 : vector<8x32xbf16> to vector<1x8x32xbf16>
    %47 = vector.broadcast %46 : vector<1x8x32xbf16> to vector<4x8x32xbf16>
    "tpu.trace_start"() <{level = 10 : i32, message = "hsd,hdk->hsk"}> : () -> ()
    %cst_32 = arith.constant dense<0.000000e+00> : vector<4x8x8xf32>
    %48 = tpu.matmul %47, %40, %cst_32 {dimension_numbers = #tpu.dot_dimension_numbers<[2], [1], [1], [2], [0, 0, 0, 1, 1, 2], [0], [0]>} : vector<4x8x32xbf16>, vector<4x32x8xbf16>, vector<4x8x8xf32> -> vector<4x8x8xf32>
    "tpu.trace_stop"() : () -> ()
    %c0_33 = arith.constant 0 : index
    %c0_34 = arith.constant 0 : index
    %c0_35 = arith.constant 0 : index
    %c0_36 = arith.constant 0 : index
    %49 = vector.load %arg8[%c0_33, %c0_34, %c0_35, %c0_36] : memref<4x4x1x8xf32, #tpu.memory_space<vmem>>, vector<1x4x1x8xf32>
    %50 = vector.shape_cast %49 : vector<1x4x1x8xf32> to vector<4x1x8xf32>
    %51 = vector.broadcast %50 : vector<4x1x8xf32> to vector<4x8x8xf32>
    %52 = arith.addf %48, %51 : vector<4x8x8xf32>
    %cst_37 = arith.constant 0.353553385 : f32
    %53 = vector.broadcast %cst_37 : f32 to vector<4x8x8xf32>
    %54 = arith.mulf %52, %53 : vector<4x8x8xf32>
    %55 = arith.truncf %54 : vector<4x8x8xf32> to vector<4x8x8xbf16>
    %cst_38 = arith.constant -1.000000e+30 : f32
    %56 = vector.broadcast %cst_38 : f32 to vector<4x8x1xf32>
    %57 = arith.truncf %5 : vector<8x32xf32> to vector<8x32xbf16>
    %58 = vector.shape_cast %57 : vector<8x32xbf16> to vector<1x8x32xbf16>
    %59 = vector.broadcast %58 : vector<1x8x32xbf16> to vector<4x8x32xbf16>
    "tpu.trace_start"() <{level = 10 : i32, message = "hsd,hdk->hsk"}> : () -> ()
    %cst_39 = arith.constant dense<0.000000e+00> : vector<4x8x16xf32>
    %60 = tpu.matmul %59, %42, %cst_39 {dimension_numbers = #tpu.dot_dimension_numbers<[2], [1], [1], [2], [0, 0, 0, 1, 1, 2], [0], [0]>} : vector<4x8x32xbf16>, vector<4x32x16xbf16>, vector<4x8x16xf32> -> vector<4x8x16xf32>
    "tpu.trace_stop"() : () -> ()
    %c0_40 = arith.constant 0 : index
    %c0_41 = arith.constant 0 : index
    %c0_42 = arith.constant 0 : index
    %c0_43 = arith.constant 0 : index
    %61 = vector.load %arg10[%c0_40, %c0_41, %c0_42, %c0_43] : memref<4x4x1x16xf32, #tpu.memory_space<vmem>>, vector<1x4x1x16xf32>
    %62 = vector.shape_cast %61 : vector<1x4x1x16xf32> to vector<4x1x16xf32>
    %63 = vector.broadcast %62 : vector<4x1x16xf32> to vector<4x8x16xf32>
    %64 = arith.addf %60, %63 : vector<4x8x16xf32>
    %65 = vector.extract_strided_slice %64 {offsets = [0, 0, 0], sizes = [4, 8, 8], strides = [1, 1, 1]} : vector<4x8x16xf32> to vector<4x8x8xf32>
    %66 = arith.truncf %65 : vector<4x8x8xf32> to vector<4x8x8xbf16>
    %67 = vector.extract_strided_slice %64 {offsets = [0, 0, 8], sizes = [4, 8, 8], strides = [1, 1, 1]} : vector<4x8x16xf32> to vector<4x8x8xf32>
    %68 = arith.truncf %67 : vector<4x8x8xf32> to vector<4x8x8xbf16>
    "tpu.trace_start"() <{level = 10 : i32, message = "hqd,hkd->hqk"}> : () -> ()
    %cst_44 = arith.constant dense<0.000000e+00> : vector<4x8x8xf32>
    %69 = tpu.matmul %55, %66, %cst_44 {dimension_numbers = #tpu.dot_dimension_numbers<[2], [2], [1], [1], [0, 0, 0, 1, 1, 1], [0], [0]>} : vector<4x8x8xbf16>, vector<4x8x8xbf16>, vector<4x8x8xf32> -> vector<4x8x8xf32>
    "tpu.trace_stop"() : () -> ()
    %70 = vector.shape_cast %11 : vector<8x8xf32> to vector<1x8x8xf32>
    %71 = vector.broadcast %70 : vector<1x8x8xf32> to vector<4x8x8xf32>
    %72 = arith.addf %69, %71 : vector<4x8x8xf32>
    %cst_45 = arith.constant dense<0xFF800000> : vector<4x8xf32>
    %73 = vector.multi_reduction <maximumf>, %72, %cst_45 [2] : vector<4x8x8xf32> to vector<4x8xf32>
    %74 = vector.shape_cast %73 : vector<4x8xf32> to vector<4x8x1xf32>
    %75 = arith.maximumf %56, %74 : vector<4x8x1xf32>
    %cst_46 = arith.constant 0.000000e+00 : f32
    %76 = vector.broadcast %cst_46 : f32 to vector<4x8x1xf32>
    %cst_47 = arith.constant 0.000000e+00 : f32
    %77 = vector.broadcast %cst_47 : f32 to vector<4x8x8xf32>
    %78 = vector.broadcast %75 : vector<4x8x1xf32> to vector<4x8x8xf32>
    %79 = arith.subf %72, %78 : vector<4x8x8xf32>
    %80 = math.exp %79 : vector<4x8x8xf32>
    %cst_48 = arith.constant dense<0.000000e+00> : vector<4x8xf32>
    %81 = vector.multi_reduction <add>, %80, %cst_48 [2] : vector<4x8x8xf32> to vector<4x8xf32>
    %82 = vector.shape_cast %81 : vector<4x8xf32> to vector<4x8x1xf32>
    %83 = arith.addf %76, %82 : vector<4x8x1xf32>
    %84 = arith.truncf %80 : vector<4x8x8xf32> to vector<4x8x8xbf16>
    "tpu.trace_start"() <{level = 10 : i32, message = "hqk,hkd->hqd"}> : () -> ()
    %cst_49 = arith.constant dense<0.000000e+00> : vector<4x8x8xf32>
    %85 = tpu.matmul %84, %68, %cst_49 {dimension_numbers = #tpu.dot_dimension_numbers<[2], [1], [1], [2], [0, 0, 0, 1, 1, 2], [0], [0]>} : vector<4x8x8xbf16>, vector<4x8x8xbf16>, vector<4x8x8xf32> -> vector<4x8x8xf32>
    "tpu.trace_stop"() : () -> ()
    %86 = arith.addf %77, %85 : vector<4x8x8xf32>
    %87 = tpu.reciprocal %83 {approx = true} : vector<4x8x1xf32> -> vector<4x8x1xf32>
    %88 = vector.broadcast %87 : vector<4x8x1xf32> to vector<4x8x8xf32>
    %89 = arith.mulf %86, %88 : vector<4x8x8xf32>
    %90 = arith.truncf %89 : vector<4x8x8xf32> to vector<4x8x8xbf16>
    "tpu.trace_start"() <{level = 10 : i32, message = "hqd,hdk->hqk"}> : () -> ()
    %cst_50 = arith.constant dense<0.000000e+00> : vector<4x8x32xf32>
    %91 = tpu.matmul %90, %44, %cst_50 {dimension_numbers = #tpu.dot_dimension_numbers<[2], [1], [1], [2], [0, 0, 0, 1, 1, 2], [0], [0]>} : vector<4x8x8xbf16>, vector<4x8x32xbf16>, vector<4x8x32xf32> -> vector<4x8x32xf32>
    "tpu.trace_stop"() : () -> ()
    %cst_51 = arith.constant dense<0.000000e+00> : vector<8x32xf32>
    %92 = vector.multi_reduction <add>, %91, %cst_51 [0] : vector<4x8x32xf32> to vector<8x32xf32>
    %c0_52 = arith.constant 0 : index
    %c0_53 = arith.constant 0 : index
    %c0_54 = arith.constant 0 : index
    %93 = vector.load %arg12[%c0_52, %c0_53, %c0_54] : memref<4x1x32xf32, #tpu.memory_space<vmem>>, vector<1x1x32xf32>
    %94 = vector.shape_cast %93 : vector<1x1x32xf32> to vector<1x32xf32>
    %95 = vector.broadcast %94 : vector<1x32xf32> to vector<8x32xf32>
    %96 = arith.addf %92, %95 : vector<8x32xf32>
    %c1 = arith.constant 1 : index
    %c0_55 = arith.constant 0 : index
    %c0_56 = arith.constant 0 : index
    %c0_57 = arith.constant 0 : index
    %97 = vector.load %arg7[%c1, %c0_55, %c0_56, %c0_57] : memref<4x4x32x8xbf16, #tpu.memory_space<vmem>>, vector<1x4x32x8xbf16>
    %98 = vector.shape_cast %97 : vector<1x4x32x8xbf16> to vector<4x32x8xbf16>
    %c1_58 = arith.constant 1 : index
    %c0_59 = arith.constant 0 : index
    %c0_60 = arith.constant 0 : index
    %c0_61 = arith.constant 0 : index
    %99 = vector.load %arg9[%c1_58, %c0_59, %c0_60, %c0_61] : memref<4x4x32x16xbf16, #tpu.memory_space<vmem>>, vector<1x4x32x16xbf16>
    %100 = vector.shape_cast %99 : vector<1x4x32x16xbf16> to vector<4x32x16xbf16>
    %c1_62 = arith.constant 1 : index
    %c0_63 = arith.constant 0 : index
    %c0_64 = arith.constant 0 : index
    %c0_65 = arith.constant 0 : index
    %101 = vector.load %arg11[%c1_62, %c0_63, %c0_64, %c0_65] : memref<4x4x8x32xbf16, #tpu.memory_space<vmem>>, vector<1x4x8x32xbf16>
    %102 = vector.shape_cast %101 : vector<1x4x8x32xbf16> to vector<4x8x32xbf16>
    %103 = arith.truncf %5 : vector<8x32xf32> to vector<8x32xbf16>
    %104 = vector.shape_cast %103 : vector<8x32xbf16> to vector<1x8x32xbf16>
    %105 = vector.broadcast %104 : vector<1x8x32xbf16> to vector<4x8x32xbf16>
    "tpu.trace_start"() <{level = 10 : i32, message = "hsd,hdk->hsk"}> : () -> ()
    %cst_66 = arith.constant dense<0.000000e+00> : vector<4x8x8xf32>
    %106 = tpu.matmul %105, %98, %cst_66 {dimension_numbers = #tpu.dot_dimension_numbers<[2], [1], [1], [2], [0, 0, 0, 1, 1, 2], [0], [0]>} : vector<4x8x32xbf16>, vector<4x32x8xbf16>, vector<4x8x8xf32> -> vector<4x8x8xf32>
    "tpu.trace_stop"() : () -> ()
    %c1_67 = arith.constant 1 : index
    %c0_68 = arith.constant 0 : index
    %c0_69 = arith.constant 0 : index
    %c0_70 = arith.constant 0 : index
    %107 = vector.load %arg8[%c1_67, %c0_68, %c0_69, %c0_70] : memref<4x4x1x8xf32, #tpu.memory_space<vmem>>, vector<1x4x1x8xf32>
    %108 = vector.shape_cast %107 : vector<1x4x1x8xf32> to vector<4x1x8xf32>
    %109 = vector.broadcast %108 : vector<4x1x8xf32> to vector<4x8x8xf32>
    %110 = arith.addf %106, %109 : vector<4x8x8xf32>
    %cst_71 = arith.constant 0.353553385 : f32
    %111 = vector.broadcast %cst_71 : f32 to vector<4x8x8xf32>
    %112 = arith.mulf %110, %111 : vector<4x8x8xf32>
    %113 = arith.truncf %112 : vector<4x8x8xf32> to vector<4x8x8xbf16>
    %cst_72 = arith.constant -1.000000e+30 : f32
    %114 = vector.broadcast %cst_72 : f32 to vector<4x8x1xf32>
    %115 = arith.truncf %38 : vector<8x32xf32> to vector<8x32xbf16>
    %116 = vector.shape_cast %115 : vector<8x32xbf16> to vector<1x8x32xbf16>
    %117 = vector.broadcast %116 : vector<1x8x32xbf16> to vector<4x8x32xbf16>
    "tpu.trace_start"() <{level = 10 : i32, message = "hsd,hdk->hsk"}> : () -> ()
    %cst_73 = arith.constant dense<0.000000e+00> : vector<4x8x16xf32>
    %118 = tpu.matmul %117, %100, %cst_73 {dimension_numbers = #tpu.dot_dimension_numbers<[2], [1], [1], [2], [0, 0, 0, 1, 1, 2], [0], [0]>} : vector<4x8x32xbf16>, vector<4x32x16xbf16>, vector<4x8x16xf32> -> vector<4x8x16xf32>
    "tpu.trace_stop"() : () -> ()
    %c1_74 = arith.constant 1 : index
    %c0_75 = arith.constant 0 : index
    %c0_76 = arith.constant 0 : index
    %c0_77 = arith.constant 0 : index
    %119 = vector.load %arg10[%c1_74, %c0_75, %c0_76, %c0_77] : memref<4x4x1x16xf32, #tpu.memory_space<vmem>>, vector<1x4x1x16xf32>
    %120 = vector.shape_cast %119 : vector<1x4x1x16xf32> to vector<4x1x16xf32>
    %121 = vector.broadcast %120 : vector<4x1x16xf32> to vector<4x8x16xf32>
    %122 = arith.addf %118, %121 : vector<4x8x16xf32>
    %123 = vector.extract_strided_slice %122 {offsets = [0, 0, 0], sizes = [4, 8, 8], strides = [1, 1, 1]} : vector<4x8x16xf32> to vector<4x8x8xf32>
    %124 = arith.truncf %123 : vector<4x8x8xf32> to vector<4x8x8xbf16>
    %125 = vector.extract_strided_slice %122 {offsets = [0, 0, 8], sizes = [4, 8, 8], strides = [1, 1, 1]} : vector<4x8x16xf32> to vector<4x8x8xf32>
    %126 = arith.truncf %125 : vector<4x8x8xf32> to vector<4x8x8xbf16>
    "tpu.trace_start"() <{level = 10 : i32, message = "hqd,hkd->hqk"}> : () -> ()
    %cst_78 = arith.constant dense<0.000000e+00> : vector<4x8x8xf32>
    %127 = tpu.matmul %113, %124, %cst_78 {dimension_numbers = #tpu.dot_dimension_numbers<[2], [2], [1], [1], [0, 0, 0, 1, 1, 1], [0], [0]>} : vector<4x8x8xbf16>, vector<4x8x8xbf16>, vector<4x8x8xf32> -> vector<4x8x8xf32>
    "tpu.trace_stop"() : () -> ()
    %cst_79 = arith.constant dense<0xFF800000> : vector<4x8xf32>
    %128 = vector.multi_reduction <maximumf>, %127, %cst_79 [2] : vector<4x8x8xf32> to vector<4x8xf32>
    %129 = vector.shape_cast %128 : vector<4x8xf32> to vector<4x8x1xf32>
    %130 = arith.maximumf %114, %129 : vector<4x8x1xf32>
    %cst_80 = arith.constant 0.000000e+00 : f32
    %131 = vector.broadcast %cst_80 : f32 to vector<4x8x1xf32>
    %cst_81 = arith.constant 0.000000e+00 : f32
    %132 = vector.broadcast %cst_81 : f32 to vector<4x8x8xf32>
    %133 = vector.broadcast %130 : vector<4x8x1xf32> to vector<4x8x8xf32>
    %134 = arith.subf %127, %133 : vector<4x8x8xf32>
    %135 = math.exp %134 : vector<4x8x8xf32>
    %cst_82 = arith.constant dense<0.000000e+00> : vector<4x8xf32>
    %136 = vector.multi_reduction <add>, %135, %cst_82 [2] : vector<4x8x8xf32> to vector<4x8xf32>
    %137 = vector.shape_cast %136 : vector<4x8xf32> to vector<4x8x1xf32>
    %138 = arith.addf %131, %137 : vector<4x8x1xf32>
    %139 = arith.truncf %135 : vector<4x8x8xf32> to vector<4x8x8xbf16>
    "tpu.trace_start"() <{level = 10 : i32, message = "hqk,hkd->hqd"}> : () -> ()
    %cst_83 = arith.constant dense<0.000000e+00> : vector<4x8x8xf32>
    %140 = tpu.matmul %139, %126, %cst_83 {dimension_numbers = #tpu.dot_dimension_numbers<[2], [1], [1], [2], [0, 0, 0, 1, 1, 2], [0], [0]>} : vector<4x8x8xbf16>, vector<4x8x8xbf16>, vector<4x8x8xf32> -> vector<4x8x8xf32>
    "tpu.trace_stop"() : () -> ()
    %141 = arith.addf %132, %140 : vector<4x8x8xf32>
    %142 = tpu.reciprocal %138 {approx = true} : vector<4x8x1xf32> -> vector<4x8x1xf32>
    %143 = vector.broadcast %142 : vector<4x8x1xf32> to vector<4x8x8xf32>
    %144 = arith.mulf %141, %143 : vector<4x8x8xf32>
    %145 = arith.truncf %144 : vector<4x8x8xf32> to vector<4x8x8xbf16>
    "tpu.trace_start"() <{level = 10 : i32, message = "hqd,hdk->hqk"}> : () -> ()
    %cst_84 = arith.constant dense<0.000000e+00> : vector<4x8x32xf32>
    %146 = tpu.matmul %145, %102, %cst_84 {dimension_numbers = #tpu.dot_dimension_numbers<[2], [1], [1], [2], [0, 0, 0, 1, 1, 2], [0], [0]>} : vector<4x8x8xbf16>, vector<4x8x32xbf16>, vector<4x8x32xf32> -> vector<4x8x32xf32>
    "tpu.trace_stop"() : () -> ()
    %cst_85 = arith.constant dense<0.000000e+00> : vector<8x32xf32>
    %147 = vector.multi_reduction <add>, %146, %cst_85 [0] : vector<4x8x32xf32> to vector<8x32xf32>
    %c1_86 = arith.constant 1 : index
    %c0_87 = arith.constant 0 : index
    %c0_88 = arith.constant 0 : index
    %148 = vector.load %arg12[%c1_86, %c0_87, %c0_88] : memref<4x1x32xf32, #tpu.memory_space<vmem>>, vector<1x1x32xf32>
    %149 = vector.shape_cast %148 : vector<1x1x32xf32> to vector<1x32xf32>
    %150 = vector.broadcast %149 : vector<1x32xf32> to vector<8x32xf32>
    %151 = arith.addf %147, %150 : vector<8x32xf32>
    %152 = arith.addf %96, %96 : vector<8x32xf32>
    %c1_89 = arith.constant 1 : index
    %c0_90 = arith.constant 0 : index
    %c0_91 = arith.constant 0 : index
    %153 = vector.load %arg5[%c1_89, %c0_90, %c0_91] : memref<4x1x32xf32, #tpu.memory_space<vmem>>, vector<1x1x32xf32>
    %154 = vector.shape_cast %153 : vector<1x1x32xf32> to vector<1x32xf32>
    %c1_92 = arith.constant 1 : index
    %c0_93 = arith.constant 0 : index
    %c0_94 = arith.constant 0 : index
    %155 = vector.load %arg6[%c1_92, %c0_93, %c0_94] : memref<4x1x32xf32, #tpu.memory_space<vmem>>, vector<1x1x32xf32>
    %156 = vector.shape_cast %155 : vector<1x1x32xf32> to vector<1x32xf32>
    %cst_95 = arith.constant dense<0.000000e+00> : vector<8xf32>
    %157 = vector.multi_reduction <add>, %152, %cst_95 [1] : vector<8x32xf32> to vector<8xf32>
    %158 = vector.shape_cast %157 : vector<8xf32> to vector<8x1xf32>
    %cst_96 = arith.constant 3.200000e+01 : f32
    %159 = vector.broadcast %cst_96 : f32 to vector<8x1xf32>
    %160 = arith.divf %158, %159 : vector<8x1xf32>
    %161 = vector.broadcast %160 : vector<8x1xf32> to vector<8x32xf32>
    %162 = arith.subf %152, %161 : vector<8x32xf32>
    %163 = arith.mulf %162, %162 : vector<8x32xf32>
    %cst_97 = arith.constant dense<0.000000e+00> : vector<8xf32>
    %164 = vector.multi_reduction <add>, %163, %cst_97 [1] : vector<8x32xf32> to vector<8xf32>
    %165 = vector.shape_cast %164 : vector<8xf32> to vector<8x1xf32>
    %cst_98 = arith.constant 0.0322580636 : f32
    %166 = vector.broadcast %cst_98 : f32 to vector<8x1xf32>
    %167 = arith.mulf %165, %166 : vector<8x1xf32>
    %168 = math.sqrt %167 : vector<8x1xf32>
    %169 = vector.broadcast %154 : vector<1x32xf32> to vector<8x32xf32>
    %170 = arith.mulf %169, %162 : vector<8x32xf32>
    %cst_99 = arith.constant 9.99999997E-7 : f32
    %171 = vector.broadcast %cst_99 : f32 to vector<8x1xf32>
    %172 = arith.addf %168, %171 : vector<8x1xf32>
    %173 = vector.broadcast %172 : vector<8x1xf32> to vector<8x32xf32>
    %174 = arith.divf %170, %173 : vector<8x32xf32>
    %175 = vector.broadcast %156 : vector<1x32xf32> to vector<8x32xf32>
    %176 = arith.addf %174, %175 : vector<8x32xf32>
    %c2 = arith.constant 2 : index
    %c0_100 = arith.constant 0 : index
    %c0_101 = arith.constant 0 : index
    %c0_102 = arith.constant 0 : index
    %177 = vector.load %arg7[%c2, %c0_100, %c0_101, %c0_102] : memref<4x4x32x8xbf16, #tpu.memory_space<vmem>>, vector<1x4x32x8xbf16>
    %178 = vector.shape_cast %177 : vector<1x4x32x8xbf16> to vector<4x32x8xbf16>
    %c2_103 = arith.constant 2 : index
    %c0_104 = arith.constant 0 : index
    %c0_105 = arith.constant 0 : index
    %c0_106 = arith.constant 0 : index
    %179 = vector.load %arg9[%c2_103, %c0_104, %c0_105, %c0_106] : memref<4x4x32x16xbf16, #tpu.memory_space<vmem>>, vector<1x4x32x16xbf16>
    %180 = vector.shape_cast %179 : vector<1x4x32x16xbf16> to vector<4x32x16xbf16>
    %c2_107 = arith.constant 2 : index
    %c0_108 = arith.constant 0 : index
    %c0_109 = arith.constant 0 : index
    %c0_110 = arith.constant 0 : index
    %181 = vector.load %arg11[%c2_107, %c0_108, %c0_109, %c0_110] : memref<4x4x8x32xbf16, #tpu.memory_space<vmem>>, vector<1x4x8x32xbf16>
    %182 = vector.shape_cast %181 : vector<1x4x8x32xbf16> to vector<4x8x32xbf16>
    %183 = arith.truncf %176 : vector<8x32xf32> to vector<8x32xbf16>
    %184 = vector.shape_cast %183 : vector<8x32xbf16> to vector<1x8x32xbf16>
    %185 = vector.broadcast %184 : vector<1x8x32xbf16> to vector<4x8x32xbf16>
    "tpu.trace_start"() <{level = 10 : i32, message = "hsd,hdk->hsk"}> : () -> ()
    %cst_111 = arith.constant dense<0.000000e+00> : vector<4x8x8xf32>
    %186 = tpu.matmul %185, %178, %cst_111 {dimension_numbers = #tpu.dot_dimension_numbers<[2], [1], [1], [2], [0, 0, 0, 1, 1, 2], [0], [0]>} : vector<4x8x32xbf16>, vector<4x32x8xbf16>, vector<4x8x8xf32> -> vector<4x8x8xf32>
    "tpu.trace_stop"() : () -> ()
    %c2_112 = arith.constant 2 : index
    %c0_113 = arith.constant 0 : index
    %c0_114 = arith.constant 0 : index
    %c0_115 = arith.constant 0 : index
    %187 = vector.load %arg8[%c2_112, %c0_113, %c0_114, %c0_115] : memref<4x4x1x8xf32, #tpu.memory_space<vmem>>, vector<1x4x1x8xf32>
    %188 = vector.shape_cast %187 : vector<1x4x1x8xf32> to vector<4x1x8xf32>
    %189 = vector.broadcast %188 : vector<4x1x8xf32> to vector<4x8x8xf32>
    %190 = arith.addf %186, %189 : vector<4x8x8xf32>
    %cst_116 = arith.constant 0.353553385 : f32
    %191 = vector.broadcast %cst_116 : f32 to vector<4x8x8xf32>
    %192 = arith.mulf %190, %191 : vector<4x8x8xf32>
    %193 = arith.truncf %192 : vector<4x8x8xf32> to vector<4x8x8xbf16>
    %cst_117 = arith.constant -1.000000e+30 : f32
    %194 = vector.broadcast %cst_117 : f32 to vector<4x8x1xf32>
    %195 = arith.truncf %151 : vector<8x32xf32> to vector<8x32xbf16>
    %196 = vector.shape_cast %195 : vector<8x32xbf16> to vector<1x8x32xbf16>
    %197 = vector.broadcast %196 : vector<1x8x32xbf16> to vector<4x8x32xbf16>
    "tpu.trace_start"() <{level = 10 : i32, message = "hsd,hdk->hsk"}> : () -> ()
    %cst_118 = arith.constant dense<0.000000e+00> : vector<4x8x16xf32>
    %198 = tpu.matmul %197, %180, %cst_118 {dimension_numbers = #tpu.dot_dimension_numbers<[2], [1], [1], [2], [0, 0, 0, 1, 1, 2], [0], [0]>} : vector<4x8x32xbf16>, vector<4x32x16xbf16>, vector<4x8x16xf32> -> vector<4x8x16xf32>
    "tpu.trace_stop"() : () -> ()
    %c2_119 = arith.constant 2 : index
    %c0_120 = arith.constant 0 : index
    %c0_121 = arith.constant 0 : index
    %c0_122 = arith.constant 0 : index
    %199 = vector.load %arg10[%c2_119, %c0_120, %c0_121, %c0_122] : memref<4x4x1x16xf32, #tpu.memory_space<vmem>>, vector<1x4x1x16xf32>
    %200 = vector.shape_cast %199 : vector<1x4x1x16xf32> to vector<4x1x16xf32>
    %201 = vector.broadcast %200 : vector<4x1x16xf32> to vector<4x8x16xf32>
    %202 = arith.addf %198, %201 : vector<4x8x16xf32>
    %203 = vector.extract_strided_slice %202 {offsets = [0, 0, 0], sizes = [4, 8, 8], strides = [1, 1, 1]} : vector<4x8x16xf32> to vector<4x8x8xf32>
    %204 = arith.truncf %203 : vector<4x8x8xf32> to vector<4x8x8xbf16>
    %205 = vector.extract_strided_slice %202 {offsets = [0, 0, 8], sizes = [4, 8, 8], strides = [1, 1, 1]} : vector<4x8x16xf32> to vector<4x8x8xf32>
    %206 = arith.truncf %205 : vector<4x8x8xf32> to vector<4x8x8xbf16>
    "tpu.trace_start"() <{level = 10 : i32, message = "hqd,hkd->hqk"}> : () -> ()
    %cst_123 = arith.constant dense<0.000000e+00> : vector<4x8x8xf32>
    %207 = tpu.matmul %193, %204, %cst_123 {dimension_numbers = #tpu.dot_dimension_numbers<[2], [2], [1], [1], [0, 0, 0, 1, 1, 1], [0], [0]>} : vector<4x8x8xbf16>, vector<4x8x8xbf16>, vector<4x8x8xf32> -> vector<4x8x8xf32>
    "tpu.trace_stop"() : () -> ()
    %208 = vector.shape_cast %11 : vector<8x8xf32> to vector<1x8x8xf32>
    %209 = vector.broadcast %208 : vector<1x8x8xf32> to vector<4x8x8xf32>
    %210 = arith.addf %207, %209 : vector<4x8x8xf32>
    %cst_124 = arith.constant dense<0xFF800000> : vector<4x8xf32>
    %211 = vector.multi_reduction <maximumf>, %210, %cst_124 [2] : vector<4x8x8xf32> to vector<4x8xf32>
    %212 = vector.shape_cast %211 : vector<4x8xf32> to vector<4x8x1xf32>
    %213 = arith.maximumf %194, %212 : vector<4x8x1xf32>
    %cst_125 = arith.constant 0.000000e+00 : f32
    %214 = vector.broadcast %cst_125 : f32 to vector<4x8x1xf32>
    %cst_126 = arith.constant 0.000000e+00 : f32
    %215 = vector.broadcast %cst_126 : f32 to vector<4x8x8xf32>
    %216 = vector.broadcast %213 : vector<4x8x1xf32> to vector<4x8x8xf32>
    %217 = arith.subf %210, %216 : vector<4x8x8xf32>
    %218 = math.exp %217 : vector<4x8x8xf32>
    %cst_127 = arith.constant dense<0.000000e+00> : vector<4x8xf32>
    %219 = vector.multi_reduction <add>, %218, %cst_127 [2] : vector<4x8x8xf32> to vector<4x8xf32>
    %220 = vector.shape_cast %219 : vector<4x8xf32> to vector<4x8x1xf32>
    %221 = arith.addf %214, %220 : vector<4x8x1xf32>
    %222 = arith.truncf %218 : vector<4x8x8xf32> to vector<4x8x8xbf16>
    "tpu.trace_start"() <{level = 10 : i32, message = "hqk,hkd->hqd"}> : () -> ()
    %cst_128 = arith.constant dense<0.000000e+00> : vector<4x8x8xf32>
    %223 = tpu.matmul %222, %206, %cst_128 {dimension_numbers = #tpu.dot_dimension_numbers<[2], [1], [1], [2], [0, 0, 0, 1, 1, 2], [0], [0]>} : vector<4x8x8xbf16>, vector<4x8x8xbf16>, vector<4x8x8xf32> -> vector<4x8x8xf32>
    "tpu.trace_stop"() : () -> ()
    %224 = arith.addf %215, %223 : vector<4x8x8xf32>
    %225 = tpu.reciprocal %221 {approx = true} : vector<4x8x1xf32> -> vector<4x8x1xf32>
    %226 = vector.broadcast %225 : vector<4x8x1xf32> to vector<4x8x8xf32>
    %227 = arith.mulf %224, %226 : vector<4x8x8xf32>
    %228 = arith.truncf %227 : vector<4x8x8xf32> to vector<4x8x8xbf16>
    "tpu.trace_start"() <{level = 10 : i32, message = "hqd,hdk->hqk"}> : () -> ()
    %cst_129 = arith.constant dense<0.000000e+00> : vector<4x8x32xf32>
    %229 = tpu.matmul %228, %182, %cst_129 {dimension_numbers = #tpu.dot_dimension_numbers<[2], [1], [1], [2], [0, 0, 0, 1, 1, 2], [0], [0]>} : vector<4x8x8xbf16>, vector<4x8x32xbf16>, vector<4x8x32xf32> -> vector<4x8x32xf32>
    "tpu.trace_stop"() : () -> ()
    %cst_130 = arith.constant dense<0.000000e+00> : vector<8x32xf32>
    %230 = vector.multi_reduction <add>, %229, %cst_130 [0] : vector<4x8x32xf32> to vector<8x32xf32>
    %c2_131 = arith.constant 2 : index
    %c0_132 = arith.constant 0 : index
    %c0_133 = arith.constant 0 : index
    %231 = vector.load %arg12[%c2_131, %c0_132, %c0_133] : memref<4x1x32xf32, #tpu.memory_space<vmem>>, vector<1x1x32xf32>
    %232 = vector.shape_cast %231 : vector<1x1x32xf32> to vector<1x32xf32>
    %233 = vector.broadcast %232 : vector<1x32xf32> to vector<8x32xf32>
    %234 = arith.addf %230, %233 : vector<8x32xf32>
    %235 = arith.addf %234, %234 : vector<8x32xf32>
    %c2_134 = arith.constant 2 : index
    %c0_135 = arith.constant 0 : index
    %c0_136 = arith.constant 0 : index
    %236 = vector.load %arg5[%c2_134, %c0_135, %c0_136] : memref<4x1x32xf32, #tpu.memory_space<vmem>>, vector<1x1x32xf32>
    %237 = vector.shape_cast %236 : vector<1x1x32xf32> to vector<1x32xf32>
    %c2_137 = arith.constant 2 : index
    %c0_138 = arith.constant 0 : index
    %c0_139 = arith.constant 0 : index
    %238 = vector.load %arg6[%c2_137, %c0_138, %c0_139] : memref<4x1x32xf32, #tpu.memory_space<vmem>>, vector<1x1x32xf32>
    %239 = vector.shape_cast %238 : vector<1x1x32xf32> to vector<1x32xf32>
    %cst_140 = arith.constant dense<0.000000e+00> : vector<8xf32>
    %240 = vector.multi_reduction <add>, %235, %cst_140 [1] : vector<8x32xf32> to vector<8xf32>
    %241 = vector.shape_cast %240 : vector<8xf32> to vector<8x1xf32>
    %cst_141 = arith.constant 3.200000e+01 : f32
    %242 = vector.broadcast %cst_141 : f32 to vector<8x1xf32>
    %243 = arith.divf %241, %242 : vector<8x1xf32>
    %244 = vector.broadcast %243 : vector<8x1xf32> to vector<8x32xf32>
    %245 = arith.subf %235, %244 : vector<8x32xf32>
    %246 = arith.mulf %245, %245 : vector<8x32xf32>
    %cst_142 = arith.constant dense<0.000000e+00> : vector<8xf32>
    %247 = vector.multi_reduction <add>, %246, %cst_142 [1] : vector<8x32xf32> to vector<8xf32>
    %248 = vector.shape_cast %247 : vector<8xf32> to vector<8x1xf32>
    %cst_143 = arith.constant 0.0322580636 : f32
    %249 = vector.broadcast %cst_143 : f32 to vector<8x1xf32>
    %250 = arith.mulf %248, %249 : vector<8x1xf32>
    %251 = math.sqrt %250 : vector<8x1xf32>
    %252 = vector.broadcast %237 : vector<1x32xf32> to vector<8x32xf32>
    %253 = arith.mulf %252, %245 : vector<8x32xf32>
    %cst_144 = arith.constant 9.99999997E-7 : f32
    %254 = vector.broadcast %cst_144 : f32 to vector<8x1xf32>
    %255 = arith.addf %251, %254 : vector<8x1xf32>
    %256 = vector.broadcast %255 : vector<8x1xf32> to vector<8x32xf32>
    %257 = arith.divf %253, %256 : vector<8x32xf32>
    %258 = vector.broadcast %239 : vector<1x32xf32> to vector<8x32xf32>
    %259 = arith.addf %257, %258 : vector<8x32xf32>
    %c0_145 = arith.constant 0 : index
    %c0_146 = arith.constant 0 : index
    %c0_147 = arith.constant 0 : index
    %c0_148 = arith.constant 0 : index
    %260 = vector.load %arg3[%c0_145, %c0_146, %c0_147, %c0_148] : memref<1x2x8x32xbf16, #tpu.memory_space<vmem>>, vector<1x2x8x32xbf16>
    %261 = vector.shape_cast %260 : vector<1x2x8x32xbf16> to vector<2x8x32xbf16>
    %262 = vector.extract_strided_slice %261 {offsets = [0, 0, 0], sizes = [1, 8, 32], strides = [1, 1, 1]} : vector<2x8x32xbf16> to vector<1x8x32xbf16>
    %263 = vector.shape_cast %262 : vector<1x8x32xbf16> to vector<8x32xbf16>
    %264 = vector.extract_strided_slice %261 {offsets = [1, 0, 0], sizes = [1, 8, 32], strides = [1, 1, 1]} : vector<2x8x32xbf16> to vector<1x8x32xbf16>
    %265 = vector.shape_cast %264 : vector<1x8x32xbf16> to vector<8x32xbf16>
    %c3 = arith.constant 3 : index
    %c0_149 = arith.constant 0 : index
    %c0_150 = arith.constant 0 : index
    %c0_151 = arith.constant 0 : index
    %266 = vector.load %arg7[%c3, %c0_149, %c0_150, %c0_151] : memref<4x4x32x8xbf16, #tpu.memory_space<vmem>>, vector<1x4x32x8xbf16>
    %267 = vector.shape_cast %266 : vector<1x4x32x8xbf16> to vector<4x32x8xbf16>
    %c3_152 = arith.constant 3 : index
    %c0_153 = arith.constant 0 : index
    %c0_154 = arith.constant 0 : index
    %c0_155 = arith.constant 0 : index
    %268 = vector.load %arg9[%c3_152, %c0_153, %c0_154, %c0_155] : memref<4x4x32x16xbf16, #tpu.memory_space<vmem>>, vector<1x4x32x16xbf16>
    %269 = vector.shape_cast %268 : vector<1x4x32x16xbf16> to vector<4x32x16xbf16>
    %c3_156 = arith.constant 3 : index
    %c0_157 = arith.constant 0 : index
    %c0_158 = arith.constant 0 : index
    %c0_159 = arith.constant 0 : index
    %270 = vector.load %arg11[%c3_156, %c0_157, %c0_158, %c0_159] : memref<4x4x8x32xbf16, #tpu.memory_space<vmem>>, vector<1x4x8x32xbf16>
    %271 = vector.shape_cast %270 : vector<1x4x8x32xbf16> to vector<4x8x32xbf16>
    %272 = arith.truncf %259 : vector<8x32xf32> to vector<8x32xbf16>
    %273 = vector.shape_cast %272 : vector<8x32xbf16> to vector<1x8x32xbf16>
    %274 = vector.broadcast %273 : vector<1x8x32xbf16> to vector<4x8x32xbf16>
    "tpu.trace_start"() <{level = 10 : i32, message = "hsd,hdk->hsk"}> : () -> ()
    %cst_160 = arith.constant dense<0.000000e+00> : vector<4x8x8xf32>
    %275 = tpu.matmul %274, %267, %cst_160 {dimension_numbers = #tpu.dot_dimension_numbers<[2], [1], [1], [2], [0, 0, 0, 1, 1, 2], [0], [0]>} : vector<4x8x32xbf16>, vector<4x32x8xbf16>, vector<4x8x8xf32> -> vector<4x8x8xf32>
    "tpu.trace_stop"() : () -> ()
    %c3_161 = arith.constant 3 : index
    %c0_162 = arith.constant 0 : index
    %c0_163 = arith.constant 0 : index
    %c0_164 = arith.constant 0 : index
    %276 = vector.load %arg8[%c3_161, %c0_162, %c0_163, %c0_164] : memref<4x4x1x8xf32, #tpu.memory_space<vmem>>, vector<1x4x1x8xf32>
    %277 = vector.shape_cast %276 : vector<1x4x1x8xf32> to vector<4x1x8xf32>
    %278 = vector.broadcast %277 : vector<4x1x8xf32> to vector<4x8x8xf32>
    %279 = arith.addf %275, %278 : vector<4x8x8xf32>
    %cst_165 = arith.constant 0.353553385 : f32
    %280 = vector.broadcast %cst_165 : f32 to vector<4x8x8xf32>
    %281 = arith.mulf %279, %280 : vector<4x8x8xf32>
    %282 = arith.truncf %281 : vector<4x8x8xf32> to vector<4x8x8xbf16>
    %cst_166 = arith.constant -1.000000e+30 : f32
    %283 = vector.broadcast %cst_166 : f32 to vector<4x8x1xf32>
    %284 = vector.shape_cast %263 : vector<8x32xbf16> to vector<1x8x32xbf16>
    %285 = vector.broadcast %284 : vector<1x8x32xbf16> to vector<4x8x32xbf16>
    "tpu.trace_start"() <{level = 10 : i32, message = "hsd,hdk->hsk"}> : () -> ()
    %cst_167 = arith.constant dense<0.000000e+00> : vector<4x8x16xf32>
    %286 = tpu.matmul %285, %269, %cst_167 {dimension_numbers = #tpu.dot_dimension_numbers<[2], [1], [1], [2], [0, 0, 0, 1, 1, 2], [0], [0]>} : vector<4x8x32xbf16>, vector<4x32x16xbf16>, vector<4x8x16xf32> -> vector<4x8x16xf32>
    "tpu.trace_stop"() : () -> ()
    %c3_168 = arith.constant 3 : index
    %c0_169 = arith.constant 0 : index
    %c0_170 = arith.constant 0 : index
    %c0_171 = arith.constant 0 : index
    %287 = vector.load %arg10[%c3_168, %c0_169, %c0_170, %c0_171] : memref<4x4x1x16xf32, #tpu.memory_space<vmem>>, vector<1x4x1x16xf32>
    %288 = vector.shape_cast %287 : vector<1x4x1x16xf32> to vector<4x1x16xf32>
    %289 = vector.broadcast %288 : vector<4x1x16xf32> to vector<4x8x16xf32>
    %290 = arith.addf %286, %289 : vector<4x8x16xf32>
    %291 = vector.extract_strided_slice %290 {offsets = [0, 0, 0], sizes = [4, 8, 8], strides = [1, 1, 1]} : vector<4x8x16xf32> to vector<4x8x8xf32>
    %292 = arith.truncf %291 : vector<4x8x8xf32> to vector<4x8x8xbf16>
    %293 = vector.extract_strided_slice %290 {offsets = [0, 0, 8], sizes = [4, 8, 8], strides = [1, 1, 1]} : vector<4x8x16xf32> to vector<4x8x8xf32>
    %294 = arith.truncf %293 : vector<4x8x8xf32> to vector<4x8x8xbf16>
    "tpu.trace_start"() <{level = 10 : i32, message = "hqd,hkd->hqk"}> : () -> ()
    %cst_172 = arith.constant dense<0.000000e+00> : vector<4x8x8xf32>
    %295 = tpu.matmul %282, %292, %cst_172 {dimension_numbers = #tpu.dot_dimension_numbers<[2], [2], [1], [1], [0, 0, 0, 1, 1, 1], [0], [0]>} : vector<4x8x8xbf16>, vector<4x8x8xbf16>, vector<4x8x8xf32> -> vector<4x8x8xf32>
    "tpu.trace_stop"() : () -> ()
    %296 = vector.shape_cast %14 : vector<8x8xf32> to vector<1x8x8xf32>
    %297 = vector.broadcast %296 : vector<1x8x8xf32> to vector<4x8x8xf32>
    %298 = arith.addf %295, %297 : vector<4x8x8xf32>
    %cst_173 = arith.constant dense<0xFF800000> : vector<4x8xf32>
    %299 = vector.multi_reduction <maximumf>, %298, %cst_173 [2] : vector<4x8x8xf32> to vector<4x8xf32>
    %300 = vector.shape_cast %299 : vector<4x8xf32> to vector<4x8x1xf32>
    %301 = arith.maximumf %283, %300 : vector<4x8x1xf32>
    %302 = vector.shape_cast %265 : vector<8x32xbf16> to vector<1x8x32xbf16>
    %303 = vector.broadcast %302 : vector<1x8x32xbf16> to vector<4x8x32xbf16>
    "tpu.trace_start"() <{level = 10 : i32, message = "hsd,hdk->hsk"}> : () -> ()
    %cst_174 = arith.constant dense<0.000000e+00> : vector<4x8x16xf32>
    %304 = tpu.matmul %303, %269, %cst_174 {dimension_numbers = #tpu.dot_dimension_numbers<[2], [1], [1], [2], [0, 0, 0, 1, 1, 2], [0], [0]>} : vector<4x8x32xbf16>, vector<4x32x16xbf16>, vector<4x8x16xf32> -> vector<4x8x16xf32>
    "tpu.trace_stop"() : () -> ()
    %c3_175 = arith.constant 3 : index
    %c0_176 = arith.constant 0 : index
    %c0_177 = arith.constant 0 : index
    %c0_178 = arith.constant 0 : index
    %305 = vector.load %arg10[%c3_175, %c0_176, %c0_177, %c0_178] : memref<4x4x1x16xf32, #tpu.memory_space<vmem>>, vector<1x4x1x16xf32>
    %306 = vector.shape_cast %305 : vector<1x4x1x16xf32> to vector<4x1x16xf32>
    %307 = vector.broadcast %306 : vector<4x1x16xf32> to vector<4x8x16xf32>
    %308 = arith.addf %304, %307 : vector<4x8x16xf32>
    %309 = vector.extract_strided_slice %308 {offsets = [0, 0, 0], sizes = [4, 8, 8], strides = [1, 1, 1]} : vector<4x8x16xf32> to vector<4x8x8xf32>
    %310 = arith.truncf %309 : vector<4x8x8xf32> to vector<4x8x8xbf16>
    %311 = vector.extract_strided_slice %308 {offsets = [0, 0, 8], sizes = [4, 8, 8], strides = [1, 1, 1]} : vector<4x8x16xf32> to vector<4x8x8xf32>
    %312 = arith.truncf %311 : vector<4x8x8xf32> to vector<4x8x8xbf16>
    "tpu.trace_start"() <{level = 10 : i32, message = "hqd,hkd->hqk"}> : () -> ()
    %cst_179 = arith.constant dense<0.000000e+00> : vector<4x8x8xf32>
    %313 = tpu.matmul %282, %310, %cst_179 {dimension_numbers = #tpu.dot_dimension_numbers<[2], [2], [1], [1], [0, 0, 0, 1, 1, 1], [0], [0]>} : vector<4x8x8xbf16>, vector<4x8x8xbf16>, vector<4x8x8xf32> -> vector<4x8x8xf32>
    "tpu.trace_stop"() : () -> ()
    %314 = vector.shape_cast %14 : vector<8x8xf32> to vector<1x8x8xf32>
    %315 = vector.broadcast %314 : vector<1x8x8xf32> to vector<4x8x8xf32>
    %316 = arith.addf %313, %315 : vector<4x8x8xf32>
    %cst_180 = arith.constant dense<0xFF800000> : vector<4x8xf32>
    %317 = vector.multi_reduction <maximumf>, %316, %cst_180 [2] : vector<4x8x8xf32> to vector<4x8xf32>
    %318 = vector.shape_cast %317 : vector<4x8xf32> to vector<4x8x1xf32>
    %319 = arith.maximumf %301, %318 : vector<4x8x1xf32>
    %cst_181 = arith.constant 0.000000e+00 : f32
    %320 = vector.broadcast %cst_181 : f32 to vector<4x8x1xf32>
    %cst_182 = arith.constant 0.000000e+00 : f32
    %321 = vector.broadcast %cst_182 : f32 to vector<4x8x8xf32>
    %322 = vector.broadcast %319 : vector<4x8x1xf32> to vector<4x8x8xf32>
    %323 = arith.subf %298, %322 : vector<4x8x8xf32>
    %324 = math.exp %323 : vector<4x8x8xf32>
    %cst_183 = arith.constant dense<0.000000e+00> : vector<4x8xf32>
    %325 = vector.multi_reduction <add>, %324, %cst_183 [2] : vector<4x8x8xf32> to vector<4x8xf32>
    %326 = vector.shape_cast %325 : vector<4x8xf32> to vector<4x8x1xf32>
    %327 = arith.addf %320, %326 : vector<4x8x1xf32>
    %328 = arith.truncf %324 : vector<4x8x8xf32> to vector<4x8x8xbf16>
    "tpu.trace_start"() <{level = 10 : i32, message = "hqk,hkd->hqd"}> : () -> ()
    %cst_184 = arith.constant dense<0.000000e+00> : vector<4x8x8xf32>
    %329 = tpu.matmul %328, %294, %cst_184 {dimension_numbers = #tpu.dot_dimension_numbers<[2], [1], [1], [2], [0, 0, 0, 1, 1, 2], [0], [0]>} : vector<4x8x8xbf16>, vector<4x8x8xbf16>, vector<4x8x8xf32> -> vector<4x8x8xf32>
    "tpu.trace_stop"() : () -> ()
    %330 = arith.addf %321, %329 : vector<4x8x8xf32>
    %331 = vector.broadcast %319 : vector<4x8x1xf32> to vector<4x8x8xf32>
    %332 = arith.subf %316, %331 : vector<4x8x8xf32>
    %333 = math.exp %332 : vector<4x8x8xf32>
    %cst_185 = arith.constant dense<0.000000e+00> : vector<4x8xf32>
    %334 = vector.multi_reduction <add>, %333, %cst_185 [2] : vector<4x8x8xf32> to vector<4x8xf32>
    %335 = vector.shape_cast %334 : vector<4x8xf32> to vector<4x8x1xf32>
    %336 = arith.addf %327, %335 : vector<4x8x1xf32>
    %337 = arith.truncf %333 : vector<4x8x8xf32> to vector<4x8x8xbf16>
    "tpu.trace_start"() <{level = 10 : i32, message = "hqk,hkd->hqd"}> : () -> ()
    %cst_186 = arith.constant dense<0.000000e+00> : vector<4x8x8xf32>
    %338 = tpu.matmul %337, %312, %cst_186 {dimension_numbers = #tpu.dot_dimension_numbers<[2], [1], [1], [2], [0, 0, 0, 1, 1, 2], [0], [0]>} : vector<4x8x8xbf16>, vector<4x8x8xbf16>, vector<4x8x8xf32> -> vector<4x8x8xf32>
    "tpu.trace_stop"() : () -> ()
    %339 = arith.addf %330, %338 : vector<4x8x8xf32>
    %340 = tpu.reciprocal %336 {approx = true} : vector<4x8x1xf32> -> vector<4x8x1xf32>
    %341 = vector.broadcast %340 : vector<4x8x1xf32> to vector<4x8x8xf32>
    %342 = arith.mulf %339, %341 : vector<4x8x8xf32>
    %343 = arith.truncf %342 : vector<4x8x8xf32> to vector<4x8x8xbf16>
    "tpu.trace_start"() <{level = 10 : i32, message = "hqd,hdk->hqk"}> : () -> ()
    %cst_187 = arith.constant dense<0.000000e+00> : vector<4x8x32xf32>
    %344 = tpu.matmul %343, %271, %cst_187 {dimension_numbers = #tpu.dot_dimension_numbers<[2], [1], [1], [2], [0, 0, 0, 1, 1, 2], [0], [0]>} : vector<4x8x8xbf16>, vector<4x8x32xbf16>, vector<4x8x32xf32> -> vector<4x8x32xf32>
    "tpu.trace_stop"() : () -> ()
    %cst_188 = arith.constant dense<0.000000e+00> : vector<8x32xf32>
    %345 = vector.multi_reduction <add>, %344, %cst_188 [0] : vector<4x8x32xf32> to vector<8x32xf32>
    %c3_189 = arith.constant 3 : index
    %c0_190 = arith.constant 0 : index
    %c0_191 = arith.constant 0 : index
    %346 = vector.load %arg12[%c3_189, %c0_190, %c0_191] : memref<4x1x32xf32, #tpu.memory_space<vmem>>, vector<1x1x32xf32>
    %347 = vector.shape_cast %346 : vector<1x1x32xf32> to vector<1x32xf32>
    %348 = vector.broadcast %347 : vector<1x32xf32> to vector<8x32xf32>
    %349 = arith.addf %345, %348 : vector<8x32xf32>
    %350 = arith.addf %259, %349 : vector<8x32xf32>
    %c3_192 = arith.constant 3 : index
    %c0_193 = arith.constant 0 : index
    %c0_194 = arith.constant 0 : index
    %351 = vector.load %arg5[%c3_192, %c0_193, %c0_194] : memref<4x1x32xf32, #tpu.memory_space<vmem>>, vector<1x1x32xf32>
    %352 = vector.shape_cast %351 : vector<1x1x32xf32> to vector<1x32xf32>
    %c3_195 = arith.constant 3 : index
    %c0_196 = arith.constant 0 : index
    %c0_197 = arith.constant 0 : index
    %353 = vector.load %arg6[%c3_195, %c0_196, %c0_197] : memref<4x1x32xf32, #tpu.memory_space<vmem>>, vector<1x1x32xf32>
    %354 = vector.shape_cast %353 : vector<1x1x32xf32> to vector<1x32xf32>
    %cst_198 = arith.constant dense<0.000000e+00> : vector<8xf32>
    %355 = vector.multi_reduction <add>, %350, %cst_198 [1] : vector<8x32xf32> to vector<8xf32>
    %356 = vector.shape_cast %355 : vector<8xf32> to vector<8x1xf32>
    %cst_199 = arith.constant 3.200000e+01 : f32
    %357 = vector.broadcast %cst_199 : f32 to vector<8x1xf32>
    %358 = arith.divf %356, %357 : vector<8x1xf32>
    %359 = vector.broadcast %358 : vector<8x1xf32> to vector<8x32xf32>
    %360 = arith.subf %350, %359 : vector<8x32xf32>
    %361 = arith.mulf %360, %360 : vector<8x32xf32>
    %cst_200 = arith.constant dense<0.000000e+00> : vector<8xf32>
    %362 = vector.multi_reduction <add>, %361, %cst_200 [1] : vector<8x32xf32> to vector<8xf32>
    %363 = vector.shape_cast %362 : vector<8xf32> to vector<8x1xf32>
    %cst_201 = arith.constant 0.0322580636 : f32
    %364 = vector.broadcast %cst_201 : f32 to vector<8x1xf32>
    %365 = arith.mulf %363, %364 : vector<8x1xf32>
    %366 = math.sqrt %365 : vector<8x1xf32>
    %367 = vector.broadcast %352 : vector<1x32xf32> to vector<8x32xf32>
    %368 = arith.mulf %367, %360 : vector<8x32xf32>
    %cst_202 = arith.constant 9.99999997E-7 : f32
    %369 = vector.broadcast %cst_202 : f32 to vector<8x1xf32>
    %370 = arith.addf %366, %369 : vector<8x1xf32>
    %371 = vector.broadcast %370 : vector<8x1xf32> to vector<8x32xf32>
    %372 = arith.divf %368, %371 : vector<8x32xf32>
    %373 = vector.broadcast %354 : vector<1x32xf32> to vector<8x32xf32>
    %374 = arith.addf %372, %373 : vector<8x32xf32>
    %375 = tpu.iota {dimensions = array<i32: 0>} : vector<8x1xi32>
    %c0_i32 = arith.constant 0 : i32
    %376 = vector.broadcast %c0_i32 : i32 to vector<8x1xi32>
    %377 = arith.cmpi eq, %375, %376 : vector<8x1xi32>
    %c7_i32 = arith.constant 7 : i32
    %378 = vector.broadcast %c7_i32 : i32 to vector<8x1xi32>
    %379 = arith.cmpi eq, %375, %378 : vector<8x1xi32>
    %380 = arith.truncf %374 : vector<8x32xf32> to vector<8x32xbf16>
    %c1_i32 = arith.constant 1 : i32
    %381 = tpu.dynamic_rotate %374 by %c1_i32 dim 0 : vector<8x32xf32>, i32 -> vector<8x32xf32>
    %cst_203 = arith.constant 0.000000e+00 : f32
    %382 = vector.shape_cast %377 : vector<8x1xi1> to vector<8x1xi1>
    %383 = vector.broadcast %382 : vector<8x1xi1> to vector<8x32xi1>
    %384 = vector.broadcast %cst_203 : f32 to vector<8x32xf32>
    %385 = arith.select %383, %384, %381 : vector<8x32xi1>, vector<8x32xf32>
    %386 = arith.truncf %385 : vector<8x32xf32> to vector<8x32xbf16>
    %c0_204 = arith.constant 0 : index
    %c0_205 = arith.constant 0 : index
    %c0_206 = arith.constant 0 : index
    %387 = vector.load %arg13[%c0_204, %c0_205, %c0_206] : memref<3x32x64xbf16, #tpu.memory_space<vmem>>, vector<1x32x64xbf16>
    %388 = vector.shape_cast %387 : vector<1x32x64xbf16> to vector<32x64xbf16>
    %cst_207 = arith.constant dense<0.000000e+00> : vector<8x64xf32>
    %389 = tpu.matmul %386, %388, %cst_207 {dimension_numbers = #tpu.dot_dimension_numbers<[1], [0], [0], [1], [0, 0, 1, 1], [], []>} : vector<8x32xbf16>, vector<32x64xbf16>, vector<8x64xf32> -> vector<8x64xf32>
    %c1_208 = arith.constant 1 : index
    %c0_209 = arith.constant 0 : index
    %c0_210 = arith.constant 0 : index
    %390 = vector.load %arg13[%c1_208, %c0_209, %c0_210] : memref<3x32x64xbf16, #tpu.memory_space<vmem>>, vector<1x32x64xbf16>
    %391 = vector.shape_cast %390 : vector<1x32x64xbf16> to vector<32x64xbf16>
    %cst_211 = arith.constant dense<0.000000e+00> : vector<8x64xf32>
    %392 = tpu.matmul %380, %391, %cst_211 {dimension_numbers = #tpu.dot_dimension_numbers<[1], [0], [0], [1], [0, 0, 1, 1], [], []>} : vector<8x32xbf16>, vector<32x64xbf16>, vector<8x64xf32> -> vector<8x64xf32>
    %393 = arith.addf %389, %392 : vector<8x64xf32>
    %c7_i32_212 = arith.constant 7 : i32
    %394 = tpu.dynamic_rotate %374 by %c7_i32_212 dim 0 : vector<8x32xf32>, i32 -> vector<8x32xf32>
    %cst_213 = arith.constant 0.000000e+00 : f32
    %395 = vector.shape_cast %379 : vector<8x1xi1> to vector<8x1xi1>
    %396 = vector.broadcast %395 : vector<8x1xi1> to vector<8x32xi1>
    %397 = vector.broadcast %cst_213 : f32 to vector<8x32xf32>
    %398 = arith.select %396, %397, %394 : vector<8x32xi1>, vector<8x32xf32>
    %399 = arith.truncf %398 : vector<8x32xf32> to vector<8x32xbf16>
    %c2_214 = arith.constant 2 : index
    %c0_215 = arith.constant 0 : index
    %c0_216 = arith.constant 0 : index
    %400 = vector.load %arg13[%c2_214, %c0_215, %c0_216] : memref<3x32x64xbf16, #tpu.memory_space<vmem>>, vector<1x32x64xbf16>
    %401 = vector.shape_cast %400 : vector<1x32x64xbf16> to vector<32x64xbf16>
    %cst_217 = arith.constant dense<0.000000e+00> : vector<8x64xf32>
    %402 = tpu.matmul %399, %401, %cst_217 {dimension_numbers = #tpu.dot_dimension_numbers<[1], [0], [0], [1], [0, 0, 1, 1], [], []>} : vector<8x32xbf16>, vector<32x64xbf16>, vector<8x64xf32> -> vector<8x64xf32>
    %403 = arith.addf %393, %402 : vector<8x64xf32>
    %c0_218 = arith.constant 0 : index
    %c0_219 = arith.constant 0 : index
    %404 = vector.load %arg14[%c0_218, %c0_219] : memref<1x64xf32, #tpu.memory_space<vmem>>, vector<1x64xf32>
    %405 = vector.broadcast %404 : vector<1x64xf32> to vector<8x64xf32>
    %406 = arith.addf %403, %405 : vector<8x64xf32>
    %cst_220 = arith.constant 0.000000e+00 : f32
    %407 = vector.broadcast %cst_220 : f32 to vector<8x64xf32>
    %408 = arith.maximumf %406, %407 : vector<8x64xf32>
    %c1_i32_221 = arith.constant 1 : i32
    %409 = tpu.dynamic_rotate %408 by %c1_i32_221 dim 0 : vector<8x64xf32>, i32 -> vector<8x64xf32>
    %cst_222 = arith.constant 0.000000e+00 : f32
    %410 = vector.shape_cast %377 : vector<8x1xi1> to vector<8x1xi1>
    %411 = vector.broadcast %410 : vector<8x1xi1> to vector<8x64xi1>
    %412 = vector.broadcast %cst_222 : f32 to vector<8x64xf32>
    %413 = arith.select %411, %412, %409 : vector<8x64xi1>, vector<8x64xf32>
    %414 = arith.truncf %413 : vector<8x64xf32> to vector<8x64xbf16>
    %c0_223 = arith.constant 0 : index
    %c0_224 = arith.constant 0 : index
    %c0_225 = arith.constant 0 : index
    %415 = vector.load %arg15[%c0_223, %c0_224, %c0_225] : memref<3x64x32xbf16, #tpu.memory_space<vmem>>, vector<1x64x32xbf16>
    %416 = vector.shape_cast %415 : vector<1x64x32xbf16> to vector<64x32xbf16>
    %cst_226 = arith.constant dense<0.000000e+00> : vector<8x32xf32>
    %417 = tpu.matmul %414, %416, %cst_226 {dimension_numbers = #tpu.dot_dimension_numbers<[1], [0], [0], [1], [0, 0, 1, 1], [], []>} : vector<8x64xbf16>, vector<64x32xbf16>, vector<8x32xf32> -> vector<8x32xf32>
    %418 = arith.truncf %408 : vector<8x64xf32> to vector<8x64xbf16>
    %c1_227 = arith.constant 1 : index
    %c0_228 = arith.constant 0 : index
    %c0_229 = arith.constant 0 : index
    %419 = vector.load %arg15[%c1_227, %c0_228, %c0_229] : memref<3x64x32xbf16, #tpu.memory_space<vmem>>, vector<1x64x32xbf16>
    %420 = vector.shape_cast %419 : vector<1x64x32xbf16> to vector<64x32xbf16>
    %cst_230 = arith.constant dense<0.000000e+00> : vector<8x32xf32>
    %421 = tpu.matmul %418, %420, %cst_230 {dimension_numbers = #tpu.dot_dimension_numbers<[1], [0], [0], [1], [0, 0, 1, 1], [], []>} : vector<8x64xbf16>, vector<64x32xbf16>, vector<8x32xf32> -> vector<8x32xf32>
    %422 = arith.addf %417, %421 : vector<8x32xf32>
    %c7_i32_231 = arith.constant 7 : i32
    %423 = tpu.dynamic_rotate %408 by %c7_i32_231 dim 0 : vector<8x64xf32>, i32 -> vector<8x64xf32>
    %cst_232 = arith.constant 0.000000e+00 : f32
    %424 = vector.shape_cast %379 : vector<8x1xi1> to vector<8x1xi1>
    %425 = vector.broadcast %424 : vector<8x1xi1> to vector<8x64xi1>
    %426 = vector.broadcast %cst_232 : f32 to vector<8x64xf32>
    %427 = arith.select %425, %426, %423 : vector<8x64xi1>, vector<8x64xf32>
    %428 = arith.truncf %427 : vector<8x64xf32> to vector<8x64xbf16>
    %c2_233 = arith.constant 2 : index
    %c0_234 = arith.constant 0 : index
    %c0_235 = arith.constant 0 : index
    %429 = vector.load %arg15[%c2_233, %c0_234, %c0_235] : memref<3x64x32xbf16, #tpu.memory_space<vmem>>, vector<1x64x32xbf16>
    %430 = vector.shape_cast %429 : vector<1x64x32xbf16> to vector<64x32xbf16>
    %cst_236 = arith.constant dense<0.000000e+00> : vector<8x32xf32>
    %431 = tpu.matmul %428, %430, %cst_236 {dimension_numbers = #tpu.dot_dimension_numbers<[1], [0], [0], [1], [0, 0, 1, 1], [], []>} : vector<8x64xbf16>, vector<64x32xbf16>, vector<8x32xf32> -> vector<8x32xf32>
    %432 = arith.addf %422, %431 : vector<8x32xf32>
    %c0_237 = arith.constant 0 : index
    %c0_238 = arith.constant 0 : index
    %433 = vector.load %arg16[%c0_237, %c0_238] : memref<1x32xf32, #tpu.memory_space<vmem>>, vector<1x32xf32>
    %434 = vector.broadcast %433 : vector<1x32xf32> to vector<8x32xf32>
    %435 = arith.addf %432, %434 : vector<8x32xf32>
    %436 = arith.addf %374, %435 : vector<8x32xf32>
    %c0_239 = arith.constant 0 : index
    %c0_240 = arith.constant 0 : index
    %c0_241 = arith.constant 0 : index
    %437 = vector.load %arg17[%c0_239, %c0_240, %c0_241] : memref<1x8x32xf32, #tpu.memory_space<vmem>>, vector<1x8x32xf32>
    %438 = vector.shape_cast %437 : vector<1x8x32xf32> to vector<8x32xf32>
    %439 = vector.shape_cast %436 : vector<8x32xf32> to vector<1x8x32xf32>
    tpu.vector_store %arg17[%c0_239, %c0_240, %c0_241], %439 {strides = array<i32>} : memref<1x8x32xf32, #tpu.memory_space<vmem>>, vector<1x8x32xf32>,
    %c0_242 = arith.constant 0 : index
    %c0_243 = arith.constant 0 : index
    %c0_244 = arith.constant 0 : index
    %440 = vector.load %arg18[%c0_242, %c0_243, %c0_244] : memref<1x8x32xf32, #tpu.memory_space<vmem>>, vector<1x8x32xf32>
    %441 = vector.shape_cast %440 : vector<1x8x32xf32> to vector<8x32xf32>
    %442 = vector.shape_cast %151 : vector<8x32xf32> to vector<1x8x32xf32>
    tpu.vector_store %arg18[%c0_242, %c0_243, %c0_244], %442 {strides = array<i32>} : memref<1x8x32xf32, #tpu.memory_space<vmem>>, vector<1x8x32xf32>,
    return
  }
  func.func @transform_0(%arg0: i32) -> (i32, i32, i32) {
    %c0_i32 = arith.constant 0 : i32
    %c0_i32_0 = arith.constant 0 : i32
    %c0_i32_1 = arith.constant 0 : i32
    return %arg0, %c0_i32, %c0_i32_0 : i32, i32, i32
  }
  func.func @transform_1(%arg0: i32) -> (i32, i32, i32) {
    %c0_i32 = arith.constant 0 : i32
    %c0_i32_0 = arith.constant 0 : i32
    %c0_i32_1 = arith.constant 0 : i32
    return %arg0, %c0_i32, %c0_i32_0 : i32, i32, i32
  }
  func.func @transform_2(%arg0: i32) -> (i32, i32, i32, i32) {
    %c0_i32 = arith.constant 0 : i32
    %c0_i32_0 = arith.constant 0 : i32
    %c0_i32_1 = arith.constant 0 : i32
    %c0_i32_2 = arith.constant 0 : i32
    return %arg0, %c0_i32, %c0_i32_0, %c0_i32_1 : i32, i32, i32, i32
  }
  func.func @transform_3(%arg0: i32) -> (i32, i32, i32) {
    %c0_i32 = arith.constant 0 : i32
    %c0_i32_0 = arith.constant 0 : i32
    %c0_i32_1 = arith.constant 0 : i32
    return %arg0, %c0_i32, %c0_i32_0 : i32, i32, i32
  }
  func.func @transform_4(%arg0: i32) -> (i32, i32, i32) {
    %c0_i32 = arith.constant 0 : i32
    %c0_i32_0 = arith.constant 0 : i32
    %c0_i32_1 = arith.constant 0 : i32
    %c0_i32_2 = arith.constant 0 : i32
    return %c0_i32, %c0_i32_0, %c0_i32_1 : i32, i32, i32
  }
  func.func @transform_5(%arg0: i32) -> (i32, i32, i32) {
    %c0_i32 = arith.constant 0 : i32
    %c0_i32_0 = arith.constant 0 : i32
    %c0_i32_1 = arith.constant 0 : i32
    %c0_i32_2 = arith.constant 0 : i32
    return %c0_i32, %c0_i32_0, %c0_i32_1 : i32, i32, i32
  }
  func.func @transform_6(%arg0: i32) -> (i32, i32, i32, i32) {
    %c0_i32 = arith.constant 0 : i32
    %c0_i32_0 = arith.constant 0 : i32
    %c0_i32_1 = arith.constant 0 : i32
    %c0_i32_2 = arith.constant 0 : i32
    %c0_i32_3 = arith.constant 0 : i32
    return %c0_i32, %c0_i32_0, %c0_i32_1, %c0_i32_2 : i32, i32, i32, i32
  }
  func.func @transform_7(%arg0: i32) -> (i32, i32, i32, i32) {
    %c0_i32 = arith.constant 0 : i32
    %c0_i32_0 = arith.constant 0 : i32
    %c0_i32_1 = arith.constant 0 : i32
    %c0_i32_2 = arith.constant 0 : i32
    %c0_i32_3 = arith.constant 0 : i32
    return %c0_i32, %c0_i32_0, %c0_i32_1, %c0_i32_2 : i32, i32, i32, i32
  }
  func.func @transform_8(%arg0: i32) -> (i32, i32, i32, i32) {
    %c0_i32 = arith.constant 0 : i32
    %c0_i32_0 = arith.constant 0 : i32
    %c0_i32_1 = arith.constant 0 : i32
    %c0_i32_2 = arith.constant 0 : i32
    %c0_i32_3 = arith.constant 0 : i32
    return %c0_i32, %c0_i32_0, %c0_i32_1, %c0_i32_2 : i32, i32, i32, i32
  }
  func.func @transform_9(%arg0: i32) -> (i32, i32, i32, i32) {
    %c0_i32 = arith.constant 0 : i32
    %c0_i32_0 = arith.constant 0 : i32
    %c0_i32_1 = arith.constant 0 : i32
    %c0_i32_2 = arith.constant 0 : i32
    %c0_i32_3 = arith.constant 0 : i32
    return %c0_i32, %c0_i32_0, %c0_i32_1, %c0_i32_2 : i32, i32, i32, i32
  }
  func.func @transform_10(%arg0: i32) -> (i32, i32, i32, i32) {
    %c0_i32 = arith.constant 0 : i32
    %c0_i32_0 = arith.constant 0 : i32
    %c0_i32_1 = arith.constant 0 : i32
    %c0_i32_2 = arith.constant 0 : i32
    %c0_i32_3 = arith.constant 0 : i32
    return %c0_i32, %c0_i32_0, %c0_i32_1, %c0_i32_2 : i32, i32, i32, i32
  }
  func.func @transform_11(%arg0: i32) -> (i32, i32, i32) {
    %c0_i32 = arith.constant 0 : i32
    %c0_i32_0 = arith.constant 0 : i32
    %c0_i32_1 = arith.constant 0 : i32
    %c0_i32_2 = arith.constant 0 : i32
    return %c0_i32, %c0_i32_0, %c0_i32_1 : i32, i32, i32
  }
  func.func @transform_12(%arg0: i32) -> (i32, i32, i32) {
    %c0_i32 = arith.constant 0 : i32
    %c0_i32_0 = arith.constant 0 : i32
    %c0_i32_1 = arith.constant 0 : i32
    %c0_i32_2 = arith.constant 0 : i32
    return %c0_i32, %c0_i32_0, %c0_i32_1 : i32, i32, i32
  }
  func.func @transform_13(%arg0: i32) -> (i32, i32) {
    %c0_i32 = arith.constant 0 : i32
    %c0_i32_0 = arith.constant 0 : i32
    %c0_i32_1 = arith.constant 0 : i32
    return %c0_i32, %c0_i32_0 : i32, i32
  }
  func.func @transform_14(%arg0: i32) -> (i32, i32, i32) {
    %c0_i32 = arith.constant 0 : i32
    %c0_i32_0 = arith.constant 0 : i32
    %c0_i32_1 = arith.constant 0 : i32
    %c0_i32_2 = arith.constant 0 : i32
    return %c0_i32, %c0_i32_0, %c0_i32_1 : i32, i32, i32
  }
  func.func @transform_15(%arg0: i32) -> (i32, i32) {
    %c0_i32 = arith.constant 0 : i32
    %c0_i32_0 = arith.constant 0 : i32
    %c0_i32_1 = arith.constant 0 : i32
    return %c0_i32, %c0_i32_0 : i32, i32
  }
  func.func @transform_16(%arg0: i32) -> (i32, i32, i32) {
    %c0_i32 = arith.constant 0 : i32
    %c0_i32_0 = arith.constant 0 : i32
    %c0_i32_1 = arith.constant 0 : i32
    return %arg0, %c0_i32, %c0_i32_0 : i32, i32, i32
  }
  func.func @transform_17(%arg0: i32) -> (i32, i32, i32) {
    %c0_i32 = arith.constant 0 : i32
    %c0_i32_0 = arith.constant 0 : i32
    %c0_i32_1 = arith.constant 0 : i32
    return %arg0, %c0_i32, %c0_i32_0 : i32, i32, i32
  }
}

</mosaic_0001>

<bundles_post_ra>
// kernel: _lambda_.1
= control target key start
LH: loop header
LB: loop body
LE: loop exit
PB: predicated region body
PF: predicated region fallthrough
CT: control target
= control target key end

     0   :  { %s9864_s0 = inlined_call_operand.vmem [shape: bf16[2,8,32], index: 0, kind: input, shape index: {}]   ;;  %s9865_s1 = inlined_call_operand.vmem [shape: bf16[2,8,32], index: 1, kind: input, shape index: {}]   ;;  %s9866_s2 = inlined_call_operand.vmem [shape: bf16[2,2,8,32], index: 2, kind: input, shape index: {}]   ;;  %s9867_s3 = inlined_call_operand.vmem [shape: bf16[2,8,8], index: 3, kind: input, shape index: {}]   ;;  %s9868_s4 = inlined_call_operand.vmem [shape: f32[4,1,32], index: 4, kind: input, shape index: {}]   ;;  %s9869_s5 = inlined_call_operand.vmem [shape: f32[4,1,32], index: 5, kind: input, shape index: {}]   ;;  %s9870_s6 = inlined_call_operand.hbm [shape: bf16[4,4,32,8], index: 6, kind: input, shape index: {}]   ;;  %s9871_s7 = inlined_call_operand.vmem [shape: f32[4,4,1,8], index: 7, kind: input, shape index: {}]   ;;  %s9872_s8 = inlined_call_operand.hbm [shape: bf16[4,4,32,16], index: 8, kind: input, shape index: {}]   ;;  %s9873_s9 = inlined_call_operand.hbm [shape: f32[4,4,1,16], index: 9, kind: input, shape index: {}]   ;;  %s9874_s10 = inlined_call_operand.vmem [shape: bf16[4,4,8,32], index: 10, kind: input, shape index: {}]   ;;  %s9875_s11 = inlined_call_operand.vmem [shape: f32[4,1,32], index: 11, kind: input, shape index: {}]   ;;  %s9876_s12 = inlined_call_operand.hbm [shape: bf16[3,32,64], index: 12, kind: input, shape index: {}]   ;;  %s9877_s13 = inlined_call_operand.vmem [shape: f32[1,64], index: 13, kind: input, shape index: {}]   ;;  %s9878_s14 = inlined_call_operand.vmem [shape: bf16[3,64,32], index: 14, kind: input, shape index: {}]   ;;  %s9879_s15 = inlined_call_operand.vmem [shape: f32[1,32], index: 15, kind: input, shape index: {}]   ;;  %s9880_s16 = inlined_call_operand.hbm [shape: f32[2,8,32], index: 16, kind: output, shape index: {0}]   ;;  %s9881_s17 = inlined_call_operand.hbm [shape: f32[2,8,32], index: 17, kind: output, shape index: {1}]  }
   0x1   :  { %9897 = sst [smem:[#allocation25_spill]] %s9864_s0 }
   0x2   :  { %9898 = sst [smem:[#allocation26_spill]] %s9865_s1 }
   0x3   :  { %9899 = sst [smem:[#allocation27_spill]] %s9877_s13 }
   0x4   :  { %9900 = sst [smem:[#allocation28_spill]] %s9879_s15 }
   0x5   :  { %9901 = sst [smem:[#allocation29_spill]] %s9880_s16 }
   0x6   :  { %9902 = sst [smem:[#allocation30_spill]] %s9881_s17 }
   0x7   :  { %23 = vsyncpa [#allocation3], 0 }
   0x8   :  { %24 = vsyncpa [#allocation6], 0 }
   0x9   :  { %25 = vsyncpa [#allocation9], 0 }
   0xa   :  { %26 = vsyncpa [#allocation4], 0 }
   0xb   :  { %28 = vsyncpa [#allocation4 + $0x1], 0 }
   0xc   :  { %29 = vsyncpa [#allocation12], 0 }
   0xd   :  { %31 = vsyncpa [#allocation12 + $0x1], 0  ;;  %s8611_s24 = smov 0   ;;  %s8613_s25 = smov 0  }
   0xe   :  { %s8615_s26 = smov 0   ;;  %s8617_s27 = smov 0  }
   0xf LB: > { %9903 = sst [smem:[#allocation18_spill]] %s8493_s24  ;;  %s8632_s28 = sadd.s32 4294967295, %s8505_s27   ;;  %s8505_s27 = sphi %s8617_s27, %s9937_s27   ;;  %s8501_s26 = sphi %s8615_s26, %s9939_s26   ;;  %s8497_s25 = sphi %s8613_s25, %s9941_s25   ;;  %s8493_s24 = sphi %s8611_s24, %s9940_s24  }
  0x10   : > { %9904 = sst [smem:[#allocation19_spill]] %s8501_s26  ;;  %s6775_s29 = sadd.s32 4294967294, %s8505_s27  }
  0x11   : > { %9905 = sst [smem:[#allocation20_spill]] %s8505_s27  ;;  %s8636_s0 = sadd.s32 1, %s8505_s27  }
  0x12   : > { %9906 = sst [smem:[#allocation21_spill]] %s8636_s0  ;;  %s400_s30 = sadd.s32 1, %s8501_s26 }
  0x13   : > { %s397_s18 = ssub.s32 %s8505_s27, %s8636_s0  ;;  %p410_p0 = scmp.ne.s32.totalorder %s8501_s26, %s8497_s25 }
  0x14   : > { %p398_p1 = scmp.eq.s32.totalorder %s397_s18, 0  ;;  %p411_p2 = scmp.eq.s32.totalorder %s8632_s28, 1 }
  0x15   : > { %p416_p3 = scmp.ne.s32.totalorder %s8497_s25, %s8493_s24  ;;  %p417_p4 = scmp.eq.s32.totalorder %s6775_s29, 1 }
  0x16   : > { %s8647_s19 = scalar_select %p398_p1, %s8501_s26, %s400_s30  }
  0x17   : > { %p8649_p5 = por %p411_p2, %p410_p0  ;;  %p8653_p6 = por %p417_p4, %p416_p3 }
  0x18   : > { %9907 = sst [smem:[#allocation22_spill]] %s8647_s19  ;;  %p6776_p7 = scmp.ge.s32.totalorder %s8505_s27, 1 }
  0x19   : > { %s9908_s1 = scalar_select %p8649_p5, 1, 0 }
  0x1a   : > { %s9910_s20 = scalar_select %p8653_p6, 1, 0 }
  0x1b   : > { %9909 = sst [smem:[#allocation23_spill]] %s9908_s1  ;;  %p450_p8 = scmp.lt.s32.totalorder %s8505_s27, 3 }
  0x1c   : > { %9911 = sst [smem:[#allocation24_spill]] %s9910_s20  ;;  %p9889_p9 = scmp.eq.s32.totalorder %s8632_s28, 0 }
  0x1d   : > { %p8660_p10 = pnand %p6776_p7, %p450_p8  ;;  %s8507_s22 = smov [#allocation5]  }
  0x1e   : > { %s484_s23 = sshll.u32 %s8507_s22, 4  ;;  %s8508_s30 = smov [#allocation2]   ;;  %s8666_s23 = int_to_ptr.vmem [resolvable:$true] %s484_s23 }
  0x1f   : > { %s9912_s21 = scalar_select %p8660_p10, 1, 0 }
  0x20   : > { %p8044_p11 = pneg %p8660_p10  ;;  %s468_s18 = sshll.u32 %s8508_s30, 4  ;;  %s8674_s18 = int_to_ptr.vmem [resolvable:$true] %s468_s18 }
  0x21   : > { %s8509_s19 = smov [#allocation7]   ;;  %s8287_s24 = scalar_lea.hbm %s9872_s8, 4096 }
  0x22   : > { %p8670_p12 = pnand %p9889_p9, %p8044_p11  ;;  %s8676_s26 = sshll.u32 %s8509_s19, 4  ;;  %s498_s26 = int_to_ptr.vmem [resolvable:$true] %s8676_s26 }
  0x23   : > { %p8288_p13 = scmp.ne.s32.totalorder %s9872_s8, %s8287_s24  ;;  %p8294_p3 = scmp.lt.u32.totalorder %s8287_s24, %s9872_s8 }
  0x24   : > { %p8686_p0 = pneg %p8670_p12 }
  0x26   : > { %p8290_p1 = pnand %p8686_p0, %p8288_p13 }
  0x28   : > { %p8291_p2 = pneg %p8290_p1 }
  0x2a   : > { %p8296_p4 = pnand %p8294_p3, %p8291_p2 }
  0x2c   : > { %8299 = shalt.err (!%p8296_p4)
}
  0x2d   : > { %s8300_s27 = scalar_lea.vmem %s8666_s23, 4096  ;;  %p8308_p9 = scmp.lt.s32.totalorder %s8666_s23, %s8666_s23 }
  0x2e   : > { %p8301_p7 = scmp.ne.s32.totalorder %s8666_s23, %s8300_s27  ;;  %p8309_p6 = scmp.lt.s32.totalorder %s8300_s27, %s8300_s27 }
  0x30   : > { %p8303_p8 = pnand %p8301_p7, %p8686_p0  ;;  %p8310_p13 = por %p8309_p6, %p8308_p9 }
  0x32   : > { %p8304_p11 = pneg %p8303_p8 }
  0x34   : > { %p8311_p1 = pnand %p8310_p13, %p8304_p11 }
  0x36   : > { %8314 = shalt.err (!%p8311_p1)
}
  0x37   : > { %s9895_s0 = smov 64   ;;  %s9896_s24 = smov 4  }
  0x38   : > { %8050 = dma.hbm_to_vmem [thread:$0]  (!%p8670_p12), %s9872_s8, 4096, %s8666_s23, [#allocation6], %s9895_s0, %s9895_s0, %s9896_s24  }
  0x39   : > { %s8315_s27 = scalar_lea.hbm %s9870_s6, 4096 }
  0x3a   : > { %p8316_p6 = scmp.ne.s32.totalorder %s9870_s6, %s8315_s27  ;;  %p8322_p3 = scmp.lt.u32.totalorder %s8315_s27, %s9870_s6 }
  0x3c   : > { %p8318_p9 = pnand %p8316_p6, %p8686_p0 }
  0x3e   : > { %p8319_p2 = pneg %p8318_p9 }
  0x40   : > { %p8324_p4 = pnand %p8322_p3, %p8319_p2 }
  0x42   : > { %8327 = shalt.err (!%p8324_p4)
}
  0x43   : > { %s8328_s23 = scalar_lea.vmem %s8674_s18, 4096  ;;  %p8336_p13 = scmp.lt.s32.totalorder %s8674_s18, %s8674_s18 }
  0x44   : > { %p8329_p7 = scmp.ne.s32.totalorder %s8674_s18, %s8328_s23  ;;  %p8337_p1 = scmp.lt.s32.totalorder %s8328_s23, %s8328_s23 }
  0x46   : > { %p8331_p8 = pnand %p8329_p7, %p8686_p0  ;;  %p8338_p6 = por %p8337_p1, %p8336_p13 }
  0x48   : > { %p8332_p11 = pneg %p8331_p8 }
  0x4a   : > { %p8339_p9 = pnand %p8338_p6, %p8332_p11 }
  0x4c   : > { %8342 = shalt.err (!%p8339_p9)
}
  0x4d   : > { %8047 = dma.hbm_to_vmem [thread:$0]  (!%p8670_p12), %s9870_s6, 4096, %s8674_s18, [#allocation3], %s9895_s0, %s9895_s0, %s9896_s24  }
  0x4e   : > { %s8343_s20 = scalar_lea.hbm %s9873_s9, 256 }
  0x4f   : > { %p8344_p2 = scmp.ne.s32.totalorder %s9873_s9, %s8343_s20  ;;  %p8350_p7 = scmp.lt.u32.totalorder %s8343_s20, %s9873_s9 }
  0x51   : > { %p8346_p3 = pnand %p8344_p2, %p8686_p0 }
  0x53   : > { %p8347_p4 = pneg %p8346_p3 }
  0x55   : > { %p8352_p8 = pnand %p8350_p7, %p8347_p4 }
  0x57   : > { %8355 = shalt.err (!%p8352_p8)
}
  0x58   : > { %s8356_s23 = scalar_lea.vmem %s498_s26, 256  ;;  %p8364_p6 = scmp.lt.s32.totalorder %s498_s26, %s498_s26 }
  0x59   : > { %p8357_p11 = scmp.ne.s32.totalorder %s498_s26, %s8356_s23  ;;  %p8365_p9 = scmp.lt.s32.totalorder %s8356_s23, %s8356_s23 }
  0x5b   : > { %p8359_p13 = pnand %p8357_p11, %p8686_p0  ;;  %p8366_p5 = por %p8365_p9, %p8364_p6 }
  0x5d   : > { %p8360_p1 = pneg %p8359_p13 }
  0x5f   : > { %p8367_p10 = pnand %p8366_p5, %p8360_p1 }
  0x61   : > { %8370 = shalt.err (!%p8367_p10)
}
  0x62   : > { %s8512_s18 = smov 16   ;;  %s8513_s13 = smov 1  }
  0x63   : > { %8053 = dma.hbm_to_vmem [thread:$0]  (!%p8670_p12), %s9873_s9, 256, %s498_s26, [#allocation6], %s8512_s18, %s8512_s18, %s8513_s13  }
  0x64   : > { %s8514_s1 = smov [#allocation8]   ;;  %s8371_s19 = scalar_lea.hbm %s9876_s12, 768 }
  0x65   : > { %s516_s20 = sshll.u32 %s8514_s1, 4  ;;  %p8372_p5 = scmp.ne.s32.totalorder %s9876_s12, %s8371_s19  ;;  %s517_s20 = int_to_ptr.vmem [resolvable:$true] %s516_s20 }
  0x66   : > { %p8378_p3 = scmp.lt.u32.totalorder %s8371_s19, %s9876_s12 }
  0x67   : > { %p8374_p10 = pnand %p8372_p5, %p8686_p0 }
  0x69   : > { %p8375_p2 = pneg %p8374_p10 }
  0x6b   : > { %p8380_p4 = pnand %p8378_p3, %p8375_p2 }
  0x6d   : > { %8383 = shalt.err (!%p8380_p4)
}
  0x6e   : > { %s8384_s26 = scalar_lea.vmem %s517_s20, 768  ;;  %p8392_p13 = scmp.lt.s32.totalorder %s517_s20, %s517_s20 }
  0x6f   : > { %p8385_p7 = scmp.ne.s32.totalorder %s517_s20, %s8384_s26  ;;  %p8393_p1 = scmp.lt.s32.totalorder %s8384_s26, %s8384_s26 }
  0x71   : > { %p8387_p8 = pnand %p8385_p7, %p8686_p0  ;;  %p8394_p6 = por %p8393_p1, %p8392_p13 }
  0x73   : > { %p8388_p11 = pneg %p8387_p8 }
  0x75   : > { %p8395_p9 = pnand %p8394_p6, %p8388_p11 }
  0x77   : > { %8398 = shalt.err (!%p8395_p9)
}
  0x78   : > { %s9915_s18 = smov 4   ;;  %s9916_s13 = smov 64  }
  0x79   : > { %8056 = dma.hbm_to_vmem [thread:$0]  (!%p8670_p12), %s9876_s12, 768, %s517_s20, [#allocation9], %s9916_s13, %s9916_s13, %s9915_s18  }
  0x7a   : > { %p9917_p5 = scmp.ne.s32.totalorder %s9912_s21, 0 }
  0x7b   : > { %p9918_p0 = scmp.eq.s32.totalorder (!%p9917_p5), %s8632_s28, 0 }
  0x7c   : > { %570 = sbr.rel (%p9917_p5) target bundleno = 6072 (0x17b8), region = 84 }
  0x83   : > { %8472 = dma.done.wait (%p9918_p0), [#allocation3], 4096   ;;  %p9919_p10 = pmov %p9918_p0 }
  0x84   : > { %p9920_p2 = pmov %p9918_p0 }
  0x85   : > { %8474 = vsyncadd (%p9919_p10), [#allocation3], 4294963200 }
  0x86   : > { %8476 = dma.done.wait (%p9920_p2), [#allocation6], 4352   ;;  %p9921_p3 = pmov %p9918_p0 }
  0x87   : > { %p9922_p4 = pmov %p9918_p0 }
  0x88   : > { %8478 = vsyncadd (%p9921_p3), [#allocation6], 4294962944 }
  0x89   : > { %8480 = dma.done.wait (%p9922_p4), [#allocation9], 768   ;;  %p9923_p12 = pmov %p9918_p0 }
  0x8a   : > { %p651_p7 = scmp.lt.s32.totalorder %s8632_s28, 1  ;;  %s9924_s17 = sld [smem:[#allocation25_spill]]  ;;  %vm682_vm0 = vcmask 261120   ;;  %v8117_v8 = vld [vmem:[#allocation2] sm:$0xff]   ;;  %v8118_v9 = vld [vmem:[#allocation2 + $0x10] sm:$0xff]   ;;  %v8515_v10 = vmov 0.0  }
  0x8b   : > { %8482 = vsyncadd (%p9923_p12), [#allocation9], 4294966528  ;;  %7324 = vmatprep.subr.bf16.mxu0 %v8515_v10  ;;  %7332 = vmatprep.subr.bf16.mxu1 %v8515_v10  ;;  %v8119_v11 = vld [vmem:[#allocation2 + $0x8] sm:$0xff]   ;;  %v8120_v12 = vld [vmem:[#allocation2 + $0x18] sm:$0xff]   ;;  %vm8516_vm1 = vmmov 0   ;;  %s9925_s26 = sld [smem:[#allocation26_spill]] }
  0x8c   : > { %s8792_s16 = scalar_select %p651_p7, %s8632_s28, 1  ;;  %7325 = vmatpush3.bf16.msra.mxu0 %v8117_v8  ;;  %7333 = vmatpush3.bf16.msra.mxu1 %v8118_v9  ;;  %v6794_v21 = vld [vmem:[%s9868_s4] ss:$0 sm:$0xff]  ;;  %v8122_v28 = vld [vmem:[#allocation2 + $0x30] sm:$0xff]   ;;  %v8123_v30 = vld [vmem:[#allocation2 + $0x28] sm:$0xff]   ;;  %vm1245_vm4 = vcmask 64512  }
  0x8d   : > { %7326 = vmatprep.subr.bf16.mxu0 %v8515_v10  ;;  %7334 = vmatprep.subr.bf16.mxu1 %v8515_v10  ;;  %v6795_v24 = vld [vmem:[%s9869_s5] ss:$0 sm:$0xff]  ;;  %v8124_v31 = vld [vmem:[#allocation2 + $0x38] sm:$0xff]   ;;  %v8126_v33 = vld [vmem:[#allocation5 + $0x10] sm:$0xff]   ;;  %s8518_s22 = smov 120   ;;  %vm1484_vm6 = vcmask 1043456  }
  0x8e   : > { %s8795_s21 = sshll.u32 %s8792_s16, 2  ;;  %7328 = vmatprep.mubr.msk.bf16.mxu0 %vm8516_vm1, %v8515_v10  ;;  %7336 = vmatprep.mubr.msk.bf16.mxu1 %vm8516_vm1, %v8515_v10  ;;  %v8121_v27 = vld [vmem:[#allocation2 + $0x20] sm:$0xff]   ;;  %v8127_v34 = vld [vmem:[#allocation5 + $0x8] sm:$0xff]   ;;  %v8128_v35 = vld [vmem:[#allocation5 + $0x18] sm:$0xff]   ;;  %s9187_s27 = sand.u32 1, %s8497_s25   ;;  %vm6373_vm15 = vcmask 523264  }
  0x8f   : > { %v8125_v32 = vld [vmem:[#allocation5] sm:$0xff]   ;;  %v8130_v38 = vld [vmem:[#allocation5 + $0x30] sm:$0xff]   ;;  %v8131_v39 = vld [vmem:[#allocation5 + $0x28] sm:$0xff]   ;;  %s6787_s23 = sshll.u32 %s9187_s27, 3  ;;  %s7079_s0 = sshll.u32 %s8792_s16, 3 }
  0x90   : > { %s654_s1 = scalar_lea.vmem %s9924_s17, %s8795_s21  ;;  %7327 = vmatpush3.bf16.msra.mxu0 %v8119_v11  ;;  %7335 = vmatpush3.bf16.msra.mxu1 %v8120_v12  ;;  %v8129_v37 = vld [vmem:[#allocation5 + $0x20] sm:$0xff]   ;;  %v8132_v40 = vld [vmem:[#allocation5 + $0x38] sm:$0xff]   ;;  %s9196_s13 = scalar_lea.vmem [#allocation11], %s6787_s23 }
  0x91   : > { %v669_v0 = vld [vmem:[%s654_s1] sm:$0xf]  ;;  %7340 = vmatprep.subr.bf16.mxu0 %v8515_v10  ;;  %7348 = vmatprep.subr.bf16.mxu1 %v8515_v10  ;;  %s658_s18 = scalar_lea.vmem %s9925_s26, %s8795_s21  ;;  %s9375_s16 = scalar_lea.vmem %s9866_s2, %s7079_s0 }
  0x92   : > { %v670_v1 = vunpack.c.l.bf16 %v669_v0  ;;  %v8847_v36 = vld [vmem:[%s658_s18] sm:$0xf]  ;;  %s667_s29 = scalar_lea.vmem %s9867_s3, %s8795_s21  ;;  %s9926_s17 = sld [smem:[#allocation27_spill]] }
  0x93   : > { %v6812_v57 = vld [vmem:[#allocation7] ss:$0 sm:$0xff]  ;;  %v6813_v58 = vld [vmem:[#allocation7 + $0x1] ss:$0 sm:$0xff]  ;;  %s9927_s0 = sld [smem:[#allocation23_spill]]  ;;  %s7075_s21 = sshll.u32 %s8632_s28, 7 }
  0x94   : > { %v683_v2 = vsel %vm682_vm0, %v670_v1, 0.0  ;;  %v6796_v59 = vld [vmem:[%s9871_s7] ss:$0 sm:$0xff]  ;;  %v6797_v60 = vld [vmem:[%s9871_s7 + $0x1] ss:$0 sm:$0xff]  ;;  %s9928_s15 = sld [smem:[#allocation30_spill]] }
  0x95   : > { %684 = vadd.xlane.f32.xlu0 %v683_v2  ;;  %s6607_s1 = sshll.u32 %s9196_s13, 4  ;;  %s6581_s20 = scalar_lea.sflag [#allocation12], %s9187_s27  ;;  %s6608_s1 = int_to_ptr.vmem [resolvable:$true] %s6607_s1 }
  0x96   : > { %s8399_s30 = scalar_lea.vmem %s6608_s1, 128  ;;  %s8519_s19 = smov [#allocation11]  }
  0x97   : > { %p8400_p8 = scmp.ne.s32.totalorder %s6608_s1, %s8399_s30  ;;  %s8403_s26 = sshll.u32 %s8519_s19, 4  ;;  %s8404_s26 = int_to_ptr.vmem [resolvable:$false] %s8403_s26 }
  0x98   : > { %s8405_s18 = scalar_lea.vmem %s8404_s26, 256  ;;  %p8406_p6 = scmp.lt.s32.totalorder %s6608_s1, %s8404_s26 }
  0x99   : > { %p9929_p11 = scmp.ne.s32.totalorder %s9927_s0, 0  ;;  %p8407_p9 = scmp.lt.s32.totalorder %s8405_s18, %s8399_s30 }
  0x9b   : > { %p8401_p13 = pnand %p8400_p8, %p9929_p11  ;;  %p8408_p5 = por %p8407_p9, %p8406_p6 }
  0x9d   : > { %p8402_p1 = pneg %p8401_p13 }
  0x9f   : > { %p8409_p0 = pnand %p8408_p5, %p8402_p1 }
 0x122   : > { %v685_v3 = vpop.xlane.xlu0 %684 }
 0x123   : > { %v687_v4 = vmul.f32 0.03125, %v685_v3 }
 0x125   : > { %v688_v5 = vsub.f32 %v670_v1, %v687_v4 }
 0x127   : > { %v689_v6 = vmul.f32 %v688_v5, %v688_v5  ;;  %v707_v22 = vmul.f32 %v6794_v21, %v688_v5 }
 0x129   : > { %v690_v7 = vsel %vm682_vm0, %v689_v6, 0.0 }
 0x12a   : > { %691 = vadd.xlane.f32.xlu0 %v690_v7 }
 0x1b7   : > { %v692_v13 = vpop.xlane.xlu0 %691 }
 0x1b8   : > { %v693_v14 = vmul.f32 0.032258064, %v692_v13 }
 0x1ba   : > { %8199 = vrsqrt.f32 %v693_v14  ;;  %vm696_vm2 = vcmp.eq.f32.partialorder %v693_v14, inf  ;;  %v699_v17 = vand.u32 2147483648, %v693_v14  ;;  %vm698_vm3 = vcmp.eq.f32.partialorder %v693_v14, 0.0 }
 0x1c4   : > { %v8200_v15 = vpop.eup %8199 }
 0x1c5   : > { %v695_v16 = vmul.f32 %v8200_v15, %v693_v14 }
 0x1c7   : > { %v697_v18 = vsel %vm696_vm2, %v693_v14, %v695_v16  ;;  %v6814_v14 = vld [vmem:[#allocation7 + $0x2] ss:$0 sm:$0xff] }
 0x1c8   : > { %v700_v19 = vsel %vm698_vm3, %v699_v17, %v697_v18  ;;  %v6815_v17 = vld [vmem:[#allocation7 + $0x3] ss:$0 sm:$0xff]  ;;  %v6798_v18 = vld [vmem:[%s9871_s7 + $0x2] ss:$0 sm:$0xff] }
 0x1c9   : > { %v708_v20 = vadd.f32 1e-06, %v700_v19  ;;  %v6799_v19 = vld [vmem:[%s9871_s7 + $0x3] ss:$0 sm:$0xff] }
 0x1cb   : > { %8201 = vrcp.f32 %v708_v20 }
 0x1d5   : > { %v8202_v23 = vpop.eup %8201 }
 0x1d6   : > { %v710_v25 = vmul.f32 %v8202_v23, %v707_v22 }
 0x1d8   : > { %v717_v26 = vadd.f32 %v6795_v24, %v710_v25 }
 0x1da   : > { %v8819_v29 = vpack.c.bf16 %v717_v26, %v717_v26 }
 0x1dc   : > { %7329 = vmatmul.mubr.msk.bf16.vlgmr.msra.gmra.mrb[0].mxu0 %vm682_vm0, %v8819_v29  ;;  %7337 = vmatmul.mubr.msk.bf16.vlgmr.msra.gmra.mrb[0].mxu1 %vm682_vm0, %v8819_v29 }
 0x1dd   : > { %7341 = vmatpush3.bf16.msra.mxu0 %v8121_v27  ;;  %7349 = vmatpush3.bf16.msra.mxu1 %v8122_v28 }
 0x1de   : > { %7342 = vmatprep.subr.bf16.mxu0 %v8515_v10  ;;  %7350 = vmatprep.subr.bf16.mxu1 %v8515_v10 }
 0x1df   : > { %7344 = vmatprep.mubr.msk.bf16.mxu0 %vm8516_vm1, %v8515_v10  ;;  %7352 = vmatprep.mubr.msk.bf16.mxu1 %vm8516_vm1, %v8515_v10 }
 0x1e1   : > { %7343 = vmatpush3.bf16.msra.mxu0 %v8123_v30  ;;  %7351 = vmatpush3.bf16.msra.mxu1 %v8124_v31 }
 0x1e2   : > { %7356 = vmatprep.subr.bf16.mxu0 %v8515_v10  ;;  %7364 = vmatprep.subr.bf16.mxu1 %v8515_v10 }
 0x1e4   : > { %7345 = vmatmul.mubr.msk.bf16.vlgmr.msra.gmra.mrb[4].mxu0 %vm682_vm0, %v8819_v29  ;;  %7353 = vmatmul.mubr.msk.bf16.vlgmr.msra.gmra.mrb[4].mxu1 %vm682_vm0, %v8819_v29 }
 0x1e5   : > { %7357 = vmatpush3.bf16.msra.mxu0 %v8125_v32  ;;  %7365 = vmatpush3.bf16.msra.mxu1 %v8126_v33 }
 0x1e6   : > { %7358 = vmatprep.subr.bf16.mxu0 %v8515_v10  ;;  %7366 = vmatprep.subr.bf16.mxu1 %v8515_v10 }
 0x1e7   : > { %7360 = vmatprep.mubr.msk.bf16.mxu0 %vm8516_vm1, %v8515_v10  ;;  %7368 = vmatprep.mubr.msk.bf16.mxu1 %vm8516_vm1, %v8515_v10 }
 0x1e9   : > { %7359 = vmatpush3.bf16.msra.mxu0 %v8127_v34  ;;  %7367 = vmatpush3.bf16.msra.mxu1 %v8128_v35 }
 0x1ea   : > { %7372 = vmatprep.subr.bf16.mxu0 %v8515_v10  ;;  %7380 = vmatprep.subr.bf16.mxu1 %v8515_v10 }
 0x1ec   : > { %7361 = vmatmul.mubr.msk.bf16.vlgmr.msra.gmra.mrb[8].mxu0 %vm682_vm0, %v8847_v36  ;;  %7369 = vmatmul.mubr.msk.bf16.vlgmr.msra.gmra.mrb[8].mxu1 %vm682_vm0, %v8847_v36 }
 0x1ed   : > { %7373 = vmatpush3.bf16.msra.mxu0 %v8129_v37  ;;  %7381 = vmatpush3.bf16.msra.mxu1 %v8130_v38 }
 0x1ee   : > { %7374 = vmatprep.subr.bf16.mxu0 %v8515_v10  ;;  %7382 = vmatprep.subr.bf16.mxu1 %v8515_v10 }
 0x1ef   : > { %7376 = vmatprep.mubr.msk.bf16.mxu0 %vm8516_vm1, %v8515_v10  ;;  %7384 = vmatprep.mubr.msk.bf16.mxu1 %vm8516_vm1, %v8515_v10 }
 0x1f1   : > { %7375 = vmatpush3.bf16.msra.mxu0 %v8131_v39  ;;  %7383 = vmatpush3.bf16.msra.mxu1 %v8132_v40 }
 0x1f2   : > { %7388 = vmatprep.subr.bf16.mxu0 %v8515_v10  ;;  %7394 = vmatprep.subr.bf16.mxu1 %v8515_v10 }
 0x1f4   : > { %7377 = vmatmul.mubr.msk.bf16.vlgmr.msra.gmra.mrb[12].mxu0 %vm682_vm0, %v8847_v36  ;;  %7385 = vmatmul.mubr.msk.bf16.vlgmr.msra.gmra.mrb[12].mxu1 %vm682_vm0, %v8847_v36 }
 0x1f5   : > { %7390 = vmatprep.mubr.msk.bf16.mxu0 %vm8516_vm1, %v8515_v10  ;;  %7396 = vmatprep.mubr.msk.bf16.mxu1 %vm8516_vm1, %v8515_v10 }
 0x2af   : > { %v832_v41 = vpop.f32.mrb[0].mxu0  ;;  %v884_v42 = vpop.f32.mrb[0].mxu1 }
 0x2b0   : > { %v7330_v43 = vpop.f32.mrb[1].mxu0  ;;  %v7338_v44 = vpop.f32.mrb[1].mxu1  ;;  %v833_v3 = vadd.f32 %v6796_v59, %v832_v41  ;;  %v885_v4 = vadd.f32 %v6797_v60, %v884_v42 }
 0x2b1   : > { %v835_v45 = vpop.f32.mrb[2].mxu0  ;;  %v887_v46 = vpop.f32.mrb[2].mxu1  ;;  %v672_v44 = vlaneseq }
 0x2b2   : > { %v7331_v47 = vpop.f32.mrb[3].mxu0  ;;  %v7339_v48 = vpop.f32.mrb[3].mxu1  ;;  %v994_v15 = vmul.f32 0.35355338, %v833_v3  ;;  %v995_v16 = vmul.f32 0.35355338, %v885_v4 }
 0x2b3   : > { %v8909_v45 = vshrl.u32 %v672_v44, 7  ;;  %v675_v46 = vand.u32 127, %v672_v44  ;;  %v8517_v47 = vmov -1e+09  }
 0x2b4   : > { %v998_v26 = vpack.c.bf16 %v994_v15, %v994_v15  ;;  %v999_v27 = vpack.c.bf16 %v995_v16, %v995_v16 }
 0x2b5   : > { %vm676_vm5 = vcmp.ge.s32.totalorder %v8909_v45, %v675_v46  ;;  %vm6126_vm13 = vcmp.eq.s32.totalorder %v8909_v45, 0  ;;  %vm6127_vm14 = vcmp.eq.s32.totalorder %v8909_v45, 7 }
 0x2b6   : > { %v8912_v48 = vsel %vm676_vm5, 0.0, %v8517_v47 }
 0x2b7   : > { %v936_v49 = vpop.f32.mrb[4].mxu0  ;;  %v988_v50 = vpop.f32.mrb[4].mxu1 }
 0x2b8   : > { %v7346_v51 = vpop.f32.mrb[5].mxu0  ;;  %v7354_v52 = vpop.f32.mrb[5].mxu1  ;;  %v937_v31 = vadd.f32 %v6798_v18, %v936_v49  ;;  %v989_v32 = vadd.f32 %v6799_v19, %v988_v50 }
 0x2b9   : > { %v939_v53 = vpop.f32.mrb[6].mxu0  ;;  %v991_v54 = vpop.f32.mrb[6].mxu1 }
 0x2ba   : > { %v7347_v55 = vpop.f32.mrb[7].mxu0  ;;  %v7355_v56 = vpop.f32.mrb[7].mxu1  ;;  %v996_v40 = vmul.f32 0.35355338, %v937_v31  ;;  %v997_v41 = vmul.f32 0.35355338, %v989_v32 }
 0x2bc   : > { %v1000_v42 = vpack.c.bf16 %v996_v40, %v996_v40  ;;  %v1001_v43 = vpack.c.bf16 %v997_v41, %v997_v41 }
 0x2bf   : > { %v1079_v61 = vpop.f32.mrb[8].mxu0  ;;  %v1131_v62 = vpop.f32.mrb[8].mxu1 }
 0x2c0   : > { %v1080_v63 = vadd.f32 %v6812_v57, %v1079_v61  ;;  %v1132_v0 = vadd.f32 %v6813_v58, %v1131_v62  ;;  %v7362_v1 = vpop.f32.mrb[9].mxu0  ;;  %v7370_v2 = vpop.f32.mrb[9].mxu1 }
 0x2c1   : > { %v1082_v5 = vpop.f32.mrb[10].mxu0  ;;  %v1134_v6 = vpop.f32.mrb[10].mxu1 }
 0x2c2   : > { %v8877_v7 = vpack.c.bf16 %v1080_v63, %v1080_v63  ;;  %v8879_v8 = vpack.c.bf16 %v1132_v0, %v1132_v0  ;;  %v7363_v9 = vpop.f32.mrb[11].mxu0  ;;  %v7371_v11 = vpop.f32.mrb[11].mxu1 }
 0x2c4   : > { %v1250_v12 = vsel %vm1245_vm4, %v8877_v7, 0  ;;  %v1296_v13 = vsel %vm1245_vm4, %v8879_v8, 0 }
 0x2c5   : > { %7389 = vmatpush3.bf16.xpose.msra.mxu0 %v1250_v12  ;;  %7395 = vmatpush3.bf16.xpose.msra.mxu1 %v1296_v13 }
 0x2c6   : > { %7400 = vmatprep.subr.bf16.mxu0 %v8515_v10  ;;  %7406 = vmatprep.subr.bf16.mxu1 %v8515_v10 }
 0x2c7   : > { %v1183_v20 = vpop.f32.mrb[12].mxu0  ;;  %v1235_v21 = vpop.f32.mrb[12].mxu1 }
 0x2c8   : > { %v1184_v22 = vadd.f32 %v6814_v14, %v1183_v20  ;;  %v1236_v23 = vadd.f32 %v6815_v17, %v1235_v21  ;;  %v7386_v24 = vpop.f32.mrb[13].mxu1  ;;  %v7378_v25 = vpop.f32.mrb[13].mxu0 }
 0x2c9   : > { %v1238_v28 = vpop.f32.mrb[14].mxu1  ;;  %v1186_v30 = vpop.f32.mrb[14].mxu0 }
 0x2ca   : > { %v1243_v33 = vpack.c.bf16 %v1184_v22, %v1184_v22  ;;  %v1244_v34 = vpack.c.bf16 %v1236_v23, %v1236_v23  ;;  %v7387_v35 = vpop.f32.mrb[15].mxu1  ;;  %v7379_v37 = vpop.f32.mrb[15].mxu0 }
 0x2cc   : > { %v1342_v38 = vsel %vm1245_vm4, %v1243_v33, 0  ;;  %v1388_v39 = vsel %vm1245_vm4, %v1244_v34, 0  ;;  %7391 = vmatmul.mubr.msk.bf16.vlgmr.msra.gmra.mrb[16].mxu0 %vm1245_vm4, %v998_v26  ;;  %7397 = vmatmul.mubr.msk.bf16.vlgmr.msra.gmra.mrb[16].mxu1 %vm1245_vm4, %v999_v27 }
 0x2cd   : > { %7401 = vmatpush3.bf16.xpose.msra.mxu0 %v1342_v38  ;;  %7407 = vmatpush3.bf16.xpose.msra.mxu1 %v1388_v39 }
 0x2ce   : > { %7402 = vmatprep.mubr.msk.bf16.mxu0 %vm8516_vm1, %v8515_v10  ;;  %7408 = vmatprep.mubr.msk.bf16.mxu1 %vm8516_vm1, %v8515_v10 }
 0x2cf   : > { %7418 = vmatprep.subr.bf16.mxu1 %v8515_v10  ;;  %7412 = vmatprep.subr.bf16.mxu0 %v8515_v10 }
 0x2d4   : > { %7403 = vmatmul.mubr.msk.bf16.vlgmr.msra.gmra.mrb[20].mxu0 %vm1245_vm4, %v1000_v42  ;;  %7409 = vmatmul.mubr.msk.bf16.vlgmr.msra.gmra.mrb[20].mxu1 %vm1245_vm4, %v1001_v43 }
 0x2d5   : > { %7414 = vmatprep.mubr.msk.bf16.mxu0 %vm8516_vm1, %v8515_v10  ;;  %7420 = vmatprep.mubr.msk.bf16.mxu1 %vm8516_vm1, %v8515_v10 }
 0x39f   : > { %v1286_v49 = vpop.f32.mrb[16].mxu0  ;;  %v1332_v50 = vpop.f32.mrb[16].mxu1 }
 0x3a0   : > { %v1287_v51 = vadd.f32 %v1286_v49, %v8912_v48  ;;  %v7392_v52 = vpop.f32.mrb[17].mxu0  ;;  %v7398_v53 = vpop.f32.mrb[17].mxu1  ;;  %v1333_v56 = vadd.f32 %v1332_v50, %v8912_v48  ;;  %v750_v50 = vld [vmem:[%s9874_s10] sm:$0xf] }
 0x3a1   : > { %v1289_v54 = vpop.f32.mrb[18].mxu0  ;;  %v1335_v55 = vpop.f32.mrb[18].mxu1  ;;  %v751_v52 = vld [vmem:[%s9874_s10 + $0x4] sm:$0xf] }
 0x3a2   : > { %v7393_v57 = vpop.f32.mrb[19].mxu0  ;;  %v7399_v58 = vpop.f32.mrb[19].mxu1  ;;  %v1430_v59 = vsel %vm1245_vm4, %v1287_v51, -inf  ;;  %v1433_v60 = vsel %vm1245_vm4, %v1333_v56, -inf  ;;  %v1737_v53 = vsel %vm1484_vm6, %v751_v52, 0 }
 0x3a3   : > { %1431 = vmax.xlane.f32.xlu1 %v1430_v59  ;;  %v752_v59 = vld [vmem:[%s9874_s10 + $0x8] sm:$0xf] }
 0x3a7   : > { %v1424_v61 = vpop.f32.mrb[20].mxu1  ;;  %1434 = vmax.xlane.f32.xlu1 %v1433_v60  ;;  %v1378_v62 = vpop.f32.mrb[20].mxu0 }
 0x3a8   : > { %v1379_v63 = vadd.f32 %v1378_v62, %v8912_v48  ;;  %v7404_v0 = vpop.f32.mrb[21].mxu0  ;;  %v7410_v1 = vpop.f32.mrb[21].mxu1  ;;  %v1425_v9 = vadd.f32 %v1424_v61, %v8912_v48 }
 0x3a9   : > { %v1381_v2 = vpop.f32.mrb[22].mxu0  ;;  %v1427_v3 = vpop.f32.mrb[22].mxu1  ;;  %v1783_v1 = vsel %vm1484_vm6, %v752_v59, 0 }
 0x3aa   : > { %v7405_v4 = vpop.f32.mrb[23].mxu0  ;;  %v7411_v5 = vpop.f32.mrb[23].mxu1  ;;  %v1436_v6 = vsel %vm1245_vm4, %v1379_v63, -inf  ;;  %v1439_v11 = vsel %vm1245_vm4, %v1425_v9, -inf }
 0x3ab   : > { %1437 = vmax.xlane.f32.xlu0 %v1436_v6  ;;  %v753_v4 = vld [vmem:[%s9874_s10 + $0xc] sm:$0xf] }
 0x3b8   : > { %1529 = vrot.lane.b32.xlu1 %v8879_v8, %s8518_s22 }
 0x3bc   : > { %1578 = vrot.lane.b32.xlu1 %v1243_v33, %s8518_s22 }
 0x3c1   : > { %1479 = vrot.lane.b32.xlu0 %v8877_v7, %s8518_s22 }
 0x3e0   : > { %1440 = vmax.xlane.f32.xlu1 %v1439_v11 }
 0x3f1   : > { %1627 = vrot.lane.b32.xlu1 %v1244_v34, %s8518_s22 }
 0x430   : > { %v1432_v12 = vpop.xlane.xlu1 %1431 }
 0x431   : > { %v1442_v13 = vmax.f32 %v1432_v12, -1e+30 }
 0x433   : > { %v1446_v14 = vsub.f32 %v1287_v51, %v1442_v13  ;;  %v1691_v51 = vsel %vm1484_vm6, %v750_v50, 0  ;;  %v1829_v13 = vsel %vm1484_vm6, %v753_v4, 0 }
 0x434   : > { %v1435_v15 = vpop.xlane.xlu1 %1434 }
 0x435   : > { %v1450_v16 = vmul.f32 1.442695, %v1446_v14  ;;  %v1443_v17 = vmax.f32 %v1435_v15, -1e+30 }
 0x437   : > { %8203 = vpow2.f32 %v1450_v16  ;;  %v1447_v8 = vsub.f32 %v1333_v56, %v1443_v17 }
 0x438   : > { %v1530_v18 = vpop.permute.xlu1 %1529  ;;  %v1438_v19 = vpop.xlane.xlu0 %1437 }
 0x439   : > { %v1452_v20 = vmul.f32 1.442695, %v1447_v8  ;;  %v1535_v7 = vsel %vm1484_vm6, %v1530_v18, 0  ;;  %v1444_v21 = vmax.f32 %v1438_v19, -1e+30  ;;  %v8133_v18 = vld [vmem:[#allocation2 + $0x40] sm:$0xff]  }
 0x43a   : > { %7419 = vmatpush3.bf16.msra.mxu1 %v1535_v7  ;;  %v8134_v7 = vld [vmem:[#allocation2 + $0x48] sm:$0xff]  }
 0x43b   : > { %8205 = vpow2.f32 %v1452_v20  ;;  %v1448_v22 = vsub.f32 %v1379_v63, %v1444_v21  ;;  %7430 = vmatprep.subr.bf16.mxu1 %v8515_v10  ;;  %v8135_v21 = vld [vmem:[#allocation2 + $0x60] sm:$0xff]  }
 0x43c   : > { %v1480_v23 = vpop.permute.xlu0 %1479  ;;  %v1579_v27 = vpop.permute.xlu1 %1578 }
 0x43d   : > { %v1454_v24 = vmul.f32 1.442695, %v1448_v22  ;;  %v1486_v25 = vsel %vm1484_vm6, %v1480_v23, 0  ;;  %v1584_v31 = vsel %vm1484_vm6, %v1579_v27, 0  ;;  %v8136_v22 = vld [vmem:[#allocation2 + $0x68] sm:$0xff]   ;;  %v8137_v23 = vld [vmem:[#allocation5 + $0x40] sm:$0xff]  }
 0x43e   : > { %7413 = vmatpush3.bf16.msra.mxu0 %v1486_v25  ;;  %v8139_v25 = vld [vmem:[#allocation5 + $0x60] sm:$0xff]  }
 0x43f   : > { %8207 = vpow2.f32 %v1454_v24  ;;  %7424 = vmatprep.subr.bf16.mxu0 %v8515_v10  ;;  %v8138_v24 = vld [vmem:[#allocation5 + $0x48] sm:$0xff]  }
 0x441   : > { %v8204_v26 = vpop.eup %8203 }
 0x442   : > { %v1458_v28 = vsel %vm1245_vm4, %v8204_v26, 0.0  ;;  %v1474_v30 = vpack.c.bf16 %v8204_v26, %v8204_v26  ;;  %v8140_v26 = vld [vmem:[#allocation5 + $0x68] sm:$0xff]  }
 0x443   : > { %1459 = vadd.xlane.f32.xlu0 %v1458_v28 }
 0x444   : > { %7415 = vmatmul.mubr.msk.bf16.vlgmr.msra.gmra.mrb[24].mxu0 %vm1245_vm4, %v1474_v30 }
 0x445   : > { %v8206_v32 = vpop.eup %8205  ;;  %7425 = vmatpush3.bf16.msra.mxu0 %v1584_v31  ;;  %7426 = vmatprep.mubr.msk.bf16.mxu0 %vm8516_vm1, %v8515_v10 }
 0x446   : > { %v1461_v33 = vsel %vm1245_vm4, %v8206_v32, 0.0  ;;  %v1475_v34 = vpack.c.bf16 %v8206_v32, %v8206_v32  ;;  %7436 = vmatprep.subr.bf16.mxu0 %v8515_v10 }
 0x447   : > { %1462 = vadd.xlane.f32.xlu1 %v1461_v33 }
 0x448   : > { %7421 = vmatmul.mubr.msk.bf16.vlgmr.msra.gmra.mrb[24].mxu1 %vm1245_vm4, %v1475_v34  ;;  %v8141_v34 = vld [vmem:[#allocation2 + $0x50] sm:$0xff]  }
 0x449   : > { %v8208_v35 = vpop.eup %8207  ;;  %7432 = vmatprep.mubr.msk.bf16.mxu1 %vm8516_vm1, %v8515_v10 }
 0x44a   : > { %v1464_v37 = vsel %vm1245_vm4, %v8208_v35, 0.0  ;;  %v1476_v38 = vpack.c.bf16 %v8208_v35, %v8208_v35 }
 0x44b   : > { %1465 = vadd.xlane.f32.xlu0 %v1464_v37 }
 0x44c   : > { %7427 = vmatmul.mubr.msk.bf16.vlgmr.msra.gmra.mrb[28].mxu0 %vm1245_vm4, %v1476_v38  ;;  %v8142_v38 = vld [vmem:[#allocation2 + $0x58] sm:$0xff]  }
 0x44d   : > { %7438 = vmatprep.mubr.msk.bf16.mxu0 %vm8516_vm1, %v8515_v10  ;;  %7437 = vmatpush3.bf16.msra.mxu0 %v1691_v51 }
 0x44e   : > { %7448 = vmatprep.subr.bf16.mxu0 %v8515_v10 }
 0x46d   : > { %v1441_v39 = vpop.xlane.xlu1 %1440 }
 0x46e   : > { %v1445_v40 = vmax.f32 %v1441_v39, -1e+30  ;;  %v8143_v39 = vld [vmem:[#allocation2 + $0x70] sm:$0xff]  }
 0x470   : > { %v1449_v41 = vsub.f32 %v1425_v9, %v1445_v40  ;;  %v8144_v40 = vld [vmem:[#allocation2 + $0x78] sm:$0xff]  }
 0x471   : > { %v1628_v42 = vpop.permute.xlu1 %1627 }
 0x472   : > { %v1456_v43 = vmul.f32 1.442695, %v1449_v41  ;;  %v1633_v44 = vsel %vm1484_vm6, %v1628_v42, 0  ;;  %v8145_v41 = vld [vmem:[#allocation5 + $0x50] sm:$0xff]   ;;  %v8146_v42 = vld [vmem:[#allocation5 + $0x58] sm:$0xff]  }
 0x473   : > { %7431 = vmatpush3.bf16.msra.mxu1 %v1633_v44  ;;  %v8148_v44 = vld [vmem:[#allocation5 + $0x78] sm:$0xff]  }
 0x474   : > { %8209 = vpow2.f32 %v1456_v43  ;;  %7442 = vmatprep.subr.bf16.mxu1 %v8515_v10  ;;  %v8147_v43 = vld [vmem:[#allocation5 + $0x70] sm:$0xff]  }
 0x47e   : > { %v8210_v46 = vpop.eup %8209 }
 0x47f   : > { %v1467_v47 = vsel %vm1245_vm4, %v8210_v46, 0.0  ;;  %v1477_v49 = vpack.c.bf16 %v8210_v46, %v8210_v46 }
 0x480   : > { %1468 = vadd.xlane.f32.xlu0 %v1467_v47 }
 0x481   : > { %7433 = vmatmul.mubr.msk.bf16.vlgmr.msra.gmra.mrb[28].mxu1 %vm1245_vm4, %v1477_v49 }
 0x482   : > { %7444 = vmatprep.mubr.msk.bf16.mxu1 %vm8516_vm1, %v8515_v10  ;;  %7443 = vmatpush3.bf16.msra.mxu1 %v1737_v53 }
 0x483   : > { %7454 = vmatprep.subr.bf16.mxu1 %v8515_v10 }
 0x4d0   : > { %v1460_v54 = vpop.xlane.xlu0 %1459 }
 0x4d1   : > { %8211 = vrcp.f32 %v1460_v54 }
 0x4d4   : > { %v1463_v55 = vpop.xlane.xlu1 %1462 }
 0x4d5   : > { %8213 = vrcp.f32 %v1463_v55 }
 0x4d8   : > { %v1466_v56 = vpop.xlane.xlu0 %1465 }
 0x4d9   : > { %8215 = vrcp.f32 %v1466_v56 }
 0x4db   : > { %v8212_v57 = vpop.eup %8211 }
 0x4df   : > { %v8214_v2 = vpop.eup %8213 }
 0x4e3   : > { %v8216_v14 = vpop.eup %8215 }
 0x50d   : > { %v1469_v27 = vpop.xlane.xlu0 %1468 }
 0x50e   : > { %8217 = vrcp.f32 %v1469_v27 }
 0x517   : > { %v1522_v58 = vpop.f32.mrb[24].mxu0 }
 0x518   : > { %v1679_v60 = vmul.f32 %v8212_v57, %v1522_v58  ;;  %v7416_v61 = vpop.f32.mrb[25].mxu0  ;;  %v8218_v28 = vpop.eup %8217 }
 0x519   : > { %v1525_v62 = vpop.f32.mrb[26].mxu0 }
 0x51a   : > { %v1683_v63 = vpack.c.bf16 %v1679_v60, %v1679_v60  ;;  %v7417_v0 = vpop.f32.mrb[27].mxu0 }
 0x51b   : > { %v1571_v3 = vpop.f32.mrb[24].mxu1 }
 0x51c   : > { %v1680_v5 = vmul.f32 %v8214_v2, %v1571_v3  ;;  %v7422_v6 = vpop.f32.mrb[25].mxu1  ;;  %7439 = vmatmul.mubr.msk.bf16.vlgmr.msra.gmra.mrb[32].mxu0 %vm1245_vm4, %v1683_v63 }
 0x51d   : > { %v1574_v9 = vpop.f32.mrb[26].mxu1  ;;  %7449 = vmatpush3.bf16.msra.mxu0 %v1783_v1  ;;  %7450 = vmatprep.mubr.msk.bf16.mxu0 %vm8516_vm1, %v8515_v10  ;;  %v6849_v6 = vld [vmem:[%s9871_s7 + $0x4] ss:$0 sm:$0xff] }
 0x51e   : > { %v1684_v11 = vpack.c.bf16 %v1680_v5, %v1680_v5  ;;  %v7423_v12 = vpop.f32.mrb[27].mxu1  ;;  %7460 = vmatprep.subr.bf16.mxu0 %v8515_v10  ;;  %v6865_v9 = vld [vmem:[#allocation7 + $0x4] ss:$0 sm:$0xff] }
 0x51f   : > { %v1620_v15 = vpop.f32.mrb[28].mxu0 }
 0x520   : > { %v1681_v16 = vmul.f32 %v8216_v14, %v1620_v15  ;;  %v7428_v17 = vpop.f32.mrb[29].mxu0  ;;  %7445 = vmatmul.mubr.msk.bf16.vlgmr.msra.gmra.mrb[32].mxu1 %vm1245_vm4, %v1684_v11 }
 0x521   : > { %v1623_v8 = vpop.f32.mrb[30].mxu0  ;;  %7455 = vmatpush3.bf16.msra.mxu1 %v1829_v13  ;;  %7456 = vmatprep.mubr.msk.bf16.mxu1 %vm8516_vm1, %v8515_v10 }
 0x522   : > { %v1685_v19 = vpack.c.bf16 %v1681_v16, %v1681_v16  ;;  %v7429_v20 = vpop.f32.mrb[31].mxu0  ;;  %7468 = vmatprep.subr.bf16.mxu1 %v8515_v10 }
 0x523   : > { %v6867_v20 = vld [vmem:[#allocation7 + $0x6] ss:$0 sm:$0xff] }
 0x524   : > { %7451 = vmatmul.mubr.msk.bf16.vlgmr.msra.gmra.mrb[36].mxu0 %vm1245_vm4, %v1685_v19  ;;  %v6851_v19 = vld [vmem:[%s9871_s7 + $0x6] ss:$0 sm:$0xff] }
 0x525   : > { %7461 = vmatpush3.bf16.msra.mxu0 %v8133_v18  ;;  %7464 = vmatprep.mubr.msk.bf16.mxu0 %vm8516_vm1, %v8515_v10 }
 0x526   : > { %7462 = vmatprep.subr.bf16.mxu0 %v8515_v10 }
 0x529   : > { %7463 = vmatpush3.bf16.msra.mxu0 %v8134_v7 }
 0x52a   : > { %7476 = vmatprep.subr.bf16.mxu0 %v8515_v10 }
 0x52c   : > { %7465 = vmatmul.mubr.msk.bf16.vlgmr.msra.gmra.mrb[40].mxu0 %vm682_vm0, %v8847_v36 }
 0x52d   : > { %7477 = vmatpush3.bf16.msra.mxu0 %v8135_v21  ;;  %7480 = vmatprep.mubr.msk.bf16.mxu0 %vm8516_vm1, %v8515_v10 }
 0x52e   : > { %7478 = vmatprep.subr.bf16.mxu0 %v8515_v10 }
 0x531   : > { %7479 = vmatpush3.bf16.msra.mxu0 %v8136_v22 }
 0x532   : > { %7492 = vmatprep.subr.bf16.mxu0 %v8515_v10 }
 0x534   : > { %7481 = vmatmul.mubr.msk.bf16.vlgmr.msra.gmra.mrb[44].mxu0 %vm682_vm0, %v8847_v36 }
 0x535   : > { %7493 = vmatpush3.bf16.msra.mxu0 %v8137_v23  ;;  %7496 = vmatprep.mubr.msk.bf16.mxu0 %vm8516_vm1, %v8515_v10 }
 0x536   : > { %7494 = vmatprep.subr.bf16.mxu0 %v8515_v10 }
 0x539   : > { %7495 = vmatpush3.bf16.msra.mxu0 %v8138_v24 }
 0x53a   : > { %7508 = vmatprep.subr.bf16.mxu0 %v8515_v10 }
 0x53c   : > { %7497 = vmatmul.mubr.msk.bf16.vlgmr.msra.gmra.mrb[48].mxu0 %vm682_vm0, %v8819_v29 }
 0x53d   : > { %7509 = vmatpush3.bf16.msra.mxu0 %v8139_v25  ;;  %7512 = vmatprep.mubr.msk.bf16.mxu0 %vm8516_vm1, %v8515_v10 }
 0x53e   : > { %7510 = vmatprep.subr.bf16.mxu0 %v8515_v10 }
 0x541   : > { %7511 = vmatpush3.bf16.msra.mxu0 %v8140_v26 }
 0x542   : > { %7524 = vmatprep.subr.bf16.mxu0 %v8515_v10 }
 0x544   : > { %7513 = vmatmul.mubr.msk.bf16.vlgmr.msra.gmra.mrb[52].mxu0 %vm682_vm0, %v8819_v29 }
 0x545   : > { %7526 = vmatprep.mubr.msk.bf16.mxu0 %vm8516_vm1, %v8515_v10 }
 0x554   : > { %v1669_v30 = vpop.f32.mrb[28].mxu1 }
 0x555   : > { %v1682_v31 = vmul.f32 %v8218_v28, %v1669_v30  ;;  %v7434_v32 = vpop.f32.mrb[29].mxu1 }
 0x556   : > { %v1672_v33 = vpop.f32.mrb[30].mxu1 }
 0x557   : > { %v1686_v35 = vpack.c.bf16 %v1682_v31, %v1682_v31  ;;  %v7435_v37 = vpop.f32.mrb[31].mxu1 }
 0x559   : > { %7457 = vmatmul.mubr.msk.bf16.vlgmr.msra.gmra.mrb[36].mxu1 %vm1245_vm4, %v1686_v35 }
 0x55a   : > { %7469 = vmatpush3.bf16.msra.mxu1 %v8141_v34  ;;  %7472 = vmatprep.mubr.msk.bf16.mxu1 %vm8516_vm1, %v8515_v10 }
 0x55b   : > { %7470 = vmatprep.subr.bf16.mxu1 %v8515_v10 }
 0x55e   : > { %7471 = vmatpush3.bf16.msra.mxu1 %v8142_v38 }
 0x55f   : > { %7484 = vmatprep.subr.bf16.mxu1 %v8515_v10 }
 0x561   : > { %7473 = vmatmul.mubr.msk.bf16.vlgmr.msra.gmra.mrb[40].mxu1 %vm682_vm0, %v8847_v36 }
 0x562   : > { %7485 = vmatpush3.bf16.msra.mxu1 %v8143_v39  ;;  %7488 = vmatprep.mubr.msk.bf16.mxu1 %vm8516_vm1, %v8515_v10 }
 0x563   : > { %7486 = vmatprep.subr.bf16.mxu1 %v8515_v10 }
 0x566   : > { %7487 = vmatpush3.bf16.msra.mxu1 %v8144_v40 }
 0x567   : > { %7500 = vmatprep.subr.bf16.mxu1 %v8515_v10 }
 0x569   : > { %7489 = vmatmul.mubr.msk.bf16.vlgmr.msra.gmra.mrb[44].mxu1 %vm682_vm0, %v8847_v36 }
 0x56a   : > { %7501 = vmatpush3.bf16.msra.mxu1 %v8145_v41  ;;  %7504 = vmatprep.mubr.msk.bf16.mxu1 %vm8516_vm1, %v8515_v10 }
 0x56b   : > { %7502 = vmatprep.subr.bf16.mxu1 %v8515_v10 }
 0x56e   : > { %7503 = vmatpush3.bf16.msra.mxu1 %v8146_v42 }
 0x56f   : > { %7516 = vmatprep.subr.bf16.mxu1 %v8515_v10 }
 0x571   : > { %7505 = vmatmul.mubr.msk.bf16.vlgmr.msra.gmra.mrb[48].mxu1 %vm682_vm0, %v8819_v29 }
 0x572   : > { %7517 = vmatpush3.bf16.msra.mxu1 %v8147_v43  ;;  %7520 = vmatprep.mubr.msk.bf16.mxu1 %vm8516_vm1, %v8515_v10 }
 0x573   : > { %7518 = vmatprep.subr.bf16.mxu1 %v8515_v10 }
 0x576   : > { %7519 = vmatpush3.bf16.msra.mxu1 %v8148_v44 }
 0x577   : > { %7530 = vmatprep.subr.bf16.mxu1 %v8515_v10 }
 0x579   : > { %7521 = vmatmul.mubr.msk.bf16.vlgmr.msra.gmra.mrb[52].mxu1 %vm682_vm0, %v8819_v29 }
 0x57a   : > { %7532 = vmatprep.mubr.msk.bf16.mxu1 %vm8516_vm1, %v8515_v10 }
 0x5ef   : > { %v1727_v36 = vpop.f32.mrb[32].mxu0 }
 0x5f0   : > { %v7440_v46 = vpop.f32.mrb[33].mxu0  ;;  %v1871_v51 = vsel %vm682_vm0, %v1727_v36, 0.0 }
 0x5f1   : > { %v1730_v47 = vpop.f32.mrb[34].mxu0 }
 0x5f2   : > { %v7441_v49 = vpop.f32.mrb[35].mxu0  ;;  %v6866_v47 = vld [vmem:[#allocation7 + $0x5] ss:$0 sm:$0xff] }
 0x5f3   : > { %v1773_v50 = vpop.f32.mrb[32].mxu1  ;;  %v6850_v49 = vld [vmem:[%s9871_s7 + $0x5] ss:$0 sm:$0xff] }
 0x5f4   : > { %v1872_v52 = vsel %vm682_vm0, %v1773_v50, 0.0  ;;  %v7446_v53 = vpop.f32.mrb[33].mxu1 }
 0x5f5   : > { %v1873_v54 = vadd.f32 %v1872_v52, %v1871_v51  ;;  %v1776_v55 = vpop.f32.mrb[34].mxu1 }
 0x5f6   : > { %v7447_v56 = vpop.f32.mrb[35].mxu1 }
 0x5f7   : > { %v1819_v57 = vpop.f32.mrb[36].mxu0 }
 0x5f8   : > { %v1874_v58 = vsel %vm682_vm0, %v1819_v57, 0.0  ;;  %v7452_v29 = vpop.f32.mrb[37].mxu0 }
 0x5f9   : > { %v1875_v59 = vadd.f32 %v1874_v58, %v1873_v54  ;;  %v1822_v60 = vpop.f32.mrb[38].mxu0  ;;  %v6868_v58 = vld [vmem:[#allocation7 + $0x7] ss:$0 sm:$0xff] }
 0x5fa   : > { %v7453_v61 = vpop.f32.mrb[39].mxu0 }
 0x5ff   : > { %v2000_v62 = vpop.f32.mrb[40].mxu0 }
 0x600   : > { %v7466_v63 = vpop.f32.mrb[41].mxu0  ;;  %v2001_v12 = vadd.f32 %v6849_v6, %v2000_v62 }
 0x601   : > { %v2003_v0 = vpop.f32.mrb[42].mxu0 }
 0x602   : > { %v7467_v1 = vpop.f32.mrb[43].mxu0  ;;  %v2162_v8 = vmul.f32 0.35355338, %v2001_v12 }
 0x604   : > { %v2166_v21 = vpack.c.bf16 %v2162_v8, %v2162_v8 }
 0x607   : > { %v2104_v2 = vpop.f32.mrb[44].mxu0 }
 0x608   : > { %v7482_v3 = vpop.f32.mrb[45].mxu0  ;;  %v2105_v22 = vadd.f32 %v6851_v19, %v2104_v2 }
 0x609   : > { %v2107_v4 = vpop.f32.mrb[46].mxu0 }
 0x60a   : > { %v7483_v5 = vpop.f32.mrb[47].mxu0  ;;  %v2164_v28 = vmul.f32 0.35355338, %v2105_v22 }
 0x60c   : > { %v2168_v31 = vpack.c.bf16 %v2164_v28, %v2164_v28 }
 0x60f   : > { %v2245_v11 = vpop.f32.mrb[48].mxu0 }
 0x610   : > { %v2246_v13 = vadd.f32 %v6865_v9, %v2245_v11  ;;  %v7498_v14 = vpop.f32.mrb[49].mxu0 }
 0x611   : > { %v2248_v15 = vpop.f32.mrb[50].mxu0 }
 0x612   : > { %v9038_v16 = vpack.c.bf16 %v2246_v13, %v2246_v13  ;;  %v7499_v17 = vpop.f32.mrb[51].mxu0 }
 0x614   : > { %v2415_v18 = vsel %vm1245_vm4, %v9038_v16, 0 }
 0x615   : > { %7525 = vmatpush3.bf16.xpose.msra.mxu0 %v2415_v18 }
 0x616   : > { %7536 = vmatprep.subr.bf16.mxu0 %v8515_v10 }
 0x617   : > { %v2349_v7 = vpop.f32.mrb[52].mxu0 }
 0x618   : > { %v2350_v23 = vadd.f32 %v6867_v20, %v2349_v7  ;;  %v7514_v24 = vpop.f32.mrb[53].mxu0 }
 0x619   : > { %v2352_v25 = vpop.f32.mrb[54].mxu0 }
 0x61a   : > { %v9046_v26 = vpack.c.bf16 %v2350_v23, %v2350_v23  ;;  %v7515_v27 = vpop.f32.mrb[55].mxu0 }
 0x61c   : > { %v2507_v30 = vsel %vm1245_vm4, %v9046_v26, 0  ;;  %7527 = vmatmul.mubr.msk.bf16.vlgmr.msra.gmra.mrb[56].mxu0 %vm1245_vm4, %v2166_v21 }
 0x61d   : > { %7537 = vmatpush3.bf16.xpose.msra.mxu0 %v2507_v30  ;;  %7538 = vmatprep.mubr.msk.bf16.mxu0 %vm8516_vm1, %v8515_v10 }
 0x61e   : > { %7548 = vmatprep.subr.bf16.mxu0 %v8515_v10 }
 0x624   : > { %7539 = vmatmul.mubr.msk.bf16.vlgmr.msra.gmra.mrb[60].mxu0 %vm1245_vm4, %v2168_v31 }
 0x625   : > { %7550 = vmatprep.mubr.msk.bf16.mxu0 %vm8516_vm1, %v8515_v10 }
 0x62c   : > { %v1865_v32 = vpop.f32.mrb[36].mxu1 }
 0x62d   : > { %v1876_v33 = vsel %vm682_vm0, %v1865_v32, 0.0  ;;  %v7458_v34 = vpop.f32.mrb[37].mxu1 }
 0x62e   : > { %v9058_v35 = vadd.f32 %v1876_v33, %v1875_v59  ;;  %v1868_v37 = vpop.f32.mrb[38].mxu1  ;;  %v6852_v59 = vld [vmem:[%s9871_s7 + $0x7] ss:$0 sm:$0xff] }
 0x62f   : > { %v7459_v38 = vpop.f32.mrb[39].mxu1 }
 0x634   : > { %v2052_v39 = vpop.f32.mrb[40].mxu1 }
 0x635   : > { %v7474_v40 = vpop.f32.mrb[41].mxu1  ;;  %v2053_v54 = vadd.f32 %v6850_v49, %v2052_v39 }
 0x636   : > { %v2055_v41 = vpop.f32.mrb[42].mxu1 }
 0x637   : > { %v7475_v42 = vpop.f32.mrb[43].mxu1  ;;  %v2163_v29 = vmul.f32 0.35355338, %v2053_v54 }
 0x639   : > { %v2167_v0 = vpack.c.bf16 %v2163_v29, %v2163_v29  ;;  %v6841_v29 = vld [vmem:[%s9874_s10 + $0x10] sm:$0xf] }
 0x63c   : > { %v2156_v43 = vpop.f32.mrb[44].mxu1 }
 0x63d   : > { %v7490_v44 = vpop.f32.mrb[45].mxu1  ;;  %v2157_v1 = vadd.f32 %v6852_v59, %v2156_v43  ;;  %v2855_v59 = vsel %vm1484_vm6, %v6841_v29, 0  ;;  %v8152_v29 = vld [vmem:[#allocation2 + $0x98] sm:$0xff]  }
 0x63e   : > { %v2159_v36 = vpop.f32.mrb[46].mxu1 }
 0x63f   : > { %v7491_v46 = vpop.f32.mrb[47].mxu1  ;;  %v2165_v5 = vmul.f32 0.35355338, %v2157_v1 }
 0x641   : > { %v2169_v6 = vpack.c.bf16 %v2165_v5, %v2165_v5 }
 0x644   : > { %v2297_v50 = vpop.f32.mrb[48].mxu1 }
 0x645   : > { %v2298_v51 = vadd.f32 %v6866_v47, %v2297_v50  ;;  %v7506_v52 = vpop.f32.mrb[49].mxu1 }
 0x646   : > { %v2300_v53 = vpop.f32.mrb[50].mxu1 }
 0x647   : > { %v2408_v55 = vpack.c.bf16 %v2298_v51, %v2298_v51  ;;  %v7507_v56 = vpop.f32.mrb[51].mxu1 }
 0x649   : > { %v2461_v57 = vsel %vm1245_vm4, %v2408_v55, 0 }
 0x64a   : > { %7531 = vmatpush3.bf16.xpose.msra.mxu1 %v2461_v57 }
 0x64b   : > { %7542 = vmatprep.subr.bf16.mxu1 %v8515_v10 }
 0x64c   : > { %v2401_v60 = vpop.f32.mrb[52].mxu1 }
 0x64d   : > { %v2402_v61 = vadd.f32 %v6868_v58, %v2401_v60  ;;  %v7522_v62 = vpop.f32.mrb[53].mxu1 }
 0x64e   : > { %v2404_v63 = vpop.f32.mrb[54].mxu1 }
 0x64f   : > { %v2410_v2 = vpack.c.bf16 %v2402_v61, %v2402_v61  ;;  %v7523_v3 = vpop.f32.mrb[55].mxu1 }
 0x651   : > { %v2553_v4 = vsel %vm1245_vm4, %v2410_v2, 0  ;;  %7533 = vmatmul.mubr.msk.bf16.vlgmr.msra.gmra.mrb[56].mxu1 %vm1245_vm4, %v2167_v0 }
 0x652   : > { %7543 = vmatpush3.bf16.xpose.msra.mxu1 %v2553_v4  ;;  %7544 = vmatprep.mubr.msk.bf16.mxu1 %vm8516_vm1, %v8515_v10 }
 0x653   : > { %7554 = vmatprep.subr.bf16.mxu1 %v8515_v10 }
 0x659   : > { %7545 = vmatmul.mubr.msk.bf16.vlgmr.msra.gmra.mrb[60].mxu1 %vm1245_vm4, %v2169_v6 }
 0x65a   : > { %7556 = vmatprep.mubr.msk.bf16.mxu1 %vm8516_vm1, %v8515_v10 }
 0x6ef   : > { %v2451_v9 = vpop.f32.mrb[56].mxu0 }
 0x6f0   : > { %v2595_v11 = vsel %vm1245_vm4, %v2451_v9, -inf  ;;  %v7528_v12 = vpop.f32.mrb[57].mxu0 }
 0x6f1   : > { %2596 = vmax.xlane.f32.xlu0 %v2595_v11  ;;  %v2454_v13 = vpop.f32.mrb[58].mxu0  ;;  %v6842_v12 = vld [vmem:[%s9874_s10 + $0x14] sm:$0xf] }
 0x6f2   : > { %v7529_v14 = vpop.f32.mrb[59].mxu0 }
 0x6f7   : > { %v2543_v15 = vpop.f32.mrb[60].mxu0 }
 0x6f8   : > { %v2601_v17 = vsel %vm1245_vm4, %v2543_v15, -inf  ;;  %v7540_v8 = vpop.f32.mrb[61].mxu0 }
 0x6f9   : > { %2602 = vmax.xlane.f32.xlu0 %v2601_v17  ;;  %v2546_v18 = vpop.f32.mrb[62].mxu0  ;;  %v6843_v17 = vld [vmem:[%s9874_s10 + $0x18] sm:$0xf] }
 0x6fa   : > { %v7541_v19 = vpop.f32.mrb[63].mxu0 }
 0x70f   : > { %2644 = vrot.lane.b32.xlu0 %v9038_v16, %s8518_s22 }
 0x724   : > { %v2497_v20 = vpop.f32.mrb[56].mxu1 }
 0x725   : > { %v7534_v7 = vpop.f32.mrb[57].mxu1  ;;  %v2598_v21 = vsel %vm1245_vm4, %v2497_v20, -inf }
 0x726   : > { %2599 = vmax.xlane.f32.xlu1 %v2598_v21  ;;  %v2500_v22 = vpop.f32.mrb[58].mxu1  ;;  %v2947_v21 = vsel %vm1484_vm6, %v6843_v17, 0  ;;  %v8154_v17 = vld [vmem:[#allocation2 + $0xb0] sm:$0xff]  }
 0x727   : > { %v7535_v23 = vpop.f32.mrb[59].mxu1 }
 0x72c   : > { %v2589_v24 = vpop.f32.mrb[60].mxu1 }
 0x72d   : > { %v7546_v25 = vpop.f32.mrb[61].mxu1  ;;  %v2604_v30 = vsel %vm1245_vm4, %v2589_v24, -inf }
 0x72e   : > { %v2592_v27 = vpop.f32.mrb[62].mxu1 }
 0x72f   : > { %v7547_v28 = vpop.f32.mrb[63].mxu1 }
 0x737   : > { %2693 = vrot.lane.b32.xlu1 %v2408_v55, %s8518_s22 }
 0x73b   : > { %2742 = vrot.lane.b32.xlu1 %v9046_v26, %s8518_s22 }
 0x75f   : > { %2605 = vmax.xlane.f32.xlu1 %v2604_v30 }
 0x770   : > { %2791 = vrot.lane.b32.xlu1 %v2410_v2, %s8518_s22  ;;  %v6840_v2 = vld [vmem:[%s9875_s11] ss:$0 sm:$0xff] }
 0x771   : > { %v1885_v3 = vadd.f32 %v6840_v2, %v9058_v35  ;;  %v2901_v35 = vsel %vm1484_vm6, %v6842_v12, 0 }
 0x77e   : > { %v2597_v16 = vpop.xlane.xlu0 %2596 }
 0x77f   : > { %v2607_v31 = vmax.f32 %v2597_v16, -1e+30 }
 0x781   : > { %v2611_v32 = vsub.f32 %v2451_v9, %v2607_v31  ;;  %v3051_v9 = vadd.f32 %v1885_v3, %v1885_v3 }
 0x783   : > { %v2615_v33 = vmul.f32 1.442695, %v2611_v32  ;;  %v3056_v11 = vsel %vm682_vm0, %v3051_v9, 0.0 }
 0x785   : > { %8219 = vpow2.f32 %v2615_v33 }
 0x786   : > { %v2603_v34 = vpop.xlane.xlu0 %2602 }
 0x787   : > { %v2609_v37 = vmax.f32 %v2603_v34, -1e+30 }
 0x789   : > { %v2613_v38 = vsub.f32 %v2543_v15, %v2609_v37 }
 0x78a   : > { %v2645_v39 = vpop.permute.xlu0 %2644 }
 0x78b   : > { %v2619_v40 = vmul.f32 1.442695, %v2613_v38  ;;  %v2650_v41 = vsel %vm1484_vm6, %v2645_v39, 0 }
 0x78c   : > { %7549 = vmatpush3.bf16.msra.mxu0 %v2650_v41 }
 0x78d   : > { %8221 = vpow2.f32 %v2619_v40  ;;  %7560 = vmatprep.subr.bf16.mxu0 %v8515_v10 }
 0x78f   : > { %v8220_v26 = vpop.eup %8219 }
 0x790   : > { %v2623_v42 = vsel %vm1245_vm4, %v8220_v26, 0.0  ;;  %v2639_v43 = vpack.c.bf16 %v8220_v26, %v8220_v26  ;;  %v6844_v26 = vld [vmem:[%s9874_s10 + $0x1c] sm:$0xf] }
 0x791   : > { %2624 = vadd.xlane.f32.xlu0 %v2623_v42 }
 0x792   : > { %7551 = vmatmul.mubr.msk.bf16.vlgmr.msra.gmra.mrb[64].mxu0 %vm1245_vm4, %v2639_v43 }
 0x793   : > { %7562 = vmatprep.mubr.msk.bf16.mxu0 %vm8516_vm1, %v8515_v10 }
 0x797   : > { %v8222_v44 = vpop.eup %8221 }
 0x798   : > { %v2629_v36 = vsel %vm1245_vm4, %v8222_v44, 0.0  ;;  %v2641_v55 = vpack.c.bf16 %v8222_v44, %v8222_v44 }
 0x799   : > { %2630 = vadd.xlane.f32.xlu0 %v2629_v36 }
 0x7b3   : > { %v2600_v46 = vpop.xlane.xlu1 %2599 }
 0x7b4   : > { %v2608_v47 = vmax.f32 %v2600_v46, -1e+30 }
 0x7b6   : > { %v2612_v49 = vsub.f32 %v2497_v20, %v2608_v47  ;;  %v2993_v47 = vsel %vm1484_vm6, %v6844_v26, 0 }
 0x7b7   : > { %v2694_v50 = vpop.permute.xlu1 %2693 }
 0x7b8   : > { %v2617_v51 = vmul.f32 1.442695, %v2612_v49  ;;  %v2699_v52 = vsel %vm1484_vm6, %v2694_v50, 0  ;;  %v8149_v49 = vld [vmem:[#allocation2 + $0x80] sm:$0xff]   ;;  %v8151_v50 = vld [vmem:[#allocation2 + $0x88] sm:$0xff]  }
 0x7b9   : > { %7555 = vmatpush3.bf16.msra.mxu1 %v2699_v52 }
 0x7ba   : > { %8223 = vpow2.f32 %v2617_v51  ;;  %7566 = vmatprep.subr.bf16.mxu1 %v8515_v10 }
 0x7bb   : > { %v2743_v53 = vpop.permute.xlu1 %2742 }
 0x7bc   : > { %v2748_v54 = vsel %vm1484_vm6, %v2743_v53, 0 }
 0x7bd   : > { %7561 = vmatpush3.bf16.msra.mxu0 %v2748_v54 }
 0x7be   : > { %7572 = vmatprep.subr.bf16.mxu0 %v8515_v10 }
 0x7c0   : > { %7563 = vmatmul.mubr.msk.bf16.vlgmr.msra.gmra.mrb[68].mxu0 %vm1245_vm4, %v2641_v55 }
 0x7c1   : > { %7574 = vmatprep.mubr.msk.bf16.mxu0 %vm8516_vm1, %v8515_v10  ;;  %7573 = vmatpush3.bf16.msra.mxu0 %v2855_v59 }
 0x7c2   : > { %7584 = vmatprep.subr.bf16.mxu0 %v8515_v10 }
 0x7c4   : > { %v8224_v56 = vpop.eup %8223 }
 0x7c5   : > { %v2626_v57 = vsel %vm1245_vm4, %v8224_v56, 0.0  ;;  %v2640_v58 = vpack.c.bf16 %v8224_v56, %v8224_v56  ;;  %v8150_v56 = vld [vmem:[#allocation2 + $0x90] sm:$0xff]  }
 0x7c6   : > { %2627 = vadd.xlane.f32.xlu1 %v2626_v57 }
 0x7c7   : > { %7557 = vmatmul.mubr.msk.bf16.vlgmr.msra.gmra.mrb[64].mxu1 %vm1245_vm4, %v2640_v58 }
 0x7c8   : > { %7568 = vmatprep.mubr.msk.bf16.mxu1 %vm8516_vm1, %v8515_v10 }
 0x7ec   : > { %v2606_v60 = vpop.xlane.xlu1 %2605 }
 0x7ed   : > { %v2610_v61 = vmax.f32 %v2606_v60, -1e+30 }
 0x7ef   : > { %v2614_v62 = vsub.f32 %v2589_v24, %v2610_v61 }
 0x7f0   : > { %v2792_v63 = vpop.permute.xlu1 %2791 }
 0x7f1   : > { %v2621_v0 = vmul.f32 1.442695, %v2614_v62  ;;  %v2797_v1 = vsel %vm1484_vm6, %v2792_v63, 0 }
 0x7f2   : > { %7567 = vmatpush3.bf16.msra.mxu1 %v2797_v1 }
 0x7f3   : > { %8225 = vpow2.f32 %v2621_v0  ;;  %7578 = vmatprep.subr.bf16.mxu1 %v8515_v10 }
 0x7fd   : > { %v8226_v4 = vpop.eup %8225 }
 0x7fe   : > { %v2632_v5 = vsel %vm1245_vm4, %v8226_v4, 0.0  ;;  %v2642_v6 = vpack.c.bf16 %v8226_v4, %v8226_v4 }
 0x7ff   : > { %2633 = vadd.xlane.f32.xlu0 %v2632_v5  ;;  %v6897_v5 = vld [vmem:[%s9868_s4 + $0x1] ss:$0 sm:$0xff] }
 0x800   : > { %7569 = vmatmul.mubr.msk.bf16.vlgmr.msra.gmra.mrb[68].mxu1 %vm1245_vm4, %v2642_v6 }
 0x801   : > { %7580 = vmatprep.mubr.msk.bf16.mxu1 %vm8516_vm1, %v8515_v10  ;;  %7579 = vmatpush3.bf16.msra.mxu1 %v2901_v35  ;;  %v6898_v35 = vld [vmem:[%s9869_s5 + $0x1] ss:$0 sm:$0xff] }
 0x802   : > { %7590 = vmatprep.subr.bf16.mxu1 %v8515_v10 }
 0x803   : > { %3057 = vadd.xlane.f32.xlu0 %v3056_v11 }
 0x81e   : > { %v2625_v13 = vpop.xlane.xlu0 %2624 }
 0x81f   : > { %8227 = vrcp.f32 %v2625_v13 }
 0x826   : > { %v2631_v22 = vpop.xlane.xlu0 %2630 }
 0x827   : > { %8229 = vrcp.f32 %v2631_v22  ;;  %v8160_v22 = vld [vmem:[#allocation5 + $0x98] sm:$0xff]  }
 0x829   : > { %v8228_v14 = vpop.eup %8227 }
 0x831   : > { %v8230_v28 = vpop.eup %8229 }
 0x853   : > { %v2628_v24 = vpop.xlane.xlu1 %2627 }
 0x854   : > { %8231 = vrcp.f32 %v2628_v24 }
 0x85e   : > { %v8232_v40 = vpop.eup %8231 }
 0x865   : > { %v2686_v15 = vpop.f32.mrb[64].mxu0 }
 0x866   : > { %v2843_v8 = vmul.f32 %v8228_v14, %v2686_v15  ;;  %v7552_v18 = vpop.f32.mrb[65].mxu0  ;;  %v8153_v15 = vld [vmem:[#allocation2 + $0xa0] sm:$0xff]  }
 0x867   : > { %v2689_v19 = vpop.f32.mrb[66].mxu0  ;;  %v8155_v18 = vld [vmem:[#allocation2 + $0xa8] sm:$0xff]  }
 0x868   : > { %v2847_v20 = vpack.c.bf16 %v2843_v8, %v2843_v8  ;;  %v7553_v7 = vpop.f32.mrb[67].mxu0  ;;  %v8156_v19 = vld [vmem:[#allocation2 + $0xb8] sm:$0xff]  }
 0x869   : > { %v8158_v7 = vld [vmem:[#allocation5 + $0x90] sm:$0xff]  }
 0x86a   : > { %7575 = vmatmul.mubr.msk.bf16.vlgmr.msra.gmra.mrb[72].mxu0 %vm1245_vm4, %v2847_v20  ;;  %v8157_v20 = vld [vmem:[#allocation5 + $0x80] sm:$0xff]  }
 0x86b   : > { %7585 = vmatpush3.bf16.msra.mxu0 %v2947_v21  ;;  %7586 = vmatprep.mubr.msk.bf16.mxu0 %vm8516_vm1, %v8515_v10  ;;  %v8159_v21 = vld [vmem:[#allocation5 + $0x88] sm:$0xff]  }
 0x86c   : > { %7596 = vmatprep.subr.bf16.mxu0 %v8515_v10 }
 0x88c   : > { %v2634_v23 = vpop.xlane.xlu0 %2633 }
 0x88d   : > { %8233 = vrcp.f32 %v2634_v23 }
 0x890   : > { %v3058_v25 = vpop.xlane.xlu0 %3057 }
 0x891   : > { %v3059_v27 = vmul.f32 0.03125, %v3058_v25 }
 0x893   : > { %v9133_v30 = vsub.f32 %v3051_v9, %v3059_v27  ;;  %v2784_v16 = vpop.f32.mrb[68].mxu0 }
 0x894   : > { %v2845_v31 = vmul.f32 %v8230_v28, %v2784_v16  ;;  %v7564_v32 = vpop.f32.mrb[69].mxu0 }
 0x895   : > { %v2787_v33 = vpop.f32.mrb[70].mxu0  ;;  %v3061_v34 = vmul.f32 %v9133_v30, %v9133_v30  ;;  %v3079_v11 = vmul.f32 %v6897_v5, %v9133_v30  ;;  %v6907_v5 = vld [vmem:[%s9871_s7 + $0x8] ss:$0 sm:$0xff] }
 0x896   : > { %v2849_v37 = vpack.c.bf16 %v2845_v31, %v2845_v31  ;;  %v7565_v38 = vpop.f32.mrb[71].mxu0 }
 0x897   : > { %v3062_v39 = vsel %vm682_vm0, %v3061_v34, 0.0  ;;  %v8234_v51 = vpop.eup %8233 }
 0x898   : > { %3063 = vadd.xlane.f32.xlu1 %v3062_v39  ;;  %7587 = vmatmul.mubr.msk.bf16.vlgmr.msra.gmra.mrb[76].mxu0 %vm1245_vm4, %v2849_v37 }
 0x899   : > { %7600 = vmatprep.mubr.msk.bf16.mxu0 %vm8516_vm1, %v8515_v10  ;;  %7597 = vmatpush3.bf16.msra.mxu0 %v8149_v49 }
 0x89a   : > { %v2735_v41 = vpop.f32.mrb[64].mxu1  ;;  %7598 = vmatprep.subr.bf16.mxu0 %v8515_v10 }
 0x89b   : > { %v2844_v42 = vmul.f32 %v8232_v40, %v2735_v41  ;;  %v7558_v43 = vpop.f32.mrb[65].mxu1  ;;  %v6894_v41 = vld [vmem:[%s9875_s11 + $0x1] ss:$0 sm:$0xff] }
 0x89c   : > { %v2738_v44 = vpop.f32.mrb[66].mxu1 }
 0x89d   : > { %v2848_v36 = vpack.c.bf16 %v2844_v42, %v2844_v42  ;;  %v7559_v46 = vpop.f32.mrb[67].mxu1  ;;  %7599 = vmatpush3.bf16.msra.mxu0 %v8151_v50  ;;  %v8163_v50 = vld [vmem:[#allocation5 + $0xa8] sm:$0xff]  }
 0x89e   : > { %7612 = vmatprep.subr.bf16.mxu0 %v8515_v10  ;;  %v8161_v46 = vld [vmem:[#allocation5 + $0xa0] sm:$0xff]  }
 0x89f   : > { %7581 = vmatmul.mubr.msk.bf16.vlgmr.msra.gmra.mrb[72].mxu1 %vm1245_vm4, %v2848_v36 }
 0x8a0   : > { %7591 = vmatpush3.bf16.msra.mxu1 %v2993_v47  ;;  %7592 = vmatprep.mubr.msk.bf16.mxu1 %vm8516_vm1, %v8515_v10  ;;  %v8162_v47 = vld [vmem:[#allocation5 + $0xb0] sm:$0xff]  }
 0x8a1   : > { %7604 = vmatprep.subr.bf16.mxu1 %v8515_v10 }
 0x8d3   : > { %v2833_v52 = vpop.f32.mrb[68].mxu1 }
 0x8d4   : > { %v2846_v53 = vmul.f32 %v8234_v51, %v2833_v52  ;;  %v7570_v54 = vpop.f32.mrb[69].mxu1  ;;  %v8164_v51 = vld [vmem:[#allocation5 + $0xb8] sm:$0xff]  }
 0x8d5   : > { %v2836_v55 = vpop.f32.mrb[70].mxu1 }
 0x8d6   : > { %v2850_v57 = vpack.c.bf16 %v2846_v53, %v2846_v53  ;;  %v7571_v58 = vpop.f32.mrb[71].mxu1 }
 0x8d8   : > { %7593 = vmatmul.mubr.msk.bf16.vlgmr.msra.gmra.mrb[76].mxu1 %vm1245_vm4, %v2850_v57 }
 0x8d9   : > { %7605 = vmatpush3.bf16.msra.mxu1 %v8150_v56  ;;  %7608 = vmatprep.mubr.msk.bf16.mxu1 %vm8516_vm1, %v8515_v10 }
 0x8da   : > { %7606 = vmatprep.subr.bf16.mxu1 %v8515_v10 }
 0x8dd   : > { %7607 = vmatpush3.bf16.msra.mxu1 %v8152_v29 }
 0x8de   : > { %7620 = vmatprep.subr.bf16.mxu1 %v8515_v10 }
 0x925   : > { %v3064_v59 = vpop.xlane.xlu1 %3063 }
 0x926   : > { %v3065_v60 = vmul.f32 0.032258064, %v3064_v59 }
 0x928   : > { %8235 = vrsqrt.f32 %v3065_v60  ;;  %vm3068_vm7 = vcmp.eq.f32.partialorder %v3065_v60, inf  ;;  %v3071_v63 = vand.u32 2147483648, %v3065_v60  ;;  %vm3070_vm8 = vcmp.eq.f32.partialorder %v3065_v60, 0.0 }
 0x932   : > { %v8236_v61 = vpop.eup %8235 }
 0x933   : > { %v3067_v62 = vmul.f32 %v8236_v61, %v3065_v60 }
 0x935   : > { %v3069_v0 = vsel %vm3068_vm7, %v3065_v60, %v3067_v62 }
 0x936   : > { %v3072_v1 = vsel %vm3070_vm8, %v3071_v63, %v3069_v0 }
 0x937   : > { %v3080_v2 = vadd.f32 1e-06, %v3072_v1 }
 0x939   : > { %8237 = vrcp.f32 %v3080_v2 }
 0x93d   : > { %v2891_v3 = vpop.f32.mrb[72].mxu0 }
 0x93e   : > { %v7576_v4 = vpop.f32.mrb[73].mxu0  ;;  %v3035_v30 = vsel %vm682_vm0, %v2891_v3, 0.0  ;;  %v6923_v3 = vld [vmem:[#allocation7 + $0x8] ss:$0 sm:$0xff] }
 0x93f   : > { %v2894_v6 = vpop.f32.mrb[74].mxu0  ;;  %v6924_v4 = vld [vmem:[#allocation7 + $0x9] ss:$0 sm:$0xff] }
 0x940   : > { %v7577_v9 = vpop.f32.mrb[75].mxu0  ;;  %v6908_v6 = vld [vmem:[%s9871_s7 + $0x9] ss:$0 sm:$0xff] }
 0x943   : > { %v8238_v12 = vpop.eup %8237 }
 0x944   : > { %v3082_v13 = vmul.f32 %v8238_v12, %v3079_v11 }
 0x946   : > { %v3089_v14 = vadd.f32 %v6898_v35, %v3082_v13 }
 0x948   : > { %v3129_v8 = vpack.c.bf16 %v3089_v14, %v3089_v14 }
 0x94a   : > { %7601 = vmatmul.mubr.msk.bf16.vlgmr.msra.gmra.mrb[80].mxu0 %vm682_vm0, %v3129_v8  ;;  %7609 = vmatmul.mubr.msk.bf16.vlgmr.msra.gmra.mrb[80].mxu1 %vm682_vm0, %v3129_v8 }
 0x94b   : > { %7613 = vmatpush3.bf16.msra.mxu0 %v8153_v15  ;;  %7621 = vmatpush3.bf16.msra.mxu1 %v8154_v17 }
 0x94c   : > { %7614 = vmatprep.subr.bf16.mxu0 %v8515_v10  ;;  %7622 = vmatprep.subr.bf16.mxu1 %v8515_v10 }
 0x94d   : > { %7616 = vmatprep.mubr.msk.bf16.mxu0 %vm8516_vm1, %v8515_v10  ;;  %7624 = vmatprep.mubr.msk.bf16.mxu1 %vm8516_vm1, %v8515_v10 }
 0x94f   : > { %7615 = vmatpush3.bf16.msra.mxu0 %v8155_v18  ;;  %7623 = vmatpush3.bf16.msra.mxu1 %v8156_v19 }
 0x950   : > { %7628 = vmatprep.subr.bf16.mxu0 %v8515_v10  ;;  %7636 = vmatprep.subr.bf16.mxu1 %v8515_v10 }
 0x952   : > { %7617 = vmatmul.mubr.msk.bf16.vlgmr.msra.gmra.mrb[84].mxu0 %vm682_vm0, %v3129_v8  ;;  %7625 = vmatmul.mubr.msk.bf16.vlgmr.msra.gmra.mrb[84].mxu1 %vm682_vm0, %v3129_v8 }
 0x953   : > { %7629 = vmatpush3.bf16.msra.mxu0 %v8157_v20  ;;  %7637 = vmatpush3.bf16.msra.mxu1 %v8158_v7 }
 0x954   : > { %7630 = vmatprep.subr.bf16.mxu0 %v8515_v10  ;;  %7638 = vmatprep.subr.bf16.mxu1 %v8515_v10 }
 0x955   : > { %7632 = vmatprep.mubr.msk.bf16.mxu0 %vm8516_vm1, %v8515_v10  ;;  %7640 = vmatprep.mubr.msk.bf16.mxu1 %vm8516_vm1, %v8515_v10 }
 0x957   : > { %7631 = vmatpush3.bf16.msra.mxu0 %v8159_v21  ;;  %7639 = vmatpush3.bf16.msra.mxu1 %v8160_v22 }
 0x958   : > { %7644 = vmatprep.subr.bf16.mxu0 %v8515_v10  ;;  %7652 = vmatprep.subr.bf16.mxu1 %v8515_v10 }
 0x96b   : > { %v2983_v23 = vpop.f32.mrb[76].mxu0 }
 0x96c   : > { %v7588_v24 = vpop.f32.mrb[77].mxu0  ;;  %v3038_v34 = vsel %vm682_vm0, %v2983_v23, 0.0 }
 0x96d   : > { %v2986_v25 = vpop.f32.mrb[78].mxu0  ;;  %v6925_v24 = vld [vmem:[#allocation7 + $0xa] ss:$0 sm:$0xff] }
 0x96e   : > { %v7589_v27 = vpop.f32.mrb[79].mxu0 }
 0x972   : > { %v2937_v28 = vpop.f32.mrb[72].mxu1 }
 0x973   : > { %v3036_v16 = vsel %vm682_vm0, %v2937_v28, 0.0  ;;  %v7582_v31 = vpop.f32.mrb[73].mxu1  ;;  %v6926_v28 = vld [vmem:[#allocation7 + $0xb] ss:$0 sm:$0xff] }
 0x974   : > { %v3037_v32 = vadd.f32 %v3036_v16, %v3035_v30  ;;  %v2940_v33 = vpop.f32.mrb[74].mxu1  ;;  %v6909_v30 = vld [vmem:[%s9871_s7 + $0xa] ss:$0 sm:$0xff]  ;;  %v6910_v16 = vld [vmem:[%s9871_s7 + $0xb] ss:$0 sm:$0xff] }
 0x975   : > { %v7583_v37 = vpop.f32.mrb[75].mxu1 }
 0x976   : > { %v3039_v38 = vadd.f32 %v3038_v34, %v3037_v32 }
 0x9ab   : > { %v3029_v39 = vpop.f32.mrb[76].mxu1 }
 0x9ac   : > { %v3040_v40 = vsel %vm682_vm0, %v3029_v39, 0.0  ;;  %v7594_v26 = vpop.f32.mrb[77].mxu1 }
 0x9ad   : > { %v3041_v42 = vadd.f32 %v3040_v40, %v3039_v38  ;;  %v3032_v43 = vpop.f32.mrb[78].mxu1 }
 0x9ae   : > { %v7595_v44 = vpop.f32.mrb[79].mxu1 }
 0x9af   : > { %v3050_v36 = vadd.f32 %v6894_v41, %v3041_v42 }
 0x9b1   : > { %v3378_v49 = vpack.c.bf16 %v3050_v36, %v3050_v36  ;;  %6574 = vst.msk [vmem:[%s9196_s13] sm:$0xff] %vm682_vm0, %v3050_v36 }
 0x9b3   : > { %7633 = vmatmul.mubr.msk.bf16.vlgmr.msra.gmra.mrb[88].mxu0 %vm682_vm0, %v3378_v49  ;;  %7641 = vmatmul.mubr.msk.bf16.vlgmr.msra.gmra.mrb[88].mxu1 %vm682_vm0, %v3378_v49 }
 0x9b4   : > { %7645 = vmatpush3.bf16.msra.mxu0 %v8161_v46  ;;  %7653 = vmatpush3.bf16.msra.mxu1 %v8162_v47 }
 0x9b5   : > { %7646 = vmatprep.subr.bf16.mxu0 %v8515_v10  ;;  %7654 = vmatprep.subr.bf16.mxu1 %v8515_v10 }
 0x9b6   : > { %7648 = vmatprep.mubr.msk.bf16.mxu0 %vm8516_vm1, %v8515_v10  ;;  %7656 = vmatprep.mubr.msk.bf16.mxu1 %vm8516_vm1, %v8515_v10 }
 0x9b8   : > { %7647 = vmatpush3.bf16.msra.mxu0 %v8163_v50  ;;  %7655 = vmatpush3.bf16.msra.mxu1 %v8164_v51 }
 0x9b9   : > { %7660 = vmatprep.subr.bf16.mxu0 %v8515_v10  ;;  %7666 = vmatprep.subr.bf16.mxu1 %v8515_v10 }
 0x9bb   : > { %7649 = vmatmul.mubr.msk.bf16.vlgmr.msra.gmra.mrb[92].mxu0 %vm682_vm0, %v3378_v49  ;;  %7657 = vmatmul.mubr.msk.bf16.vlgmr.msra.gmra.mrb[92].mxu1 %vm682_vm0, %v3378_v49 }
 0x9bc   : > { %7662 = vmatprep.mubr.msk.bf16.mxu0 %vm8516_vm1, %v8515_v10  ;;  %7668 = vmatprep.mubr.msk.bf16.mxu1 %vm8516_vm1, %v8515_v10 }
 0xa1d   : > { %v3208_v52 = vpop.f32.mrb[80].mxu0  ;;  %v3260_v53 = vpop.f32.mrb[80].mxu1 }
 0xa1e   : > { %v7602_v54 = vpop.f32.mrb[81].mxu0  ;;  %v7610_v55 = vpop.f32.mrb[81].mxu1  ;;  %v3209_v15 = vadd.f32 %v6907_v5, %v3208_v52  ;;  %v3261_v17 = vadd.f32 %v6908_v6, %v3260_v53 }
 0xa1f   : > { %v3211_v56 = vpop.f32.mrb[82].mxu0  ;;  %v3263_v57 = vpop.f32.mrb[82].mxu1 }
 0xa20   : > { %v7603_v58 = vpop.f32.mrb[83].mxu0  ;;  %v7611_v29 = vpop.f32.mrb[83].mxu1  ;;  %v3370_v25 = vmul.f32 0.35355338, %v3209_v15  ;;  %v3371_v27 = vmul.f32 0.35355338, %v3261_v17 }
 0xa22   : > { %v3374_v39 = vpack.c.bf16 %v3370_v25, %v3370_v25  ;;  %v3375_v40 = vpack.c.bf16 %v3371_v27, %v3371_v27 }
 0xa25   : > { %v3312_v59 = vpop.f32.mrb[84].mxu0  ;;  %v3364_v60 = vpop.f32.mrb[84].mxu1 }
 0xa26   : > { %v7618_v61 = vpop.f32.mrb[85].mxu0  ;;  %v7626_v62 = vpop.f32.mrb[85].mxu1  ;;  %v3313_v42 = vadd.f32 %v6909_v30, %v3312_v59  ;;  %v3365_v43 = vadd.f32 %v6910_v16, %v3364_v60 }
 0xa27   : > { %v3315_v63 = vpop.f32.mrb[86].mxu0  ;;  %v3367_v0 = vpop.f32.mrb[86].mxu1 }
 0xa28   : > { %v7619_v1 = vpop.f32.mrb[87].mxu0  ;;  %v7627_v2 = vpop.f32.mrb[87].mxu1  ;;  %v3372_v51 = vmul.f32 0.35355338, %v3313_v42  ;;  %v3373_v52 = vmul.f32 0.35355338, %v3365_v43 }
 0xa2a   : > { %v3376_v53 = vpack.c.bf16 %v3372_v51, %v3372_v51  ;;  %v3377_v54 = vpack.c.bf16 %v3373_v52, %v3373_v52 }
 0xa86   : > { %v3457_v9 = vpop.f32.mrb[88].mxu0  ;;  %v3509_v11 = vpop.f32.mrb[88].mxu1 }
 0xa87   : > { %v3458_v12 = vadd.f32 %v6923_v3, %v3457_v9  ;;  %v3510_v35 = vadd.f32 %v6924_v4, %v3509_v11  ;;  %v7634_v13 = vpop.f32.mrb[89].mxu0  ;;  %v7642_v14 = vpop.f32.mrb[89].mxu1 }
 0xa88   : > { %v3460_v8 = vpop.f32.mrb[90].mxu0  ;;  %v3512_v18 = vpop.f32.mrb[90].mxu1 }
 0xa89   : > { %v9222_v19 = vpack.c.bf16 %v3458_v12, %v3458_v12  ;;  %v9224_v20 = vpack.c.bf16 %v3510_v35, %v3510_v35  ;;  %v7635_v7 = vpop.f32.mrb[91].mxu0  ;;  %v7643_v21 = vpop.f32.mrb[91].mxu1 }
 0xa8b   : > { %v3627_v22 = vsel %vm1245_vm4, %v9222_v19, 0  ;;  %v3673_v23 = vsel %vm1245_vm4, %v9224_v20, 0 }
 0xa8c   : > { %7661 = vmatpush3.bf16.xpose.msra.mxu0 %v3627_v22  ;;  %7667 = vmatpush3.bf16.xpose.msra.mxu1 %v3673_v23 }
 0xa8d   : > { %7672 = vmatprep.subr.bf16.mxu0 %v8515_v10  ;;  %7678 = vmatprep.subr.bf16.mxu1 %v8515_v10 }
 0xa8e   : > { %v3561_v31 = vpop.f32.mrb[92].mxu0  ;;  %v3613_v32 = vpop.f32.mrb[92].mxu1 }
 0xa8f   : > { %v3562_v33 = vadd.f32 %v6925_v24, %v3561_v31  ;;  %v3614_v34 = vadd.f32 %v6926_v28, %v3613_v32  ;;  %v7650_v37 = vpop.f32.mrb[93].mxu0  ;;  %v7658_v38 = vpop.f32.mrb[93].mxu1 }
 0xa90   : > { %v3564_v41 = vpop.f32.mrb[94].mxu0  ;;  %v3616_v26 = vpop.f32.mrb[94].mxu1 }
 0xa91   : > { %v3621_v44 = vpack.c.bf16 %v3562_v33, %v3562_v33  ;;  %v3622_v36 = vpack.c.bf16 %v3614_v34, %v3614_v34  ;;  %v7651_v46 = vpop.f32.mrb[95].mxu0  ;;  %v7659_v47 = vpop.f32.mrb[95].mxu1 }
 0xa93   : > { %v3719_v49 = vsel %vm1245_vm4, %v3621_v44, 0  ;;  %v3765_v50 = vsel %vm1245_vm4, %v3622_v36, 0  ;;  %7663 = vmatmul.mubr.msk.bf16.vlgmr.msra.gmra.mrb[96].mxu0 %vm1245_vm4, %v3374_v39  ;;  %7669 = vmatmul.mubr.msk.bf16.vlgmr.msra.gmra.mrb[96].mxu1 %vm1245_vm4, %v3375_v40 }
 0xa94   : > { %7673 = vmatpush3.bf16.xpose.msra.mxu0 %v3719_v49  ;;  %7679 = vmatpush3.bf16.xpose.msra.mxu1 %v3765_v50 }
 0xa95   : > { %7674 = vmatprep.mubr.msk.bf16.mxu0 %vm8516_vm1, %v8515_v10  ;;  %7680 = vmatprep.mubr.msk.bf16.mxu1 %vm8516_vm1, %v8515_v10 }
 0xa96   : > { %7690 = vmatprep.subr.bf16.mxu1 %v8515_v10  ;;  %7684 = vmatprep.subr.bf16.mxu0 %v8515_v10 }
 0xa9b   : > { %7675 = vmatmul.mubr.msk.bf16.vlgmr.msra.gmra.mrb[100].mxu0 %vm1245_vm4, %v3376_v53  ;;  %7681 = vmatmul.mubr.msk.bf16.vlgmr.msra.gmra.mrb[100].mxu1 %vm1245_vm4, %v3377_v54  ;;  %v6899_v53 = vld [vmem:[%s9874_s10 + $0x20] sm:$0xf]  ;;  %v6900_v54 = vld [vmem:[%s9874_s10 + $0x24] sm:$0xf] }
 0xa9c   : > { %7692 = vmatprep.mubr.msk.bf16.mxu1 %vm8516_vm1, %v8515_v10  ;;  %7686 = vmatprep.mubr.msk.bf16.mxu0 %vm8516_vm1, %v8515_v10 }
 0xb66   : > { %v3663_v55 = vpop.f32.mrb[96].mxu0  ;;  %v3709_v56 = vpop.f32.mrb[96].mxu1 }
 0xb67   : > { %v3664_v57 = vadd.f32 %v3663_v55, %v8912_v48  ;;  %v3710_v58 = vadd.f32 %v3709_v56, %v8912_v48  ;;  %v7664_v29 = vpop.f32.mrb[97].mxu0  ;;  %v7670_v59 = vpop.f32.mrb[97].mxu1  ;;  %v4067_v55 = vsel %vm1484_vm6, %v6899_v53, 0  ;;  %v4113_v56 = vsel %vm1484_vm6, %v6900_v54, 0 }
 0xb68   : > { %v3666_v60 = vpop.f32.mrb[98].mxu0  ;;  %v3712_v61 = vpop.f32.mrb[98].mxu1 }
 0xb69   : > { %v7665_v62 = vpop.f32.mrb[99].mxu0  ;;  %v7671_v63 = vpop.f32.mrb[99].mxu1  ;;  %v3810_v0 = vsel %vm1245_vm4, %v3710_v58, -inf  ;;  %v3807_v1 = vsel %vm1245_vm4, %v3664_v57, -inf  ;;  %v6902_v61 = vld [vmem:[%s9874_s10 + $0x2c] sm:$0xf] }
 0xb6a   : > { %3811 = vmax.xlane.f32.xlu1 %v3810_v0  ;;  %3808 = vmax.xlane.f32.xlu0 %v3807_v1 }
 0xb6e   : > { %v3755_v2 = vpop.f32.mrb[100].mxu0  ;;  %v3801_v3 = vpop.f32.mrb[100].mxu1 }
 0xb6f   : > { %v3756_v4 = vadd.f32 %v3755_v2, %v8912_v48  ;;  %v7676_v5 = vpop.f32.mrb[101].mxu0  ;;  %v7682_v6 = vpop.f32.mrb[101].mxu1  ;;  %v3802_v14 = vadd.f32 %v3801_v3, %v8912_v48  ;;  %v6901_v2 = vld [vmem:[%s9874_s10 + $0x28] sm:$0xf] }
 0xb70   : > { %v3758_v9 = vpop.f32.mrb[102].mxu0  ;;  %v3804_v11 = vpop.f32.mrb[102].mxu1 }
 0xb71   : > { %v7677_v12 = vpop.f32.mrb[103].mxu0  ;;  %v7683_v35 = vpop.f32.mrb[103].mxu1  ;;  %v3813_v13 = vsel %vm1245_vm4, %v3756_v4, -inf  ;;  %v3816_v15 = vsel %vm1245_vm4, %v3802_v14, -inf }
 0xb72   : > { %3814 = vmax.xlane.f32.xlu0 %v3813_v13  ;;  %v4205_v12 = vsel %vm1484_vm6, %v6902_v61, 0 }
 0xb7b   : > { %3905 = vrot.lane.b32.xlu1 %v9224_v20, %s8518_s22 }
 0xb7f   : > { %3954 = vrot.lane.b32.xlu1 %v3621_v44, %s8518_s22 }
 0xb88   : > { %3856 = vrot.lane.b32.xlu0 %v9222_v19, %s8518_s22 }
 0xba3   : > { %3817 = vmax.xlane.f32.xlu1 %v3816_v15 }
 0xbb4   : > { %4003 = vrot.lane.b32.xlu1 %v3622_v36, %s8518_s22 }
 0xbf7   : > { %v3812_v17 = vpop.xlane.xlu1 %3811  ;;  %v3809_v8 = vpop.xlane.xlu0 %3808 }
 0xbf8   : > { %v3820_v18 = vmax.f32 %v3812_v17, -1e+30  ;;  %v3819_v7 = vmax.f32 %v3809_v8, -1e+30 }
 0xbfa   : > { %v3824_v21 = vsub.f32 %v3710_v58, %v3820_v18  ;;  %v3823_v22 = vsub.f32 %v3664_v57, %v3819_v7 }
 0xbfb   : > { %v3906_v23 = vpop.permute.xlu1 %3905 }
 0xbfc   : > { %v3829_v20 = vmul.f32 1.442695, %v3824_v21  ;;  %v3827_v24 = vmul.f32 1.442695, %v3823_v22  ;;  %v3911_v25 = vsel %vm1484_vm6, %v3906_v23, 0 }
 0xbfd   : > { %7691 = vmatpush3.bf16.msra.mxu1 %v3911_v25 }
 0xbfe   : > { %8239 = vpow2.f32 %v3829_v20  ;;  %7702 = vmatprep.subr.bf16.mxu1 %v8515_v10 }
 0xbff   : > { %8241 = vpow2.f32 %v3827_v24  ;;  %v3815_v48 = vpop.xlane.xlu0 %3814  ;;  %v3955_v33 = vpop.permute.xlu1 %3954 }
 0xc00   : > { %v3821_v19 = vmax.f32 %v3815_v48, -1e+30  ;;  %v3960_v40 = vsel %vm1484_vm6, %v3955_v33, 0 }
 0xc02   : > { %v3825_v27 = vsub.f32 %v3756_v4, %v3821_v19 }
 0xc03   : > { %v3857_v28 = vpop.permute.xlu0 %3856 }
 0xc04   : > { %v3831_v30 = vmul.f32 1.442695, %v3825_v27  ;;  %v3862_v16 = vsel %vm1484_vm6, %v3857_v28, 0 }
 0xc05   : > { %7685 = vmatpush3.bf16.msra.mxu0 %v3862_v16 }
 0xc06   : > { %8243 = vpow2.f32 %v3831_v30  ;;  %7696 = vmatprep.subr.bf16.mxu0 %v8515_v10 }
 0xc08   : > { %v8240_v31 = vpop.eup %8239 }
 0xc09   : > { %v8242_v32 = vpop.eup %8241  ;;  %v3838_v34 = vsel %vm1245_vm4, %v8240_v31, 0.0  ;;  %v3852_v37 = vpack.c.bf16 %v8240_v31, %v8240_v31 }
 0xc0a   : > { %3839 = vadd.xlane.f32.xlu1 %v3838_v34  ;;  %v3835_v38 = vsel %vm1245_vm4, %v8242_v32, 0.0  ;;  %v3851_v39 = vpack.c.bf16 %v8242_v32, %v8242_v32 }
 0xc0b   : > { %3836 = vadd.xlane.f32.xlu0 %v3835_v38  ;;  %7693 = vmatmul.mubr.msk.bf16.vlgmr.msra.gmra.mrb[104].mxu1 %vm1245_vm4, %v3852_v37 }
 0xc0c   : > { %7687 = vmatmul.mubr.msk.bf16.vlgmr.msra.gmra.mrb[104].mxu0 %vm1245_vm4, %v3851_v39  ;;  %7704 = vmatprep.mubr.msk.bf16.mxu1 %vm8516_vm1, %v8515_v10 }
 0xc0d   : > { %7697 = vmatpush3.bf16.msra.mxu0 %v3960_v40  ;;  %7698 = vmatprep.mubr.msk.bf16.mxu0 %vm8516_vm1, %v8515_v10 }
 0xc0e   : > { %7708 = vmatprep.subr.bf16.mxu0 %v8515_v10 }
 0xc10   : > { %v8244_v41 = vpop.eup %8243 }
 0xc11   : > { %v3841_v26 = vsel %vm1245_vm4, %v8244_v41, 0.0  ;;  %v3853_v42 = vpack.c.bf16 %v8244_v41, %v8244_v41 }
 0xc12   : > { %3842 = vadd.xlane.f32.xlu0 %v3841_v26 }
 0xc14   : > { %7699 = vmatmul.mubr.msk.bf16.vlgmr.msra.gmra.mrb[108].mxu0 %vm1245_vm4, %v3853_v42 }
 0xc15   : > { %7710 = vmatprep.mubr.msk.bf16.mxu0 %vm8516_vm1, %v8515_v10  ;;  %7709 = vmatpush3.bf16.msra.mxu0 %v4067_v55 }
 0xc16   : > { %7720 = vmatprep.subr.bf16.mxu0 %v8515_v10 }
 0xc30   : > { %v3818_v43 = vpop.xlane.xlu1 %3817 }
 0xc31   : > { %v3822_v44 = vmax.f32 %v3818_v43, -1e+30 }
 0xc33   : > { %v3826_v36 = vsub.f32 %v3802_v14, %v3822_v44  ;;  %v4159_v14 = vsel %vm1484_vm6, %v6901_v2, 0 }
 0xc34   : > { %v4004_v46 = vpop.permute.xlu1 %4003 }
 0xc35   : > { %v3833_v47 = vmul.f32 1.442695, %v3826_v36  ;;  %v4009_v49 = vsel %vm1484_vm6, %v4004_v46, 0 }
 0xc36   : > { %7703 = vmatpush3.bf16.msra.mxu1 %v4009_v49 }
 0xc37   : > { %8245 = vpow2.f32 %v3833_v47  ;;  %7714 = vmatprep.subr.bf16.mxu1 %v8515_v10 }
 0xc41   : > { %v8246_v50 = vpop.eup %8245 }
 0xc42   : > { %v3844_v51 = vsel %vm1245_vm4, %v8246_v50, 0.0  ;;  %v3854_v52 = vpack.c.bf16 %v8246_v50, %v8246_v50 }
 0xc43   : > { %3845 = vadd.xlane.f32.xlu0 %v3844_v51  ;;  %v6952_v51 = vld [vmem:[%s9875_s11 + $0x2] ss:$0 sm:$0xff] }
 0xc44   : > { %7705 = vmatmul.mubr.msk.bf16.vlgmr.msra.gmra.mrb[108].mxu1 %vm1245_vm4, %v3854_v52 }
 0xc45   : > { %7716 = vmatprep.mubr.msk.bf16.mxu1 %vm8516_vm1, %v8515_v10  ;;  %7715 = vmatpush3.bf16.msra.mxu1 %v4113_v56 }
 0xc46   : > { %7726 = vmatprep.subr.bf16.mxu1 %v8515_v10 }
 0xc97   : > { %v3840_v57 = vpop.xlane.xlu1 %3839 }
 0xc98   : > { %v3837_v58 = vpop.xlane.xlu0 %3836  ;;  %8247 = vrcp.f32 %v3840_v57 }
 0xc99   : > { %8249 = vrcp.f32 %v3837_v58 }
 0xc9f   : > { %v3843_v29 = vpop.xlane.xlu0 %3842 }
 0xca0   : > { %8251 = vrcp.f32 %v3843_v29 }
 0xca2   : > { %v8248_v59 = vpop.eup %8247 }
 0xca3   : > { %v8250_v62 = vpop.eup %8249 }
 0xcaa   : > { %v8252_v15 = vpop.eup %8251 }
 0xcd0   : > { %v3846_v23 = vpop.xlane.xlu0 %3845 }
 0xcd1   : > { %8253 = vrcp.f32 %v3846_v23  ;;  %v8172_v23 = vld [vmem:[#allocation2 + $0xf8] sm:$0xff]  }
 0xcdb   : > { %v8254_v20 = vpop.eup %8253 }
 0xcde   : > { %v3947_v60 = vpop.f32.mrb[104].mxu1 }
 0xcdf   : > { %v3898_v63 = vpop.f32.mrb[104].mxu0  ;;  %v4056_v0 = vmul.f32 %v8248_v59, %v3947_v60  ;;  %v7694_v1 = vpop.f32.mrb[105].mxu1 }
 0xce0   : > { %v4055_v3 = vmul.f32 %v8250_v62, %v3898_v63  ;;  %v7688_v4 = vpop.f32.mrb[105].mxu0  ;;  %v3950_v5 = vpop.f32.mrb[106].mxu1  ;;  %v8165_v62 = vld [vmem:[#allocation2 + $0xc0] sm:$0xff]   ;;  %v8166_v63 = vld [vmem:[#allocation2 + $0xd0] sm:$0xff]   ;;  %v8168_v1 = vld [vmem:[#allocation2 + $0xd8] sm:$0xff]  }
 0xce1   : > { %v4060_v6 = vpack.c.bf16 %v4056_v0, %v4056_v0  ;;  %v3901_v9 = vpop.f32.mrb[106].mxu0  ;;  %v7695_v11 = vpop.f32.mrb[107].mxu1  ;;  %v8167_v0 = vld [vmem:[#allocation2 + $0xc8] sm:$0xff]  }
 0xce2   : > { %v4059_v35 = vpack.c.bf16 %v4055_v3, %v4055_v3  ;;  %v7689_v13 = vpop.f32.mrb[107].mxu0 }
 0xce3   : > { %7717 = vmatmul.mubr.msk.bf16.vlgmr.msra.gmra.mrb[112].mxu1 %vm1245_vm4, %v4060_v6 }
 0xce4   : > { %7711 = vmatmul.mubr.msk.bf16.vlgmr.msra.gmra.mrb[112].mxu0 %vm1245_vm4, %v4059_v35  ;;  %7727 = vmatpush3.bf16.msra.mxu1 %v4205_v12  ;;  %v6955_v35 = vld [vmem:[%s9868_s4 + $0x2] ss:$0 sm:$0xff] }
 0xce5   : > { %7721 = vmatpush3.bf16.msra.mxu0 %v4159_v14  ;;  %7722 = vmatprep.mubr.msk.bf16.mxu0 %vm8516_vm1, %v8515_v10 }
 0xce6   : > { %7728 = vmatprep.mubr.msk.bf16.mxu1 %vm8516_vm1, %v8515_v10  ;;  %7732 = vmatprep.subr.bf16.mxu0 %v8515_v10 }
 0xce7   : > { %v3996_v17 = vpop.f32.mrb[108].mxu0  ;;  %7740 = vmatprep.subr.bf16.mxu1 %v8515_v10 }
 0xce8   : > { %v4057_v8 = vmul.f32 %v8252_v15, %v3996_v17  ;;  %v7700_v18 = vpop.f32.mrb[109].mxu0  ;;  %v6956_v15 = vld [vmem:[%s9869_s5 + $0x2] ss:$0 sm:$0xff] }
 0xce9   : > { %v3999_v7 = vpop.f32.mrb[110].mxu0  ;;  %v8169_v18 = vld [vmem:[#allocation2 + $0xe0] sm:$0xff]  }
 0xcea   : > { %v4061_v21 = vpack.c.bf16 %v4057_v8, %v4057_v8  ;;  %v7701_v22 = vpop.f32.mrb[111].mxu0  ;;  %v8170_v7 = vld [vmem:[#allocation2 + $0xf0] sm:$0xff]  }
 0xceb   : > { %v8171_v22 = vld [vmem:[#allocation2 + $0xe8] sm:$0xff]  }
 0xcec   : > { %7723 = vmatmul.mubr.msk.bf16.vlgmr.msra.gmra.mrb[116].mxu0 %vm1245_vm4, %v4061_v21 }
 0xced   : > { %7736 = vmatprep.mubr.msk.bf16.mxu0 %vm8516_vm1, %v8515_v10  ;;  %7733 = vmatpush3.bf16.msra.mxu0 %v8165_v62 }
 0xcee   : > { %7734 = vmatprep.subr.bf16.mxu0 %v8515_v10 }
 0xcf1   : > { %7735 = vmatpush3.bf16.msra.mxu0 %v8167_v0 }
 0xcf2   : > { %7748 = vmatprep.subr.bf16.mxu0 %v8515_v10 }
 0xd17   : > { %v4045_v24 = vpop.f32.mrb[108].mxu1 }
 0xd18   : > { %v4058_v25 = vmul.f32 %v8254_v20, %v4045_v24  ;;  %v7706_v48 = vpop.f32.mrb[109].mxu1  ;;  %v9355_v20 = vld [vmem:[#allocation5 + $0xc0] sm:$0xff]   ;;  %v9357_v24 = vld [vmem:[#allocation5 + $0xd0] sm:$0xff]  }
 0xd19   : > { %v4048_v19 = vpop.f32.mrb[110].mxu1  ;;  %v9368_v48 = vld [vmem:[#allocation5 + $0xd8] sm:$0xff]  }
 0xd1a   : > { %v4062_v27 = vpack.c.bf16 %v4058_v25, %v4058_v25  ;;  %v7707_v28 = vpop.f32.mrb[111].mxu1  ;;  %v9366_v25 = vld [vmem:[#allocation5 + $0xc8] sm:$0xff]   ;;  %v4302_v19 = vld [vmem:[%s9375_s16] sm:$0xf] }
 0xd1b   : > { %v9386_v28 = vld [vmem:[#allocation5 + $0xf0] sm:$0xff]  }
 0xd1c   : > { %7729 = vmatmul.mubr.msk.bf16.vlgmr.msra.gmra.mrb[116].mxu1 %vm1245_vm4, %v4062_v27  ;;  %v9384_v27 = vld [vmem:[#allocation5 + $0xe0] sm:$0xff]  }
 0xd1d   : > { %7744 = vmatprep.mubr.msk.bf16.mxu1 %vm8516_vm1, %v8515_v10  ;;  %7741 = vmatpush3.bf16.msra.mxu1 %v8166_v63 }
 0xd1e   : > { %7742 = vmatprep.subr.bf16.mxu1 %v8515_v10 }
 0xd21   : > { %7743 = vmatpush3.bf16.msra.mxu1 %v8168_v1 }
 0xd22   : > { %7756 = vmatprep.subr.bf16.mxu1 %v8515_v10 }
 0xdb6   : > { %v4149_v30 = vpop.f32.mrb[112].mxu1 }
 0xdb7   : > { %v4103_v16 = vpop.f32.mrb[112].mxu0  ;;  %v4248_v31 = vsel %vm682_vm0, %v4149_v30, 0.0  ;;  %v7718_v32 = vpop.f32.mrb[113].mxu1  ;;  %v9394_v30 = vld [vmem:[#allocation5 + $0xe8] sm:$0xff]  }
 0xdb8   : > { %v4247_v33 = vsel %vm682_vm0, %v4103_v16, 0.0  ;;  %v7712_v34 = vpop.f32.mrb[113].mxu0  ;;  %v4152_v37 = vpop.f32.mrb[114].mxu1  ;;  %v9396_v16 = vld [vmem:[#allocation5 + $0xf8] sm:$0xff]  }
 0xdb9   : > { %v4249_v38 = vadd.f32 %v4248_v31, %v4247_v33  ;;  %v4106_v39 = vpop.f32.mrb[114].mxu0  ;;  %v7719_v40 = vpop.f32.mrb[115].mxu1 }
 0xdba   : > { %v7713_v41 = vpop.f32.mrb[115].mxu0 }
 0xdbf   : > { %v4195_v26 = vpop.f32.mrb[116].mxu0 }
 0xdc0   : > { %v4250_v42 = vsel %vm682_vm0, %v4195_v26, 0.0  ;;  %v7724_v43 = vpop.f32.mrb[117].mxu0 }
 0xdc1   : > { %v4251_v44 = vadd.f32 %v4250_v42, %v4249_v38  ;;  %v4198_v36 = vpop.f32.mrb[118].mxu0 }
 0xdc2   : > { %v7725_v46 = vpop.f32.mrb[119].mxu0 }
 0xdef   : > { %v4241_v47 = vpop.f32.mrb[116].mxu1 }
 0xdf0   : > { %v4252_v49 = vsel %vm682_vm0, %v4241_v47, 0.0  ;;  %v7730_v50 = vpop.f32.mrb[117].mxu1 }
 0xdf1   : > { %v4253_v52 = vadd.f32 %v4252_v49, %v4251_v44  ;;  %v4244_v53 = vpop.f32.mrb[118].mxu1  ;;  %v9414_v49 = vld [vmem:[#allocation7 + $0xc] ss:$0 sm:$0xff]  ;;  %v9416_v50 = vld [vmem:[#allocation7 + $0xd] ss:$0 sm:$0xff] }
 0xdf2   : > { %v7731_v54 = vpop.f32.mrb[119].mxu1 }
 0xdf3   : > { %v4262_v55 = vadd.f32 %v6952_v51, %v4253_v52  ;;  %v6965_v51 = vld [vmem:[%s9871_s7 + $0xc] ss:$0 sm:$0xff]  ;;  %v6966_v52 = vld [vmem:[%s9871_s7 + $0xd] ss:$0 sm:$0xff] }
 0xdf5   : > { %v4263_v56 = vadd.f32 %v4262_v55, %v4262_v55 }
 0xdf7   : > { %v4268_v57 = vsel %vm682_vm0, %v4263_v56, 0.0 }
 0xdf8   : > { %4269 = vadd.xlane.f32.xlu0 %v4268_v57 }
 0xe85   : > { %v4270_v58 = vpop.xlane.xlu0 %4269 }
 0xe86   : > { %v4271_v29 = vmul.f32 0.03125, %v4270_v58 }
 0xe88   : > { %v4272_v59 = vsub.f32 %v4263_v56, %v4271_v29 }
 0xe8a   : > { %v4273_v60 = vmul.f32 %v4272_v59, %v4272_v59  ;;  %v4291_v13 = vmul.f32 %v6955_v35, %v4272_v59 }
 0xe8c   : > { %v4274_v61 = vsel %vm682_vm0, %v4273_v60, 0.0 }
 0xe8d   : > { %4275 = vadd.xlane.f32.xlu1 %v4274_v61 }
 0xf1a   : > { %v4276_v2 = vpop.xlane.xlu1 %4275 }
 0xf1b   : > { %v4277_v3 = vmul.f32 0.032258064, %v4276_v2 }
 0xf1d   : > { %8255 = vrsqrt.f32 %v4277_v3  ;;  %vm4280_vm9 = vcmp.eq.f32.partialorder %v4277_v3, inf  ;;  %v4283_v6 = vand.u32 2147483648, %v4277_v3  ;;  %vm4282_vm10 = vcmp.eq.f32.partialorder %v4277_v3, 0.0 }
 0xf27   : > { %v8256_v4 = vpop.eup %8255 }
 0xf28   : > { %v4279_v5 = vmul.f32 %v8256_v4, %v4277_v3  ;;  %v9434_v4 = vld [vmem:[#allocation7 + $0xe] ss:$0 sm:$0xff] }
 0xf2a   : > { %v4281_v9 = vsel %vm4280_vm9, %v4277_v3, %v4279_v5 }
 0xf2b   : > { %v4284_v11 = vsel %vm4282_vm10, %v4283_v6, %v4281_v9  ;;  %v9436_v9 = vld [vmem:[#allocation7 + $0xf] ss:$0 sm:$0xff] }
 0xf2c   : > { %v4292_v12 = vadd.f32 1e-06, %v4284_v11  ;;  %v6967_v11 = vld [vmem:[%s9871_s7 + $0xe] ss:$0 sm:$0xff] }
 0xf2e   : > { %8257 = vrcp.f32 %v4292_v12  ;;  %v6968_v12 = vld [vmem:[%s9871_s7 + $0xf] ss:$0 sm:$0xff] }
 0xf38   : > { %v8258_v14 = vpop.eup %8257 }
 0xf39   : > { %v4294_v17 = vmul.f32 %v8258_v14, %v4291_v13 }
 0xf3b   : > { %v9343_v8 = vadd.f32 %v6956_v15, %v4294_v17 }
 0xf3d   : > { %v4343_v21 = vpack.c.bf16 %v9343_v8, %v9343_v8 }
 0xf3f   : > { %7737 = vmatmul.mubr.msk.bf16.vlgmr.msra.gmra.mrb[120].mxu0 %vm682_vm0, %v4343_v21  ;;  %7745 = vmatmul.mubr.msk.bf16.vlgmr.msra.gmra.mrb[120].mxu1 %vm682_vm0, %v4343_v21 }
 0xf40   : > { %7749 = vmatpush3.bf16.msra.mxu0 %v8169_v18  ;;  %7757 = vmatpush3.bf16.msra.mxu1 %v8170_v7 }
 0xf41   : > { %7750 = vmatprep.subr.bf16.mxu0 %v8515_v10  ;;  %7758 = vmatprep.subr.bf16.mxu1 %v8515_v10 }
 0xf42   : > { %7752 = vmatprep.mubr.msk.bf16.mxu0 %vm8516_vm1, %v8515_v10  ;;  %7760 = vmatprep.mubr.msk.bf16.mxu1 %vm8516_vm1, %v8515_v10 }
 0xf44   : > { %7751 = vmatpush3.bf16.msra.mxu0 %v8171_v22  ;;  %7759 = vmatpush3.bf16.msra.mxu1 %v8172_v23 }
 0xf45   : > { %7764 = vmatprep.subr.bf16.mxu0 %v8515_v10  ;;  %7772 = vmatprep.subr.bf16.mxu1 %v8515_v10 }
 0xf47   : > { %7753 = vmatmul.mubr.msk.bf16.vlgmr.msra.gmra.mrb[124].mxu0 %vm682_vm0, %v4343_v21  ;;  %7761 = vmatmul.mubr.msk.bf16.vlgmr.msra.gmra.mrb[124].mxu1 %vm682_vm0, %v4343_v21 }
 0xf48   : > { %7765 = vmatpush3.bf16.msra.mxu0 %v9355_v20  ;;  %7773 = vmatpush3.bf16.msra.mxu1 %v9357_v24 }
 0xf49   : > { %7766 = vmatprep.subr.bf16.mxu0 %v8515_v10  ;;  %7774 = vmatprep.subr.bf16.mxu1 %v8515_v10 }
 0xf4a   : > { %7768 = vmatprep.mubr.msk.bf16.mxu0 %vm8516_vm1, %v8515_v10  ;;  %7776 = vmatprep.mubr.msk.bf16.mxu1 %vm8516_vm1, %v8515_v10 }
 0xf4c   : > { %7767 = vmatpush3.bf16.msra.mxu0 %v9366_v25  ;;  %7775 = vmatpush3.bf16.msra.mxu1 %v9368_v48 }
 0xf4d   : > { %7780 = vmatprep.subr.bf16.mxu0 %v8515_v10  ;;  %7788 = vmatprep.subr.bf16.mxu1 %v8515_v10 }
 0xf4f   : > { %7769 = vmatmul.mubr.msk.bf16.vlgmr.msra.gmra.mrb[128].mxu0 %vm682_vm0, %v4302_v19  ;;  %7777 = vmatmul.mubr.msk.bf16.vlgmr.msra.gmra.mrb[128].mxu1 %vm682_vm0, %v4302_v19 }
 0xf50   : > { %7781 = vmatpush3.bf16.msra.mxu0 %v9384_v27  ;;  %7789 = vmatpush3.bf16.msra.mxu1 %v9386_v28 }
 0xf51   : > { %7782 = vmatprep.subr.bf16.mxu0 %v8515_v10  ;;  %7790 = vmatprep.subr.bf16.mxu1 %v8515_v10 }
 0xf52   : > { %7784 = vmatprep.mubr.msk.bf16.mxu0 %vm8516_vm1, %v8515_v10  ;;  %7792 = vmatprep.mubr.msk.bf16.mxu1 %vm8516_vm1, %v8515_v10 }
 0xf54   : > { %7783 = vmatpush3.bf16.msra.mxu0 %v9394_v30  ;;  %7791 = vmatpush3.bf16.msra.mxu1 %v9396_v16 }
 0xf55   : > { %7796 = vmatprep.subr.bf16.mxu0 %v8515_v10  ;;  %7802 = vmatprep.subr.bf16.mxu1 %v8515_v10 }
 0xf57   : > { %7785 = vmatmul.mubr.msk.bf16.vlgmr.msra.gmra.mrb[132].mxu0 %vm682_vm0, %v4302_v19  ;;  %7793 = vmatmul.mubr.msk.bf16.vlgmr.msra.gmra.mrb[132].mxu1 %vm682_vm0, %v4302_v19 }
 0xf58   : > { %7798 = vmatprep.mubr.msk.bf16.mxu0 %vm8516_vm1, %v8515_v10  ;;  %7804 = vmatprep.mubr.msk.bf16.mxu1 %vm8516_vm1, %v8515_v10 }
0x1012   : > { %v4422_v31 = vpop.f32.mrb[120].mxu0  ;;  %v4474_v32 = vpop.f32.mrb[120].mxu1 }
0x1013   : > { %v7738_v33 = vpop.f32.mrb[121].mxu0  ;;  %v7746_v34 = vpop.f32.mrb[121].mxu1  ;;  %v4423_v29 = vadd.f32 %v6965_v51, %v4422_v31  ;;  %v4475_v59 = vadd.f32 %v6966_v52, %v4474_v32 }
0x1014   : > { %v4425_v37 = vpop.f32.mrb[122].mxu0  ;;  %v4477_v38 = vpop.f32.mrb[122].mxu1 }
0x1015   : > { %v7739_v39 = vpop.f32.mrb[123].mxu0  ;;  %v7747_v40 = vpop.f32.mrb[123].mxu1  ;;  %v4584_v5 = vmul.f32 0.35355338, %v4423_v29  ;;  %v4585_v6 = vmul.f32 0.35355338, %v4475_v59 }
0x1017   : > { %v9448_v7 = vpack.c.bf16 %v4584_v5, %v4584_v5  ;;  %v9450_v21 = vpack.c.bf16 %v4585_v6, %v4585_v6 }
0x101a   : > { %v4526_v41 = vpop.f32.mrb[124].mxu0  ;;  %v4578_v26 = vpop.f32.mrb[124].mxu1 }
0x101b   : > { %v7754_v42 = vpop.f32.mrb[125].mxu0  ;;  %v7762_v43 = vpop.f32.mrb[125].mxu1  ;;  %v4527_v19 = vadd.f32 %v6967_v11, %v4526_v41  ;;  %v4579_v31 = vadd.f32 %v6968_v12, %v4578_v26 }
0x101c   : > { %v4529_v44 = vpop.f32.mrb[126].mxu0  ;;  %v4581_v36 = vpop.f32.mrb[126].mxu1  ;;  %v4303_v43 = vld [vmem:[%s9375_s16 + $0x4] sm:$0xf] }
0x101d   : > { %v7755_v46 = vpop.f32.mrb[127].mxu0  ;;  %v7763_v47 = vpop.f32.mrb[127].mxu1  ;;  %v4586_v40 = vmul.f32 0.35355338, %v4527_v19  ;;  %v4587_v41 = vmul.f32 0.35355338, %v4579_v31 }
0x101f   : > { %v9470_v26 = vpack.c.bf16 %v4586_v40, %v4586_v40  ;;  %v9472_v42 = vpack.c.bf16 %v4587_v41, %v4587_v41 }
0x1022   : > { %v4670_v53 = vpop.f32.mrb[128].mxu0  ;;  %v4722_v54 = vpop.f32.mrb[128].mxu1 }
0x1023   : > { %v4671_v55 = vadd.f32 %v9414_v49, %v4670_v53  ;;  %v4723_v56 = vadd.f32 %v9416_v50, %v4722_v54  ;;  %v7778_v57 = vpop.f32.mrb[129].mxu1  ;;  %v7770_v58 = vpop.f32.mrb[129].mxu0 }
0x1024   : > { %v4725_v60 = vpop.f32.mrb[130].mxu1  ;;  %v4673_v61 = vpop.f32.mrb[130].mxu0 }
0x1025   : > { %v9426_v62 = vpack.c.bf16 %v4671_v55, %v4671_v55  ;;  %v9428_v63 = vpack.c.bf16 %v4723_v56, %v4723_v56  ;;  %v7779_v0 = vpop.f32.mrb[131].mxu1  ;;  %v7771_v1 = vpop.f32.mrb[131].mxu0 }
0x1027   : > { %v4840_v2 = vsel %vm1245_vm4, %v9426_v62, 0  ;;  %v4886_v3 = vsel %vm1245_vm4, %v9428_v63, 0 }
0x1028   : > { %7797 = vmatpush3.bf16.xpose.msra.mxu0 %v4840_v2  ;;  %7803 = vmatpush3.bf16.xpose.msra.mxu1 %v4886_v3 }
0x1029   : > { %7808 = vmatprep.subr.bf16.mxu0 %v8515_v10  ;;  %7814 = vmatprep.subr.bf16.mxu1 %v8515_v10 }
0x102a   : > { %v4774_v35 = vpop.f32.mrb[132].mxu0  ;;  %v4826_v13 = vpop.f32.mrb[132].mxu1 }
0x102b   : > { %v4775_v14 = vadd.f32 %v9434_v4, %v4774_v35  ;;  %v4827_v15 = vadd.f32 %v9436_v9, %v4826_v13  ;;  %v7794_v17 = vpop.f32.mrb[133].mxu1  ;;  %v7786_v18 = vpop.f32.mrb[133].mxu0 }
0x102c   : > { %v4829_v22 = vpop.f32.mrb[134].mxu1  ;;  %v4777_v23 = vpop.f32.mrb[134].mxu0 }
0x102d   : > { %v9452_v32 = vpack.c.bf16 %v4775_v14, %v4775_v14  ;;  %v9454_v33 = vpack.c.bf16 %v4827_v15, %v4827_v15  ;;  %v7795_v34 = vpop.f32.mrb[135].mxu1  ;;  %v7787_v37 = vpop.f32.mrb[135].mxu0 }
0x102f   : > { %v4932_v38 = vsel %vm1245_vm4, %v9452_v32, 0  ;;  %v4978_v39 = vsel %vm1245_vm4, %v9454_v33, 0  ;;  %7799 = vmatmul.mubr.msk.bf16.vlgmr.msra.gmra.mrb[136].mxu0 %vm1245_vm4, %v9448_v7  ;;  %7805 = vmatmul.mubr.msk.bf16.vlgmr.msra.gmra.mrb[136].mxu1 %vm1245_vm4, %v9450_v21 }
0x1030   : > { %7809 = vmatpush3.bf16.xpose.msra.mxu0 %v4932_v38  ;;  %7815 = vmatpush3.bf16.xpose.msra.mxu1 %v4978_v39 }
0x1031   : > { %7810 = vmatprep.mubr.msk.bf16.mxu0 %vm8516_vm1, %v8515_v10  ;;  %7816 = vmatprep.mubr.msk.bf16.mxu1 %vm8516_vm1, %v8515_v10 }
0x1032   : > { %7820 = vmatprep.subr.bf16.mxu0 %v8515_v10  ;;  %7828 = vmatprep.subr.bf16.mxu1 %v8515_v10 }
0x1037   : > { %7811 = vmatmul.mubr.msk.bf16.vlgmr.msra.gmra.mrb[140].mxu0 %vm1245_vm4, %v9470_v26  ;;  %7817 = vmatmul.mubr.msk.bf16.vlgmr.msra.gmra.mrb[140].mxu1 %vm1245_vm4, %v9472_v42 }
0x1038   : > { %7821 = vmatpush3.bf16.msra.mxu0 %v9355_v20  ;;  %7829 = vmatpush3.bf16.msra.mxu1 %v9357_v24  ;;  %v678_v20 = vld [vmem:[%s667_s29] sm:$0xf] }
0x1039   : > { %7822 = vmatprep.subr.bf16.mxu0 %v8515_v10  ;;  %7830 = vmatprep.subr.bf16.mxu1 %v8515_v10  ;;  %v9515_v24 = vunpack.c.l.bf16 %v678_v20 }
0x103a   : > { %7824 = vmatprep.mubr.msk.bf16.mxu0 %vm8516_vm1, %v8515_v10  ;;  %7832 = vmatprep.mubr.msk.bf16.mxu1 %vm8516_vm1, %v8515_v10 }
0x103c   : > { %7823 = vmatpush3.bf16.msra.mxu0 %v9366_v25  ;;  %7831 = vmatpush3.bf16.msra.mxu1 %v9368_v48 }
0x103d   : > { %7836 = vmatprep.subr.bf16.mxu0 %v8515_v10  ;;  %7844 = vmatprep.subr.bf16.mxu1 %v8515_v10 }
0x103f   : > { %7825 = vmatmul.mubr.msk.bf16.vlgmr.msra.gmra.mrb[144].mxu0 %vm682_vm0, %v4303_v43  ;;  %7833 = vmatmul.mubr.msk.bf16.vlgmr.msra.gmra.mrb[144].mxu1 %vm682_vm0, %v4303_v43 }
0x1040   : > { %7837 = vmatpush3.bf16.msra.mxu0 %v9384_v27  ;;  %7845 = vmatpush3.bf16.msra.mxu1 %v9386_v28 }
0x1041   : > { %7838 = vmatprep.subr.bf16.mxu0 %v8515_v10  ;;  %7846 = vmatprep.subr.bf16.mxu1 %v8515_v10 }
0x1042   : > { %7840 = vmatprep.mubr.msk.bf16.mxu0 %vm8516_vm1, %v8515_v10  ;;  %7848 = vmatprep.mubr.msk.bf16.mxu1 %vm8516_vm1, %v8515_v10 }
0x1044   : > { %7839 = vmatpush3.bf16.msra.mxu0 %v9394_v30  ;;  %7847 = vmatpush3.bf16.msra.mxu1 %v9396_v16 }
0x1045   : > { %7852 = vmatprep.subr.bf16.mxu0 %v8515_v10  ;;  %7858 = vmatprep.subr.bf16.mxu1 %v8515_v10 }
0x1047   : > { %7841 = vmatmul.mubr.msk.bf16.vlgmr.msra.gmra.mrb[148].mxu0 %vm682_vm0, %v4303_v43  ;;  %7849 = vmatmul.mubr.msk.bf16.vlgmr.msra.gmra.mrb[148].mxu1 %vm682_vm0, %v4303_v43 }
0x1048   : > { %7854 = vmatprep.mubr.msk.bf16.mxu0 %vm8516_vm1, %v8515_v10  ;;  %7860 = vmatprep.mubr.msk.bf16.mxu1 %vm8516_vm1, %v8515_v10 }
0x1102   : > { %v4876_v25 = vpop.f32.mrb[136].mxu0  ;;  %v4922_v48 = vpop.f32.mrb[136].mxu1 }
0x1103   : > { %v9518_v27 = vadd.f32 %v4876_v25, %v9515_v24  ;;  %v9521_v28 = vadd.f32 %v4922_v48, %v9515_v24  ;;  %v7800_v30 = vpop.f32.mrb[137].mxu0  ;;  %v7806_v16 = vpop.f32.mrb[137].mxu1 }
0x1104   : > { %v4879_v44 = vpop.f32.mrb[138].mxu0  ;;  %v4925_v36 = vpop.f32.mrb[138].mxu1 }
0x1105   : > { %v7801_v46 = vpop.f32.mrb[139].mxu0  ;;  %v7807_v47 = vpop.f32.mrb[139].mxu1  ;;  %v5023_v51 = vsel %vm1245_vm4, %v9521_v28, -inf  ;;  %v5020_v52 = vsel %vm1245_vm4, %v9518_v27, -inf }
0x1106   : > { %5024 = vmax.xlane.f32.xlu1 %v5023_v51  ;;  %5021 = vmax.xlane.f32.xlu0 %v5020_v52 }
0x110a   : > { %v4968_v53 = vpop.f32.mrb[140].mxu0  ;;  %v5014_v54 = vpop.f32.mrb[140].mxu1 }
0x110b   : > { %v9528_v55 = vadd.f32 %v4968_v53, %v9515_v24  ;;  %v9531_v56 = vadd.f32 %v5014_v54, %v9515_v24  ;;  %v7812_v57 = vpop.f32.mrb[141].mxu0  ;;  %v7818_v58 = vpop.f32.mrb[141].mxu1 }
0x110c   : > { %v4971_v29 = vpop.f32.mrb[142].mxu0  ;;  %v5017_v59 = vpop.f32.mrb[142].mxu1 }
0x110d   : > { %v7813_v60 = vpop.f32.mrb[143].mxu0  ;;  %v7819_v61 = vpop.f32.mrb[143].mxu1  ;;  %v5029_v0 = vsel %vm1245_vm4, %v9531_v56, -inf  ;;  %v5026_v1 = vsel %vm1245_vm4, %v9528_v55, -inf }
0x110e   : > { %5030 = vmax.xlane.f32.xlu1 %v5029_v0  ;;  %5027 = vmax.xlane.f32.xlu0 %v5026_v1 }
0x1112   : > { %v5101_v2 = vpop.f32.mrb[144].mxu0  ;;  %v5141_v3 = vpop.f32.mrb[144].mxu1 }
0x1113   : > { %v5102_v5 = vadd.f32 %v9414_v49, %v5101_v2  ;;  %v5142_v6 = vadd.f32 %v9416_v50, %v5141_v3  ;;  %v7834_v11 = vpop.f32.mrb[145].mxu1  ;;  %v7826_v12 = vpop.f32.mrb[145].mxu0 }
0x1114   : > { %v5144_v35 = vpop.f32.mrb[146].mxu1  ;;  %v5104_v13 = vpop.f32.mrb[146].mxu0 }
0x1115   : > { %v5227_v14 = vpack.c.bf16 %v5102_v5, %v5102_v5  ;;  %v5228_v15 = vpack.c.bf16 %v5142_v6, %v5142_v6  ;;  %v7835_v17 = vpop.f32.mrb[147].mxu1  ;;  %v7827_v18 = vpop.f32.mrb[147].mxu0 }
0x1117   : > { %v5232_v22 = vsel %vm1245_vm4, %v5227_v14, 0  ;;  %v5275_v23 = vsel %vm1245_vm4, %v5228_v15, 0 }
0x1118   : > { %7853 = vmatpush3.bf16.xpose.msra.mxu0 %v5232_v22  ;;  %7859 = vmatpush3.bf16.xpose.msra.mxu1 %v5275_v23 }
0x1119   : > { %7864 = vmatprep.subr.bf16.mxu0 %v8515_v10  ;;  %7870 = vmatprep.subr.bf16.mxu1 %v8515_v10 }
0x111a   : > { %v5181_v49 = vpop.f32.mrb[148].mxu0  ;;  %v5221_v50 = vpop.f32.mrb[148].mxu1 }
0x111b   : > { %v5182_v19 = vadd.f32 %v9434_v4, %v5181_v49  ;;  %v5222_v31 = vadd.f32 %v9436_v9, %v5221_v50  ;;  %v7842_v34 = vpop.f32.mrb[149].mxu0  ;;  %v7850_v37 = vpop.f32.mrb[149].mxu1 }
0x111c   : > { %v5184_v38 = vpop.f32.mrb[150].mxu0  ;;  %v5224_v39 = vpop.f32.mrb[150].mxu1 }
0x111d   : > { %v5229_v40 = vpack.c.bf16 %v5182_v19, %v5182_v19  ;;  %v5230_v41 = vpack.c.bf16 %v5222_v31, %v5222_v31  ;;  %v7843_v43 = vpop.f32.mrb[151].mxu0  ;;  %v7851_v20 = vpop.f32.mrb[151].mxu1 }
0x111f   : > { %v5318_v25 = vsel %vm1245_vm4, %v5229_v40, 0  ;;  %v5361_v48 = vsel %vm1245_vm4, %v5230_v41, 0  ;;  %7855 = vmatmul.mubr.msk.bf16.vlgmr.msra.gmra.mrb[152].mxu0 %vm1245_vm4, %v9448_v7  ;;  %7861 = vmatmul.mubr.msk.bf16.vlgmr.msra.gmra.mrb[152].mxu1 %vm1245_vm4, %v9450_v21 }
0x1120   : > { %7865 = vmatpush3.bf16.xpose.msra.mxu0 %v5318_v25  ;;  %7871 = vmatpush3.bf16.xpose.msra.mxu1 %v5361_v48 }
0x1121   : > { %7866 = vmatprep.mubr.msk.bf16.mxu0 %vm8516_vm1, %v8515_v10  ;;  %7872 = vmatprep.mubr.msk.bf16.mxu1 %vm8516_vm1, %v8515_v10 }
0x1122   : > { %7882 = vmatprep.subr.bf16.mxu1 %v8515_v10  ;;  %7876 = vmatprep.subr.bf16.mxu0 %v8515_v10 }
0x1127   : > { %7867 = vmatmul.mubr.msk.bf16.vlgmr.msra.gmra.mrb[156].mxu0 %vm1245_vm4, %v9470_v26  ;;  %7873 = vmatmul.mubr.msk.bf16.vlgmr.msra.gmra.mrb[156].mxu1 %vm1245_vm4, %v9472_v42 }
0x1128   : > { %7878 = vmatprep.mubr.msk.bf16.mxu0 %vm8516_vm1, %v8515_v10  ;;  %7884 = vmatprep.mubr.msk.bf16.mxu1 %vm8516_vm1, %v8515_v10 }
0x1193   : > { %v5025_v2 = vpop.xlane.xlu1 %5024 }
0x1194   : > { %v5033_v5 = vmax.f32 %v5025_v2, -1e+30 }
0x119b   : > { %v9588_v3 = vpop.xlane.xlu1 %5030 }
0x11f2   : > { %v5268_v4 = vpop.f32.mrb[152].mxu0  ;;  %v5311_v9 = vpop.f32.mrb[152].mxu1 }
0x11f3   : > { %v5269_v7 = vadd.f32 %v5268_v4, %v9515_v24  ;;  %v5312_v21 = vadd.f32 %v5311_v9, %v9515_v24  ;;  %v7856_v30 = vpop.f32.mrb[153].mxu0  ;;  %v7862_v16 = vpop.f32.mrb[153].mxu1 }
0x11f4   : > { %v5271_v44 = vpop.f32.mrb[154].mxu0  ;;  %v5314_v36 = vpop.f32.mrb[154].mxu1 }
0x11f5   : > { %v7857_v26 = vpop.f32.mrb[155].mxu0  ;;  %v7863_v46 = vpop.f32.mrb[155].mxu1  ;;  %v5406_v42 = vsel %vm1245_vm4, %v5312_v21, -inf  ;;  %v5403_v47 = vsel %vm1245_vm4, %v5269_v7, -inf }
0x11f6   : > { %5407 = vmax.xlane.f32.xlu1 %v5406_v42  ;;  %5404 = vmax.xlane.f32.xlu0 %v5403_v47 }
0x11fa   : > { %v5354_v51 = vpop.f32.mrb[156].mxu0  ;;  %v5397_v52 = vpop.f32.mrb[156].mxu1 }
0x11fb   : > { %v5355_v53 = vadd.f32 %v5354_v51, %v9515_v24  ;;  %v7868_v54 = vpop.f32.mrb[157].mxu0  ;;  %v7874_v57 = vpop.f32.mrb[157].mxu1  ;;  %v9579_v0 = vadd.f32 %v5397_v52, %v9515_v24 }
0x11fc   : > { %v5357_v58 = vpop.f32.mrb[158].mxu0  ;;  %v5400_v29 = vpop.f32.mrb[158].mxu1  ;;  %v5035_v57 = vmax.f32 %v9588_v3, -1e+30 }
0x11fd   : > { %v7869_v59 = vpop.f32.mrb[159].mxu0  ;;  %v7875_v60 = vpop.f32.mrb[159].mxu1  ;;  %v5409_v61 = vsel %vm1245_vm4, %v5355_v53, -inf  ;;  %v5412_v1 = vsel %vm1245_vm4, %v9579_v0, -inf }
0x11fe   : > { %5410 = vmax.xlane.f32.xlu0 %v5409_v61 }
0x1207   : > { %5533 = vrot.lane.b32.xlu1 %v5228_v15, %s8518_s22 }
0x120b   : > { %5582 = vrot.lane.b32.xlu1 %v5229_v40, %s8518_s22 }
0x1214   : > { %5484 = vrot.lane.b32.xlu0 %v5227_v14, %s8518_s22 }
0x1218   : > { %5680 = vrot.lane.b32.xlu0 %v9426_v62, %s8518_s22  ;;  %v5022_v62 = vpop.xlane.xlu0 %5021 }
0x1219   : > { %v5032_v24 = vmax.f32 %v5022_v62, -1e+30 }
0x121c   : > { %5778 = vrot.lane.b32.xlu0 %v9452_v32, %s8518_s22  ;;  %v5028_v32 = vpop.xlane.xlu0 %5027 }
0x121d   : > { %v5034_v49 = vmax.f32 %v5028_v32, -1e+30 }
0x122f   : > { %5413 = vmax.xlane.f32.xlu1 %v5412_v1 }
0x1240   : > { %5631 = vrot.lane.b32.xlu1 %v5230_v41, %s8518_s22 }
0x1244   : > { %5729 = vrot.lane.b32.xlu1 %v9428_v63, %s8518_s22 }
0x1248   : > { %5827 = vrot.lane.b32.xlu1 %v9454_v33, %s8518_s22 }
0x1283   : > { %v5408_v6 = vpop.xlane.xlu1 %5407  ;;  %v5405_v11 = vpop.xlane.xlu0 %5404 }
0x1284   : > { %v5416_v12 = vmax.f32 %v5033_v5, %v5408_v6  ;;  %v5415_v35 = vmax.f32 %v5032_v24, %v5405_v11 }
0x1286   : > { %v5420_v13 = vsub.f32 %v9521_v28, %v5416_v12  ;;  %v5452_v14 = vsub.f32 %v5312_v21, %v5416_v12  ;;  %v5419_v15 = vsub.f32 %v9518_v27, %v5415_v35  ;;  %v5451_v63 = vsub.f32 %v5269_v7, %v5415_v35 }
0x1287   : > { %v5534_v17 = vpop.permute.xlu1 %5533 }
0x1288   : > { %v5457_v18 = vmul.f32 1.442695, %v5452_v14  ;;  %v5423_v33 = vmul.f32 1.442695, %v5419_v15  ;;  %v5455_v22 = vmul.f32 1.442695, %v5451_v63 }
0x1289   : > { %v5539_v23 = vsel %vm1484_vm6, %v5534_v17, 0  ;;  %v5425_v50 = vmul.f32 1.442695, %v5420_v13  ;;  %v6957_v14 = vld [vmem:[%s9874_s10 + $0x30] sm:$0xf] }
0x128a   : > { %7883 = vmatpush3.bf16.msra.mxu1 %v5539_v23  ;;  %8259 = vpow2.f32 %v5457_v18  ;;  %v5891_v15 = vsel %vm1484_vm6, %v6957_v14, 0  ;;  %v6958_v63 = vld [vmem:[%s9874_s10 + $0x34] sm:$0xf] }
0x128b   : > { %v5411_v19 = vpop.xlane.xlu0 %5410  ;;  %7894 = vmatprep.subr.bf16.mxu1 %v8515_v10  ;;  %8261 = vpow2.f32 %v5423_v33  ;;  %v5583_v25 = vpop.permute.xlu1 %5582  ;;  %v5937_v17 = vsel %vm1484_vm6, %v6958_v63, 0 }
0x128c   : > { %v5417_v31 = vmax.f32 %v5034_v49, %v5411_v19  ;;  %8263 = vpow2.f32 %v5455_v22  ;;  %v5588_v7 = vsel %vm1484_vm6, %v5583_v25, 0 }
0x128d   : > { %8265 = vpow2.f32 %v5425_v50 }
0x128e   : > { %v5421_v27 = vsub.f32 %v9528_v55, %v5417_v31  ;;  %v5453_v28 = vsub.f32 %v5355_v53, %v5417_v31 }
0x128f   : > { %v5485_v34 = vpop.permute.xlu0 %5484 }
0x1290   : > { %v5459_v37 = vmul.f32 1.442695, %v5453_v28  ;;  %v5490_v38 = vsel %vm1484_vm6, %v5485_v34, 0  ;;  %v5427_v39 = vmul.f32 1.442695, %v5421_v27 }
0x1291   : > { %7877 = vmatpush3.bf16.msra.mxu0 %v5490_v38  ;;  %v6959_v34 = vld [vmem:[%s9874_s10 + $0x38] sm:$0xf] }
0x1292   : > { %7888 = vmatprep.subr.bf16.mxu0 %v8515_v10  ;;  %8267 = vpow2.f32 %v5459_v37 }
0x1293   : > { %8269 = vpow2.f32 %v5427_v39  ;;  %v5681_v36 = vpop.permute.xlu0 %5680 }
0x1294   : > { %v8260_v40 = vpop.eup %8259  ;;  %v5686_v42 = vsel %vm1484_vm6, %v5681_v36, 0 }
0x1295   : > { %v8262_v41 = vpop.eup %8261  ;;  %v5480_v43 = vpack.c.bf16 %v8260_v40, %v8260_v40  ;;  %v5466_v26 = vsel %vm1245_vm4, %v8260_v40, 0.0 }
0x1296   : > { %v8264_v20 = vpop.eup %8263  ;;  %v5431_v48 = vsel %vm1245_vm4, %v8262_v41, 0.0  ;;  %v5447_v52 = vpack.c.bf16 %v8262_v41, %v8262_v41 }
0x1297   : > { %v9598_v4 = vpop.eup %8265  ;;  %v5463_v55 = vsel %vm1245_vm4, %v8264_v20, 0.0  ;;  %5432 = vadd.xlane.f32.xlu0 %v5431_v48  ;;  %v5479_v9 = vpack.c.bf16 %v8264_v20, %v8264_v20  ;;  %7885 = vmatmul.mubr.msk.bf16.vlgmr.msra.gmra.mrb[160].mxu1 %vm1245_vm4, %v5480_v43  ;;  %v5779_v51 = vpop.permute.xlu0 %5778  ;;  %v5983_v43 = vsel %vm1484_vm6, %v6959_v34, 0 }
0x1298   : > { %5464 = vadd.xlane.f32.xlu1 %v5463_v55  ;;  %7896 = vmatprep.mubr.msk.bf16.mxu1 %vm8516_vm1, %v8515_v10  ;;  %v5434_v21 = vsel %vm1245_vm4, %v9598_v4, 0.0  ;;  %v5784_v53 = vsel %vm1484_vm6, %v5779_v51, 0  ;;  %v5448_v12 = vpack.c.bf16 %v9598_v4, %v9598_v4 }
0x1299   : > { %7879 = vmatmul.mubr.msk.bf16.vlgmr.msra.gmra.mrb[160].mxu0 %vm1245_vm4, %v5479_v9 }
0x129a   : > { %7889 = vmatpush3.bf16.msra.mxu0 %v5588_v7  ;;  %7890 = vmatprep.mubr.msk.bf16.mxu0 %vm8516_vm1, %v8515_v10 }
0x129b   : > { %5435 = vadd.xlane.f32.xlu0 %v5434_v21  ;;  %7900 = vmatprep.subr.bf16.mxu0 %v8515_v10 }
0x129c   : > { %v8268_v30 = vpop.eup %8267 }
0x129d   : > { %v5469_v16 = vsel %vm1245_vm4, %v8268_v30, 0.0  ;;  %v5481_v44 = vpack.c.bf16 %v8268_v30, %v8268_v30  ;;  %v8270_v46 = vpop.eup %8269 }
0x129e   : > { %5470 = vadd.xlane.f32.xlu1 %v5469_v16  ;;  %v5437_v47 = vsel %vm1245_vm4, %v8270_v46, 0.0  ;;  %v5449_v54 = vpack.c.bf16 %v8270_v46, %v8270_v46  ;;  %v6960_v46 = vld [vmem:[%s9874_s10 + $0x3c] sm:$0xf] }
0x129f   : > { %5467 = vadd.xlane.f32.xlu0 %v5466_v26 }
0x12a1   : > { %7891 = vmatmul.mubr.msk.bf16.vlgmr.msra.gmra.mrb[164].mxu0 %vm1245_vm4, %v5481_v44 }
0x12a2   : > { %7901 = vmatpush3.bf16.msra.mxu0 %v5686_v42  ;;  %7902 = vmatprep.mubr.msk.bf16.mxu0 %vm8516_vm1, %v8515_v10 }
0x12a3   : > { %5438 = vadd.xlane.f32.xlu0 %v5437_v47  ;;  %7912 = vmatprep.subr.bf16.mxu0 %v8515_v10 }
0x12a9   : > { %7903 = vmatmul.mubr.msk.bf16.vlgmr.msra.gmra.mrb[160].mxu0 %vm1245_vm4, %v5447_v52 }
0x12aa   : > { %7913 = vmatpush3.bf16.msra.mxu0 %v5784_v53  ;;  %7914 = vmatprep.mubr.msk.bf16.mxu0 %vm8516_vm1, %v8515_v10 }
0x12ab   : > { %7924 = vmatprep.subr.bf16.mxu0 %v8515_v10 }
0x12b1   : > { %7915 = vmatmul.mubr.msk.bf16.vlgmr.msra.gmra.mrb[164].mxu0 %vm1245_vm4, %v5449_v54  ;;  %v6029_v54 = vsel %vm1484_vm6, %v6960_v46, 0 }
0x12b2   : > { %7926 = vmatprep.mubr.msk.bf16.mxu0 %vm8516_vm1, %v8515_v10  ;;  %7925 = vmatpush3.bf16.msra.mxu0 %v5891_v15 }
0x12b3   : > { %7936 = vmatprep.subr.bf16.mxu0 %v8515_v10 }
0x12bc   : > { %v5414_v58 = vpop.xlane.xlu1 %5413 }
0x12bd   : > { %v5418_v29 = vmax.f32 %v5035_v57, %v5414_v58 }
0x12bf   : > { %v5422_v59 = vsub.f32 %v9531_v56, %v5418_v29  ;;  %v5454_v60 = vsub.f32 %v9579_v0, %v5418_v29 }
0x12c0   : > { %v5632_v61 = vpop.permute.xlu1 %5631 }
0x12c1   : > { %v5429_v1 = vmul.f32 1.442695, %v5422_v59  ;;  %v5461_v2 = vmul.f32 1.442695, %v5454_v60  ;;  %v5637_v62 = vsel %vm1484_vm6, %v5632_v61, 0 }
0x12c2   : > { %7895 = vmatpush3.bf16.msra.mxu1 %v5637_v62 }
0x12c3   : > { %8271 = vpow2.f32 %v5429_v1  ;;  %7906 = vmatprep.subr.bf16.mxu1 %v8515_v10 }
0x12c4   : > { %8273 = vpow2.f32 %v5461_v2  ;;  %v5730_v24 = vpop.permute.xlu1 %5729 }
0x12c5   : > { %v5735_v0 = vsel %vm1484_vm6, %v5730_v24, 0 }
0x12c8   : > { %v5828_v11 = vpop.permute.xlu1 %5827 }
0x12c9   : > { %v5833_v35 = vsel %vm1484_vm6, %v5828_v11, 0 }
0x12cd   : > { %v8272_v32 = vpop.eup %8271 }
0x12ce   : > { %v8274_v5 = vpop.eup %8273  ;;  %v5440_v3 = vsel %vm1245_vm4, %v8272_v32, 0.0  ;;  %v5450_v13 = vpack.c.bf16 %v8272_v32, %v8272_v32 }
0x12cf   : > { %v5472_v6 = vsel %vm1245_vm4, %v8274_v5, 0.0  ;;  %5441 = vadd.xlane.f32.xlu0 %v5440_v3  ;;  %v5482_v56 = vpack.c.bf16 %v8274_v5, %v8274_v5 }
0x12d0   : > { %5473 = vadd.xlane.f32.xlu1 %v5472_v6 }
0x12d1   : > { %7897 = vmatmul.mubr.msk.bf16.vlgmr.msra.gmra.mrb[164].mxu1 %vm1245_vm4, %v5482_v56 }
0x12d2   : > { %7907 = vmatpush3.bf16.msra.mxu1 %v5735_v0  ;;  %7908 = vmatprep.mubr.msk.bf16.mxu1 %vm8516_vm1, %v8515_v10 }
0x12d3   : > { %7918 = vmatprep.subr.bf16.mxu1 %v8515_v10 }
0x12d9   : > { %7909 = vmatmul.mubr.msk.bf16.vlgmr.msra.gmra.mrb[160].mxu1 %vm1245_vm4, %v5448_v12 }
0x12da   : > { %7919 = vmatpush3.bf16.msra.mxu1 %v5833_v35  ;;  %7920 = vmatprep.mubr.msk.bf16.mxu1 %vm8516_vm1, %v8515_v10 }
0x12db   : > { %7930 = vmatprep.subr.bf16.mxu1 %v8515_v10 }
0x12e1   : > { %7921 = vmatmul.mubr.msk.bf16.vlgmr.msra.gmra.mrb[164].mxu1 %vm1245_vm4, %v5450_v13 }
0x12e2   : > { %7932 = vmatprep.mubr.msk.bf16.mxu1 %vm8516_vm1, %v8515_v10  ;;  %7931 = vmatpush3.bf16.msra.mxu1 %v5937_v17 }
0x12e3   : > { %7942 = vmatprep.subr.bf16.mxu1 %v8515_v10 }
0x1324   : > { %v5433_v18 = vpop.xlane.xlu0 %5432 }
0x1325   : > { %v5465_v22 = vpop.xlane.xlu1 %5464 }
0x1326   : > { %v5475_v49 = vadd.f32 %v5465_v22, %v5433_v18  ;;  %v7026_v22 = vld [vmem:[%s9875_s11 + $0x3] ss:$0 sm:$0xff] }
0x1328   : > { %v5436_v33 = vpop.xlane.xlu0 %5435  ;;  %8275 = vrcp.f32 %v5475_v49 }
0x132b   : > { %v5471_v19 = vpop.xlane.xlu1 %5470 }
0x132c   : > { %v5468_v23 = vpop.xlane.xlu0 %5467 }
0x132d   : > { %v5476_v21 = vadd.f32 %v5468_v23, %v5436_v33 }
0x1330   : > { %v5439_v50 = vpop.xlane.xlu0 %5438 }
0x1331   : > { %v5477_v31 = vadd.f32 %v5471_v19, %v5439_v50 }
0x1332   : > { %v8276_v27 = vpop.eup %8275 }
0x1333   : > { %8277 = vrcp.f32 %v5477_v31 }
0x1334   : > { %8279 = vrcp.f32 %v5476_v21 }
0x133d   : > { %v8278_v20 = vpop.eup %8277 }
0x133e   : > { %v8280_v36 = vpop.eup %8279 }
0x135c   : > { %v5442_v16 = vpop.xlane.xlu0 %5441 }
0x135d   : > { %v5474_v30 = vpop.xlane.xlu1 %5473 }
0x135e   : > { %v5478_v44 = vadd.f32 %v5474_v30, %v5442_v16  ;;  %v7029_v16 = vld [vmem:[%s9868_s4 + $0x3] ss:$0 sm:$0xff] }
0x1360   : > { %8281 = vrcp.f32 %v5478_v44 }
0x136a   : > { %v8282_v57 = vpop.eup %8281 }
0x137c   : > { %v5722_v28 = vpop.f32.mrb[160].mxu0 }
0x137d   : > { %v5879_v37 = vmul.f32 %v8276_v27, %v5722_v28  ;;  %v7904_v38 = vpop.f32.mrb[161].mxu0 }
0x137e   : > { %v5725_v39 = vpop.f32.mrb[162].mxu0 }
0x137f   : > { %v5883_v40 = vpack.c.bf16 %v5879_v37, %v5879_v37  ;;  %v7905_v41 = vpop.f32.mrb[163].mxu0 }
0x1380   : > { %v8181_v41 = vld [vmem:[#allocation8 + $0x10] sm:$0xff]  }
0x1381   : > { %7927 = vmatmul.mubr.msk.bf16.vlgmr.msra.gmra.mrb[168].mxu0 %vm1245_vm4, %v5883_v40 }
0x1382   : > { %7937 = vmatpush3.bf16.msra.mxu0 %v5983_v43  ;;  %7938 = vmatprep.mubr.msk.bf16.mxu0 %vm8516_vm1, %v8515_v10  ;;  %v8182_v43 = vld [vmem:[#allocation8] sm:$0xff]  }
0x1383   : > { %7948 = vmatprep.subr.bf16.mxu0 %v8515_v10 }
0x1384   : > { %v5820_v25 = vpop.f32.mrb[164].mxu0 }
0x1385   : > { %v5881_v48 = vmul.f32 %v8278_v20, %v5820_v25  ;;  %v7916_v4 = vpop.f32.mrb[165].mxu0  ;;  %v8183_v20 = vld [vmem:[#allocation8 + $0x18] sm:$0xff]  }
0x1386   : > { %v5823_v55 = vpop.f32.mrb[166].mxu0 }
0x1387   : > { %v5885_v9 = vpack.c.bf16 %v5881_v48, %v5881_v48  ;;  %v7917_v7 = vpop.f32.mrb[167].mxu0 }
0x1389   : > { %7939 = vmatmul.mubr.msk.bf16.vlgmr.msra.gmra.mrb[172].mxu0 %vm1245_vm4, %v5885_v9 }
0x138a   : > { %7952 = vmatprep.mubr.msk.bf16.mxu0 %vm8516_vm1, %v8515_v10  ;;  %7949 = vmatpush3.bf16.msra.mxu0 %v8181_v41 }
0x138b   : > { %7950 = vmatprep.subr.bf16.mxu0 %v8515_v10 }
0x138e   : > { %7951 = vmatpush3.bf16.msra.mxu0 %v8183_v20 }
0x138f   : > { %7964 = vmatprep.subr.bf16.mxu0 %v8515_v10 }
0x13ac   : > { %v5771_v26 = vpop.f32.mrb[160].mxu1 }
0x13ad   : > { %v5880_v42 = vmul.f32 %v8280_v36, %v5771_v26  ;;  %v7910_v47 = vpop.f32.mrb[161].mxu1  ;;  %v7030_v26 = vld [vmem:[%s9869_s5 + $0x3] ss:$0 sm:$0xff] }
0x13ae   : > { %v5774_v51 = vpop.f32.mrb[162].mxu1  ;;  %v8185_v47 = vld [vmem:[#allocation8 + $0x20] sm:$0xff]  }
0x13af   : > { %v5884_v52 = vpack.c.bf16 %v5880_v42, %v5880_v42  ;;  %v7911_v53 = vpop.f32.mrb[163].mxu1 }
0x13b1   : > { %7933 = vmatmul.mubr.msk.bf16.vlgmr.msra.gmra.mrb[168].mxu1 %vm1245_vm4, %v5884_v52 }
0x13b2   : > { %7943 = vmatpush3.bf16.msra.mxu1 %v6029_v54  ;;  %7944 = vmatprep.mubr.msk.bf16.mxu1 %vm8516_vm1, %v8515_v10 }
0x13b3   : > { %7956 = vmatprep.subr.bf16.mxu1 %v8515_v10 }
0x13b4   : > { %v5869_v58 = vpop.f32.mrb[164].mxu1 }
0x13b5   : > { %v5882_v29 = vmul.f32 %v8282_v57, %v5869_v58  ;;  %v7922_v59 = vpop.f32.mrb[165].mxu1  ;;  %v8186_v58 = vld [vmem:[#allocation8 + $0x28] sm:$0xff]  }
0x13b6   : > { %v5872_v60 = vpop.f32.mrb[166].mxu1 }
0x13b7   : > { %v5886_v61 = vpack.c.bf16 %v5882_v29, %v5882_v29  ;;  %v7923_v1 = vpop.f32.mrb[167].mxu1  ;;  %v8187_v60 = vld [vmem:[%s9878_s14 + $0x20] sm:$0xff]  }
0x13b8   : > { %v8189_v1 = vld [vmem:[%s9878_s14] sm:$0xff]  }
0x13b9   : > { %7945 = vmatmul.mubr.msk.bf16.vlgmr.msra.gmra.mrb[172].mxu1 %vm1245_vm4, %v5886_v61  ;;  %v8188_v61 = vld [vmem:[%s9878_s14 + $0x28] sm:$0xff]  }
0x13ba   : > { %7960 = vmatprep.mubr.msk.bf16.mxu1 %vm8516_vm1, %v8515_v10  ;;  %7957 = vmatpush3.bf16.msra.mxu1 %v8182_v43 }
0x13bb   : > { %7958 = vmatprep.subr.bf16.mxu1 %v8515_v10 }
0x1454   : > { %v5927_v2 = vpop.f32.mrb[168].mxu0 }
0x1455   : > { %v7928_v62 = vpop.f32.mrb[169].mxu0  ;;  %v6071_v11 = vsel %vm682_vm0, %v5927_v2, 0.0  ;;  %v8190_v2 = vld [vmem:[%s9878_s14 + $0x30] sm:$0xff]  }
0x1456   : > { %v5930_v32 = vpop.f32.mrb[170].mxu0  ;;  %v8191_v62 = vld [vmem:[%s9878_s14 + $0x8] sm:$0xff]  }
0x1457   : > { %v7929_v5 = vpop.f32.mrb[171].mxu0  ;;  %v8192_v32 = vld [vmem:[%s9878_s14 + $0x38] sm:$0xff]  }
0x1458   : > { %v8193_v5 = vld [vmem:[%s9878_s14 + $0x10] sm:$0xff]  }
0x145c   : > { %v6019_v24 = vpop.f32.mrb[172].mxu0 }
0x145d   : > { %v7940_v3 = vpop.f32.mrb[173].mxu0  ;;  %v6074_v15 = vsel %vm682_vm0, %v6019_v24, 0.0  ;;  %v8194_v24 = vld [vmem:[%s9878_s14 + $0x18] sm:$0xff]  }
0x145e   : > { %v6022_v6 = vpop.f32.mrb[174].mxu0 }
0x145f   : > { %v7941_v56 = vpop.f32.mrb[175].mxu0 }
0x1484   : > { %v5973_v0 = vpop.f32.mrb[168].mxu1 }
0x1485   : > { %v6072_v12 = vsel %vm682_vm0, %v5973_v0, 0.0  ;;  %v7934_v35 = vpop.f32.mrb[169].mxu1 }
0x1486   : > { %v6073_v13 = vadd.f32 %v6072_v12, %v6071_v11  ;;  %v5976_v14 = vpop.f32.mrb[170].mxu1 }
0x1487   : > { %v7935_v63 = vpop.f32.mrb[171].mxu1 }
0x1488   : > { %v6075_v17 = vadd.f32 %v6074_v15, %v6073_v13  ;;  %v7040_v63 = vld [vmem:[%s9926_s17] ss:$0 sm:$0xff]  ;;  %s9788_s17 = scalar_lea.hbm %s9928_s15, %s7075_s21 }
0x148c   : > { %v6065_v18 = vpop.f32.mrb[172].mxu1 }
0x148d   : > { %v6076_v33 = vsel %vm682_vm0, %v6065_v18, 0.0  ;;  %v7946_v23 = vpop.f32.mrb[173].mxu1 }
0x148e   : > { %v6077_v49 = vadd.f32 %v6076_v33, %v6075_v17  ;;  %v6068_v50 = vpop.f32.mrb[174].mxu1 }
0x148f   : > { %v7947_v19 = vpop.f32.mrb[175].mxu1  ;;  %v8195_v50 = vld [vmem:[%s9878_s14 + $0x40] sm:$0xff]  }
0x1490   : > { %v6086_v31 = vadd.f32 %v7026_v22, %v6077_v49 }
0x1492   : > { %v6087_v27 = vadd.f32 %v6086_v31, %v9343_v8  ;;  %v8184_v8 = vld [vmem:[#allocation8 + $0x8] sm:$0xff]  }
0x1493   : > { %7959 = vmatpush3.bf16.msra.mxu1 %v8184_v8 }
0x1494   : > { %v6092_v28 = vsel %vm682_vm0, %v6087_v27, 0.0  ;;  %7972 = vmatprep.subr.bf16.mxu1 %v8515_v10 }
0x1495   : > { %6093 = vadd.xlane.f32.xlu0 %v6092_v28 }
0x1522   : > { %v6094_v34 = vpop.xlane.xlu0 %6093 }
0x1523   : > { %v6095_v37 = vmul.f32 0.03125, %v6094_v34  ;;  %v8196_v34 = vld [vmem:[%s9878_s14 + $0x48] sm:$0xff]  }
0x1525   : > { %v6096_v38 = vsub.f32 %v6087_v27, %v6095_v37  ;;  %v8197_v37 = vld [vmem:[%s9878_s14 + $0x50] sm:$0xff]  }
0x1527   : > { %v6097_v39 = vmul.f32 %v6096_v38, %v6096_v38  ;;  %v6115_v44 = vmul.f32 %v7029_v16, %v6096_v38 }
0x1529   : > { %v6098_v40 = vsel %vm682_vm0, %v6097_v39, 0.0  ;;  %v8198_v39 = vld [vmem:[%s9878_s14 + $0x58] sm:$0xff]  }
0x152a   : > { %6099 = vadd.xlane.f32.xlu1 %v6098_v40 }
0x15b7   : > { %v6100_v25 = vpop.xlane.xlu1 %6099 }
0x15b8   : > { %v6101_v48 = vmul.f32 0.032258064, %v6100_v25 }
0x15ba   : > { %8283 = vrsqrt.f32 %v6101_v48  ;;  %vm6104_vm11 = vcmp.eq.f32.partialorder %v6101_v48, inf  ;;  %v6107_v9 = vand.u32 2147483648, %v6101_v48  ;;  %vm6106_vm12 = vcmp.eq.f32.partialorder %v6101_v48, 0.0 }
0x15c4   : > { %v8284_v4 = vpop.eup %8283 }
0x15c5   : > { %v6103_v55 = vmul.f32 %v8284_v4, %v6101_v48 }
0x15c7   : > { %v6105_v7 = vsel %vm6104_vm11, %v6101_v48, %v6103_v55 }
0x15c8   : > { %v6108_v21 = vsel %vm6106_vm12, %v6107_v9, %v6105_v7 }
0x15c9   : > { %v6116_v30 = vadd.f32 1e-06, %v6108_v21 }
0x15cb   : > { %8285 = vrcp.f32 %v6116_v30 }
0x15d5   : > { %v8286_v36 = vpop.eup %8285 }
0x15d6   : > { %v6118_v46 = vmul.f32 %v8286_v36, %v6115_v44 }
0x15d8   : > { %v9701_v42 = vadd.f32 %v7030_v26, %v6118_v46 }
0x15da   : > { %v6128_v51 = vpack.c.bf16 %v9701_v42, %v9701_v42  ;;  %v6129_v52 = vrot.slane %v9701_v42, 7  ;;  %v6253_v53 = vrot.slane %v9701_v42, 1 }
0x15dc   : > { %7953 = vmatmul.mubr.msk.bf16.vlgmr.msra.gmra.mrb[176].mxu0 %vm682_vm0, %v6128_v51  ;;  %v6132_v54 = vsel %vm6126_vm13, 0.0, %v6129_v52  ;;  %v6256_v29 = vsel %vm6127_vm14, 0.0, %v6253_v53 }
0x15dd   : > { %7965 = vmatpush3.bf16.msra.mxu0 %v8185_v47  ;;  %v6133_v57 = vpack.c.bf16 %v6132_v54, %v6132_v54  ;;  %7968 = vmatprep.mubr.msk.bf16.mxu0 %vm8516_vm1, %v8515_v10  ;;  %v6257_v59 = vpack.c.bf16 %v6256_v29, %v6256_v29 }
0x15de   : > { %7966 = vmatprep.subr.bf16.mxu0 %v8515_v10 }
0x15df   : > { %7961 = vmatmul.mubr.msk.bf16.vlgmr.msra.gmra.mrb[176].mxu1 %vm682_vm0, %v6133_v57 }
0x15e0   : > { %7980 = vmatprep.mubr.msk.bf16.mxu1 %vm8516_vm1, %v8515_v10  ;;  %7973 = vmatpush3.bf16.msra.mxu1 %v8187_v60 }
0x15e1   : > { %7967 = vmatpush3.bf16.msra.mxu0 %v8186_v58  ;;  %7974 = vmatprep.subr.bf16.mxu1 %v8515_v10 }
0x15e2   : > { %7984 = vmatprep.subr.bf16.mxu0 %v8515_v10 }
0x15e4   : > { %7969 = vmatmul.mubr.msk.bf16.vlgmr.msra.gmra.mrb[180].mxu0 %vm682_vm0, %v6257_v59  ;;  %7975 = vmatpush3.bf16.msra.mxu1 %v8188_v61 }
0x15e5   : > { %7992 = vmatprep.mubr.msk.bf16.mxu0 %vm8516_vm1, %v8515_v10  ;;  %7985 = vmatpush3.bf16.msra.mxu0 %v8189_v1 }
0x15e6   : > { %7976 = vmatprep.subr.bf16.mxu1 %v8515_v10  ;;  %7986 = vmatprep.subr.bf16.mxu0 %v8515_v10 }
0x15e8   : > { %7977 = vmatpush3.bf16.msra.mxu1 %v8190_v2 }
0x15e9   : > { %7987 = vmatpush3.bf16.msra.mxu0 %v8191_v62  ;;  %7978 = vmatprep.subr.bf16.mxu1 %v8515_v10 }
0x15ea   : > { %7988 = vmatprep.subr.bf16.mxu0 %v8515_v10 }
0x15ec   : > { %7979 = vmatpush3.bf16.msra.mxu1 %v8192_v32 }
0x15ed   : > { %7989 = vmatpush3.bf16.msra.mxu0 %v8193_v5  ;;  %7996 = vmatprep.subr.bf16.mxu1 %v8515_v10 }
0x15ee   : > { %7990 = vmatprep.subr.bf16.mxu0 %v8515_v10 }
0x15f1   : > { %7991 = vmatpush3.bf16.msra.mxu0 %v8194_v24 }
0x16af   : > { %v6192_v3 = vpop.f32.mrb[176].mxu0 }
0x16b0   : > { %v7954_v6 = vpop.f32.mrb[177].mxu0 }
0x16b1   : > { %v6195_v56 = vpop.f32.mrb[178].mxu0 }
0x16b2   : > { %v7955_v0 = vpop.f32.mrb[179].mxu0  ;;  %v6247_v11 = vpop.f32.mrb[176].mxu1 }
0x16b3   : > { %v6248_v12 = vadd.f32 %v6247_v11, %v6192_v3  ;;  %v7962_v35 = vpop.f32.mrb[177].mxu1 }
0x16b4   : > { %v6250_v13 = vpop.f32.mrb[178].mxu1 }
0x16b5   : > { %v7963_v14 = vpop.f32.mrb[179].mxu1 }
0x16b7   : > { %v6312_v15 = vpop.f32.mrb[180].mxu0 }
0x16b8   : > { %v6318_v17 = vadd.f32 %v6312_v15, %v6248_v12  ;;  %v7970_v18 = vpop.f32.mrb[181].mxu0 }
0x16b9   : > { %v6315_v33 = vpop.f32.mrb[182].mxu0 }
0x16ba   : > { %v6326_v22 = vadd.f32 %v7040_v63, %v6318_v17  ;;  %v7971_v23 = vpop.f32.mrb[183].mxu0 }
0x16bc   : > { %v6327_v49 = vmax.f32 %v6326_v22, 0.0 }
0x16be   : > { %v6328_v19 = vrot.slane %v6327_v49, 7  ;;  %v6339_v31 = vpack.c.bf16 %v6327_v49, %v6327_v49  ;;  %v6484_v38 = vrot.slane %v6327_v49, 1 }
0x16c0   : > { %v6329_v27 = vsel %vm6126_vm13, 0.0, %v6328_v19  ;;  %7981 = vmatmul.mubr.msk.bf16.vlgmr.msra.gmra.mrb[180].mxu1 %vm6373_vm15, %v6339_v31  ;;  %v6485_v40 = vsel %vm6127_vm14, 0.0, %v6484_v38 }
0x16c1   : > { %v6330_v28 = vpack.c.bf16 %v6329_v27, %v6329_v27  ;;  %7997 = vmatpush3.bf16.msra.mxu1 %v8195_v50  ;;  %8004 = vmatprep.mubr.msk.bf16.mxu1 %vm8516_vm1, %v8515_v10  ;;  %v6486_v41 = vpack.c.bf16 %v6485_v40, %v6485_v40 }
0x16c2   : > { %7998 = vmatprep.subr.bf16.mxu1 %v8515_v10 }
0x16c3   : > { %7993 = vmatmul.mubr.msk.bf16.vlgmr.msra.gmra.mrb[184].mxu0 %vm6373_vm15, %v6330_v28 }
0x16c5   : > { %7999 = vmatpush3.bf16.msra.mxu1 %v8196_v34 }
0x16c6   : > { %8000 = vmatprep.subr.bf16.mxu1 %v8515_v10 }
0x16c9   : > { %8001 = vmatpush3.bf16.msra.mxu1 %v8197_v37 }
0x16ca   : > { %8002 = vmatprep.subr.bf16.mxu1 %v8515_v10 }
0x16cd   : > { %8003 = vmatpush3.bf16.msra.mxu1 %v8198_v39 }
0x16d0   : > { %8005 = vmatmul.mubr.msk.bf16.vlgmr.msra.gmra.mrb[184].mxu1 %vm6373_vm15, %v6486_v41 }
0x16d1   : > { %8412 = shalt.err (!%p8409_p0)
}
0x16d2   : > { %s8413_s13 = scalar_lea.hbm %s9788_s17, 128  ;;  %s8417_s22 = scalar_lea.hbm %s9928_s15, 256 }
0x16d3   : > { %p8414_p10 = scmp.ne.s32.totalorder %s9788_s17, %s8413_s13  ;;  %p8418_p4 = scmp.lt.u32.totalorder %s9788_s17, %s9928_s15 }
0x16d4   : > { %p8419_p12 = scmp.lt.u32.totalorder %s8417_s22, %s8413_s13  ;;  %p8421_p8 = scmp.lt.u32.totalorder %s8413_s13, %s9788_s17 }
0x16d5   : > { %p8415_p2 = pnand %p8414_p10, %p9929_p11 }
0x16d6   : > { %p8420_p7 = por %p8419_p12, %p8418_p4 }
0x16d7   : > { %p8416_p3 = pneg %p8415_p2 }
0x16d8   : > { %p8422_p13 = por %p8421_p8, %p8420_p7 }
0x16da   : > { %p8423_p1 = pnand %p8422_p13, %p8416_p3 }
0x16dc   : > { %8426 = shalt.err (!%p8423_p1)
}
0x16dd   : > { %8041 = dma.vmem_to_hbm [thread:$0]  (%p9929_p11), %s6608_s1, 128, %s9788_s17, %s6581_s20  }
0x16de   : > { %s9930_s18 = sld [smem:[#allocation28_spill]]  ;;  %s643_s17 = scalar_lea.vmem [#allocation10], %s6787_s23 }
0x16df   : > { %s6594_s1 = sshll.u32 %s643_s17, 4  ;;  %s9931_s24 = sld [smem:[#allocation29_spill]]  ;;  %s9822_s1 = int_to_ptr.vmem [resolvable:$true] %s6594_s1 }
0x16e0   : > { %s6576_s16 = scalar_lea.sflag [#allocation4], %s9187_s27  ;;  %s8427_s23 = scalar_lea.vmem %s9822_s1, 128 }
0x16e1   : > { %p8428_p6 = scmp.ne.s32.totalorder %s9822_s1, %s8427_s23  ;;  %s8520_s19 = smov [#allocation10]  }
0x16e2   : > { %s8431_s28 = sshll.u32 %s8520_s19, 4  ;;  %s8432_s28 = int_to_ptr.vmem [resolvable:$false] %s8431_s28 }
0x16e3   : > { %p8429_p9 = pnand %p8428_p6, %p9929_p11  ;;  %s8433_s30 = scalar_lea.vmem %s8432_s28, 256 }
0x16e4   : > { %v7072_v7 = vld [vmem:[%s9930_s18] ss:$0 sm:$0xff]  ;;  %p8434_p0 = scmp.lt.s32.totalorder %s9822_s1, %s8432_s28  ;;  %p8435_p10 = scmp.lt.s32.totalorder %s8433_s30, %s8427_s23 }
0x16e5   : > { %s9932_s29 = smov %s9931_s24  ;;  %s9820_s22 = scalar_lea.hbm %s9931_s24, %s7075_s21 }
0x16e6   : > { %p8430_p5 = pneg %p8429_p9  ;;  %p8436_p2 = por %p8435_p10, %p8434_p0 }
0x16e8   : > { %p8437_p3 = pnand %p8436_p2, %p8430_p5 }
0x1793   : > { %v6411_v10 = vpop.f32.mrb[180].mxu1 }
0x1794   : > { %v7982_v45 = vpop.f32.mrb[181].mxu1 }
0x1795   : > { %v6414_v43 = vpop.f32.mrb[182].mxu1 }
0x1796   : > { %v7983_v20 = vpop.f32.mrb[183].mxu1  ;;  %v6478_v8 = vpop.f32.mrb[184].mxu0 }
0x1797   : > { %v6479_v25 = vadd.f32 %v6478_v8, %v6411_v10  ;;  %v7994_v48 = vpop.f32.mrb[185].mxu0 }
0x1798   : > { %v6481_v4 = vpop.f32.mrb[186].mxu0 }
0x1799   : > { %v7995_v55 = vpop.f32.mrb[187].mxu0 }
0x17a3   : > { %v6557_v9 = vpop.f32.mrb[184].mxu1 }
0x17a4   : > { %v6563_v21 = vadd.f32 %v6557_v9, %v6479_v25  ;;  %v8006_v30 = vpop.f32.mrb[185].mxu1 }
0x17a5   : > { %v6560_v16 = vpop.f32.mrb[186].mxu1 }
0x17a6   : > { %v6571_v44 = vadd.f32 %v7072_v7, %v6563_v21  ;;  %v8007_v36 = vpop.f32.mrb[187].mxu1 }
0x17a8   : > { %v6572_v26 = vadd.f32 %v6571_v44, %v9701_v42 }
0x17aa   : > { %6573 = vst.msk [vmem:[%s643_s17] sm:$0xff] %vm682_vm0, %v6572_v26 }
0x17ab   : > { %8440 = shalt.err (!%p8437_p3)
}
0x17ac   : > { %s8441_s27 = scalar_lea.hbm %s9820_s22, 128  ;;  %s8445_s18 = scalar_lea.hbm %s9932_s29, 256 }
0x17ad   : > { %p8442_p4 = scmp.ne.s32.totalorder %s9820_s22, %s8441_s27  ;;  %p8446_p8 = scmp.lt.u32.totalorder %s9820_s22, %s9932_s29 }
0x17ae   : > { %p8447_p13 = scmp.lt.u32.totalorder %s8445_s18, %s8441_s27  ;;  %p8449_p6 = scmp.lt.u32.totalorder %s8441_s27, %s9820_s22 }
0x17af   : > { %p8443_p12 = pnand %p8442_p4, %p9929_p11 }
0x17b0   : > { %p8448_p1 = por %p8447_p13, %p8446_p8 }
0x17b1   : > { %p8444_p7 = pneg %p8443_p12 }
0x17b2   : > { %p8450_p9 = por %p8449_p6, %p8448_p1 }
0x17b4   : > { %p8451_p5 = pnand %p8450_p9, %p8444_p7 }
0x17b6   : > { %8454 = shalt.err (!%p8451_p5)
}
0x17b7   : > { %8040 = dma.vmem_to_hbm [thread:$0]  (%p9929_p11), %s9822_s1, 128, %s9820_s22, %s6576_s16  }
0x17b8 PF: > { %s9933_s13 = sld [smem:[#allocation20_spill]]  ;;  %s9934_s24 = sld [smem:[#allocation18_spill]] }
0x17b9   : > { %s9935_s23 = sld [smem:[#allocation24_spill]] }
0x17be   : > { %p8072_p0 = scmp.ge.s32.totalorder %s9933_s13, 2  ;;  %s6619_s19 = sand.u32 1, %s9934_s24  }
0x17bf   : > { %p9936_p10 = scmp.ne.s32.totalorder %s9935_s23, 0  ;;  %s6620_s28 = scalar_lea.sflag [#allocation4], %s6619_s19 }
0x17c1   : > { %p8058_p2 = pnand %p8072_p0, %p9936_p10 }
0x17c3   : > { %8484 = dma.done.wait (!%p8058_p2), %s6620_s28, 128  }
0x17c4   : > { %8486 = vsyncadd (!%p8058_p2), %s6620_s28, 4294967168  ;;  %s6629_s30 = scalar_lea.sflag [#allocation12], %s6619_s19 }
0x17c5   : > { %8488 = dma.done.wait (!%p8058_p2), %s6629_s30, 128  }
0x17c6   : > { %8490 = vsyncadd (!%p8058_p2), %s6629_s30, 4294967168  ;;  %s9937_s27 = sld [smem:[#allocation21_spill]]  ;;  %s9938_s0 = sld [smem:[#allocation19_spill]] }
0x17c7   : > { %s9939_s26 = sld [smem:[#allocation22_spill]]  ;;  %s9940_s24 = smov %s8497_s25 }
0x17cc   : > { %p34_p11 = scmp.ge.s32.totalorder %s9937_s27, 4   ;;  %s9941_s25 = smov %s9938_s0 }
0x17ce   :  { %36 = sbr.rel (!%p34_p11) target bundleno = 15 (0xf), region = 190 }
0x17d5   :  { %6634 = vsyncpa [#allocation3], 1 }
0x17d6   :  { %6636 = vsyncpa [#allocation3 + $0x1], 1 }
0x17d7   :  { %6637 = vsyncpa [#allocation6], 1 }
0x17d8   :  { %6638 = vsyncpa [#allocation9], 1 }
0x17d9   :  { %6639 = vsyncpa [#allocation4], 1 }
0x17da   :  { %6641 = vsyncpa [#allocation4 + $0x1], 1 }
0x17db   :  { %6642 = vsyncpa [#allocation12], 1 }
0x17dc   :  { %6644 = vsyncpa [#allocation12 + $0x1], 1 }

</bundles_post_ra>
